<compile_context>
chip_gen: v5e
topology: v5e:2x2
jax: 0.10.0
libtpu: 0.0.40
codegen_flags: <defaults>
</compile_context>

<pallas_src>
import math
import jax
import jax.numpy as jnp
from jax.experimental import pallas as pl
from jax.experimental.pallas import tpu as pltpu

# ---------------- config (small synthetic model) ----------------
D_MODEL = 32
N_HEADS = 4
D_K = D_MODEL // N_HEADS
D_FF = 64
N_LAYERS = 2
VOCAB = 16
EPS = 1e-6
MASK_SCALE = 1e9
SQRT_D = math.sqrt(D_MODEL)
VEC_W = 3 * D_MODEL            # row width of the packed small-operand blobs


# ---------------- in-kernel math helpers ----------------
def _layernorm(x, g, b):
    # torch.std (unbiased, N-1) + eps-added-to-std semantics (Annotated
    # Transformer LayerNorm, intentionally != nn.LayerNorm).  The divide is an
    # EUP reciprocal (approx) so it stays off the VALU critical path.
    mean = jnp.mean(x, axis=-1, keepdims=True)
    d = x - mean
    var = jnp.sum(d * d, axis=-1, keepdims=True) * (1.0 / (x.shape[-1] - 1))
    inv = pl.reciprocal(jnp.sqrt(var) + EPS, approx=True)
    return g * d * inv + b


def _mha(x_res, y_q, kv, wqkv, bqkv, wo, bo, add_mask):
    """Multi-head attention with all heads batched in one einsum pair.

    x_res: (Tq, D) residual; y_q: (Tq, D) normed query source;
    kv: None (self-attn) or (Tk, D) encoder memory (cross-attn);
    add_mask: (Tq, Tk) additive mask (0 keep / -1e9 drop), shared across heads.
    1/sqrt(d_k) is pre-folded into the Q slice of wqkv/bqkv.
    Returns x_res + out_proj(attention)."""
    D, H, Dk = D_MODEL, N_HEADS, D_K
    Tq = y_q.shape[0]
    if kv is None:
        # fused, single (Tq, 3D) QKV projection
        qkv = jnp.dot(y_q, wqkv, preferred_element_type=jnp.float32) + bqkv
        q, k, v = qkv[:, :D], qkv[:, D:2 * D], qkv[:, 2 * D:]
    else:
        q = jnp.dot(y_q, wqkv[:, :D], preferred_element_type=jnp.float32) + bqkv[:, :D]
        kvp = jnp.dot(kv, wqkv[:, D:], preferred_element_type=jnp.float32) + bqkv[:, D:]
        k, v = kvp[:, :D], kvp[:, D:]

    # (T, D) -> (H, T, Dk) head-major, then one batched dot per phase.
    qh = jnp.stack([q[:, h * Dk:(h + 1) * Dk] for h in range(H)], axis=0)
    kh = jnp.stack([k[:, h * Dk:(h + 1) * Dk] for h in range(H)], axis=0)
    vh = jnp.stack([v[:, h * Dk:(h + 1) * Dk] for h in range(H)], axis=0)

    s = jnp.einsum("hqd,hkd->hqk", qh, kh,
                   preferred_element_type=jnp.float32)          # (H, Tq, Tk)
    s = s + add_mask[None, :, :]                                # head-invariant add
    s = s - jnp.max(s, axis=-1, keepdims=True)
    p = jnp.exp(s)
    p = p * pl.reciprocal(jnp.sum(p, axis=-1, keepdims=True), approx=True)
    ctx = jnp.einsum("hqk,hkd->hqd", p, vh,
                     preferred_element_type=jnp.float32)        # (H, Tq, Dk)
    ctx = jnp.concatenate([ctx[h] for h in range(H)], axis=-1)  # (Tq, D)
    return x_res + jnp.dot(ctx, wo, preferred_element_type=jnp.float32) + bo


def _encoder_stack(x, mask, wqkv_ref, wo_ref, w1_ref, w2_ref, vecs_ref, fln_ref):
    D, F = D_MODEL, D_FF
    for l in range(N_LAYERS):                  # static unroll, L=2
        vecs = vecs_ref[l]                     # (8, 3D) packed small operands
        bqkv, bo = vecs[0:1, :], vecs[1:2, :D]
        b1, b2 = vecs[2:3, :F], vecs[3:4, :D]
        g1, be1 = vecs[4:5, :D], vecs[5:6, :D]
        g2, be2 = vecs[6:7, :D], vecs[7:8, :D]

        y = _layernorm(x, g1, be1)
        x = _mha(x, y, None, wqkv_ref[l], bqkv, wo_ref[l], bo, mask)
        y = _layernorm(x, g2, be2)
        h = jnp.maximum(
            jnp.dot(y, w1_ref[l], preferred_element_type=jnp.float32) + b1, 0.0)
        x = x + jnp.dot(h, w2_ref[l], preferred_element_type=jnp.float32) + b2
    fln = fln_ref[...]
    return _layernorm(x, fln[0:1, :], fln[1:2, :])


def _decoder_stack(x, mem, self_mask, cross_mask, wqkv_s_ref, wo_s_ref,
                   wqkv_c_ref, wo_c_ref, w1_ref, w2_ref, vecs_ref, fln_ref):
    D, F = D_MODEL, D_FF
    for l in range(N_LAYERS):                  # static unroll, L=2
        vecs = vecs_ref[l]                     # (12, 3D) packed small operands
        bqkv_s, bo_s = vecs[0:1, :], vecs[1:2, :D]
        bqkv_c, bo_c = vecs[2:3, :], vecs[3:4, :D]
        b1, b2 = vecs[4:5, :F], vecs[5:6, :D]
        g1, be1 = vecs[6:7, :D], vecs[7:8, :D]
        g2, be2 = vecs[8:9, :D], vecs[9:10, :D]
        g3, be3 = vecs[10:11, :D], vecs[11:12, :D]

        y = _layernorm(x, g1, be1)
        x = _mha(x, y, None, wqkv_s_ref[l], bqkv_s, wo_s_ref[l], bo_s, self_mask)
        y = _layernorm(x, g2, be2)
        x = _mha(x, y, mem, wqkv_c_ref[l], bqkv_c, wo_c_ref[l], bo_c, cross_mask)
        y = _layernorm(x, g3, be3)
        h = jnp.maximum(
            jnp.dot(y, w1_ref[l], preferred_element_type=jnp.float32) + b1, 0.0)
        x = x + jnp.dot(h, w2_ref[l], preferred_element_type=jnp.float32) + b2
    fln = fln_ref[...]
    return _layernorm(x, fln[0:1, :], fln[1:2, :])


# ---------------- single fused forward kernel ----------------
def _make_forward_kernel(S, T):
    def kernel(src_ids, tgt_ids,                          # SMEM scalar-prefetch
               src_lut, tgt_lut, pe,
               enc_mask, dec_mask, cross_mask,
               e_wqkv, e_wo, e_w1, e_w2, e_vecs, e_fln,
               d_wqkv_s, d_wo_s, d_wqkv_c, d_wo_c, d_w1, d_w2, d_vecs, d_fln,
               out_ref):
        b = pl.program_id(0)
        pe_all = pe[...]

        # ---- embeddings: SMEM token ids -> dynamic VMEM row gathers + pos enc
        src_rows = [src_lut[pl.ds(src_ids[b, t], 1), :] for t in range(S)]
        x_src = jnp.concatenate(src_rows, axis=0) * SQRT_D + pe_all[:S, :]
        tgt_rows = [tgt_lut[pl.ds(tgt_ids[b, t], 1), :] for t in range(T)]
        x_tgt = jnp.concatenate(tgt_rows, axis=0) * SQRT_D + pe_all[:T, :]

        # ---- encoder -> memory (stays in VMEM), then decoder
        mem = _encoder_stack(x_src, enc_mask[0],
                             e_wqkv, e_wo, e_w1, e_w2, e_vecs, e_fln)
        out = _decoder_stack(x_tgt, mem, dec_mask[0], cross_mask[0],
                             d_wqkv_s, d_wo_s, d_wqkv_c, d_wo_c,
                             d_w1, d_w2, d_vecs, d_fln)
        out_ref[0] = out
    return kernel


def transformer_forward(params, src, tgt, src_mask, tgt_mask):
    B, S = src.shape
    T = tgt.shape[1]
    D, L = D_MODEL, N_LAYERS
    f32 = jnp.float32

    # Precomputed additive masks (0 keep / -1e9 drop), shared across heads.
    src_keep = src_mask.astype(f32).reshape(B, -1, S)        # (B, 1, S)
    tgt_keep = tgt_mask.astype(f32).reshape(B, -1, T)        # (B, T, T)
    enc_mask = (jnp.broadcast_to(src_keep, (B, S, S)) - 1.0) * MASK_SCALE
    cross_mask = (jnp.broadcast_to(src_keep[:, :1, :], (B, T, S)) - 1.0) * MASK_SCALE
    dec_mask = (jnp.broadcast_to(tgt_keep, (B, T, T)) - 1.0) * MASK_SCALE

    Smax = max(S, T)
    pe_in = params["pe"][:Smax, :]
    enc, dec = params["enc"], params["dec"]

    def full(shape):                  # whole array resident, constant block idx
        nd = len(shape)
        return pl.BlockSpec(shape, lambda *args: (0,) * nd)

    def per_b(shape):                 # one batch row per grid step
        return pl.BlockSpec(shape, lambda b, *_: (b, 0, 0))

    grid_spec = pltpu.PrefetchScalarGridSpec(
        num_scalar_prefetch=2,                     # src_ids, tgt_ids -> SMEM
        grid=(B,),
        in_specs=[
            full((VOCAB, D)), full((VOCAB, D)), full((Smax, D)),
            per_b((1, S, S)), per_b((1, T, T)), per_b((1, T, S)),
            # encoder weights (stacked across layers)
            full((L, D, 3 * D)), full((L, D, D)),
            full((L, D, D_FF)), full((L, D_FF, D)),
            full((L, 8, VEC_W)), full((2, D)),
            # decoder weights
            full((L, D, 3 * D)), full((L, D, D)),
            full((L, D, 3 * D)), full((L, D, D)),
            full((L, D, D_FF)), full((L, D_FF, D)),
            full((L, 12, VEC_W)), full((2, D)),
        ],
        out_specs=pl.BlockSpec((1, T, D), lambda b, *_: (b, 0, 0)),
    )

    out = pl.pallas_call(
        _make_forward_kernel(S, T),
        grid_spec=grid_spec,
        out_shape=jax.ShapeDtypeStruct((B, T, D), jnp.float32),
        compiler_params=pltpu.CompilerParams(
            dimension_semantics=("parallel",)),    # v7x: batch rows across TCs
    )(src, tgt,
      params["src_emb"], params["tgt_emb"], pe_in,
      enc_mask, dec_mask, cross_mask,
      enc["wqkv"], enc["wo"], enc["w1"], enc["w2"], enc["vecs"], enc["fln"],
      dec["wqkv_s"], dec["wo_s"], dec["wqkv_c"], dec["wo_c"],
      dec["w1"], dec["w2"], dec["vecs"], dec["fln"])
    return out


# ---------------- deterministic parameter init (packed for the fused kernel) -----
def _uniform(key, shape, d_in):
    bound = 1.0 / math.sqrt(d_in)
    return jax.random.uniform(key, shape, jnp.float32, -bound, bound)


def _pad_row(v, width):
    return jnp.zeros((1, width), jnp.float32).at[0, : v.shape[0]].set(v)


def _init_mha(key):
    ks = jax.random.split(key, 8)
    scale = 1.0 / math.sqrt(D_K)               # fold 1/sqrt(d_k) into W_q / b_q
    wq = _uniform(ks[0], (D_MODEL, D_MODEL), D_MODEL) * scale
    bq = _uniform(ks[1], (D_MODEL,), D_MODEL) * scale
    wk = _uniform(ks[2], (D_MODEL, D_MODEL), D_MODEL)
    bk = _uniform(ks[3], (D_MODEL,), D_MODEL)
    wv = _uniform(ks[4], (D_MODEL, D_MODEL), D_MODEL)
    bv = _uniform(ks[5], (D_MODEL,), D_MODEL)
    wo = _uniform(ks[6], (D_MODEL, D_MODEL), D_MODEL)
    bo = _uniform(ks[7], (D_MODEL,), D_MODEL)
    return {"wqkv": jnp.concatenate([wq, wk, wv], axis=1),
            "bqkv": jnp.concatenate([bq, bk, bv]),
            "wo": wo, "bo": bo}


def _init_ffn(key):
    k1, k2, k3, k4 = jax.random.split(key, 4)
    return {"w1": _uniform(k1, (D_MODEL, D_FF), D_MODEL),
            "b1": _uniform(k2, (D_FF,), D_MODEL),
            "w2": _uniform(k3, (D_FF, D_MODEL), D_FF),
            "b2": _uniform(k4, (D_MODEL,), D_FF)}


def _pack_encoder(layer_keys):
    ones = jnp.ones((D_MODEL,), jnp.float32)
    zeros = jnp.zeros((D_MODEL,), jnp.float32)
    wqkv, wo, w1, w2, vecs = [], [], [], [], []
    for k in layer_keys:
        ka, kb = jax.random.split(k)
        a, f = _init_mha(ka), _init_ffn(kb)
        wqkv.append(a["wqkv"]); wo.append(a["wo"])
        w1.append(f["w1"]); w2.append(f["w2"])
        vecs.append(jnp.concatenate([
            a["bqkv"][None, :],
            _pad_row(a["bo"], VEC_W), _pad_row(f["b1"], VEC_W),
            _pad_row(f["b2"], VEC_W),
            _pad_row(ones, VEC_W), _pad_row(zeros, VEC_W),   # ln1 g, b
            _pad_row(ones, VEC_W), _pad_row(zeros, VEC_W)],  # ln2 g, b
            axis=0))
    return {"wqkv": jnp.stack(wqkv), "wo": jnp.stack(wo),
            "w1": jnp.stack(w1), "w2": jnp.stack(w2),
            "vecs": jnp.stack(vecs), "fln": jnp.stack([ones, zeros])}


def _pack_decoder(layer_keys):
    ones = jnp.ones((D_MODEL,), jnp.float32)
    zeros = jnp.zeros((D_MODEL,), jnp.float32)
    wqkv_s, wo_s, wqkv_c, wo_c, w1, w2, vecs = [], [], [], [], [], [], []
    for k in layer_keys:
        ka, kb, kc = jax.random.split(k, 3)
        s, c, f = _init_mha(ka), _init_mha(kb), _init_ffn(kc)
        wqkv_s.append(s["wqkv"]); wo_s.append(s["wo"])
        wqkv_c.append(c["wqkv"]); wo_c.append(c["wo"])
        w1.append(f["w1"]); w2.append(f["w2"])
        vecs.append(jnp.concatenate([
            s["bqkv"][None, :], _pad_row(s["bo"], VEC_W),
            c["bqkv"][None, :], _pad_row(c["bo"], VEC_W),
            _pad_row(f["b1"], VEC_W), _pad_row(f["b2"], VEC_W),
            _pad_row(ones, VEC_W), _pad_row(zeros, VEC_W),   # ln1
            _pad_row(ones, VEC_W), _pad_row(zeros, VEC_W),   # ln2
            _pad_row(ones, VEC_W), _pad_row(zeros, VEC_W)],  # ln3
            axis=0))
    return {"wqkv_s": jnp.stack(wqkv_s), "wo_s": jnp.stack(wo_s),
            "wqkv_c": jnp.stack(wqkv_c), "wo_c": jnp.stack(wo_c),
            "w1": jnp.stack(w1), "w2": jnp.stack(w2),
            "vecs": jnp.stack(vecs), "fln": jnp.stack([ones, zeros])}


def positional_encoding(max_len, d_model):
    pos = jnp.arange(max_len, dtype=jnp.float32)[:, None]
    div = jnp.exp(jnp.arange(0, d_model, 2, dtype=jnp.float32)
                  * (-math.log(10000.0) / d_model))
    pe = jnp.zeros((max_len, d_model), jnp.float32)
    pe = pe.at[:, 0::2].set(jnp.sin(pos * div))
    pe = pe.at[:, 1::2].set(jnp.cos(pos * div))
    return pe


def init_params(key, max_len):
    keys = jax.random.split(key, 2 + 2 * N_LAYERS)
    return {
        "src_emb": jax.random.normal(keys[0], (VOCAB, D_MODEL), jnp.float32),
        "tgt_emb": jax.random.normal(keys[1], (VOCAB, D_MODEL), jnp.float32),
        "pe": positional_encoding(max_len, D_MODEL),
        "enc": _pack_encoder(list(keys[2:2 + N_LAYERS])),
        "dec": _pack_decoder(list(keys[2 + N_LAYERS:2 + 2 * N_LAYERS])),
    }


# ---------------- main ----------------
if __name__ == "__main__":
    B, S, T = 2, 8, 8
    key = jax.random.PRNGKey(0)
    k_src, k_tgt, k_par = jax.random.split(key, 3)

    src = jax.random.randint(k_src, (B, S), 0, VOCAB, dtype=jnp.int32)
    tgt = jax.random.randint(k_tgt, (B, T), 0, VOCAB, dtype=jnp.int32)
    src_mask = jnp.ones((B, 1, 1, S), jnp.float32)
    tgt_mask = jnp.broadcast_to(
        jnp.tril(jnp.ones((T, T), jnp.float32))[None, None, :, :], (B, 1, T, T))

    params = init_params(k_par, max_len=64)

    fwd = jax.jit(transformer_forward)
    out = jax.block_until_ready(fwd(params, src, tgt, src_mask, tgt_mask))
    assert out.shape == (B, T, D_MODEL)
    assert bool(jnp.all(jnp.isfinite(out)))
    print("KERNEL_OK")
</pallas_src>

<mosaic_0001>
module attributes {stable_mosaic.version = 11 : i64} {
  func.func @kernel(%arg0: i32, %arg1: memref<2x8xi32, #tpu.memory_space<smem>>, %arg2: memref<2x8xi32, #tpu.memory_space<smem>>, %arg3: memref<16x32xf32, #tpu.memory_space<vmem>>, %arg4: memref<16x32xf32, #tpu.memory_space<vmem>>, %arg5: memref<8x32xf32, #tpu.memory_space<vmem>>, %arg6: memref<1x8x8xf32, #tpu.memory_space<vmem>>, %arg7: memref<1x8x8xf32, #tpu.memory_space<vmem>>, %arg8: memref<1x8x8xf32, #tpu.memory_space<vmem>>, %arg9: memref<2x32x96xf32, #tpu.memory_space<vmem>>, %arg10: memref<2x32x32xf32, #tpu.memory_space<vmem>>, %arg11: memref<2x32x64xf32, #tpu.memory_space<vmem>>, %arg12: memref<2x64x32xf32, #tpu.memory_space<vmem>>, %arg13: memref<2x8x96xf32, #tpu.memory_space<vmem>>, %arg14: memref<2x32xf32, #tpu.memory_space<vmem>>, %arg15: memref<2x32x96xf32, #tpu.memory_space<vmem>>, %arg16: memref<2x32x32xf32, #tpu.memory_space<vmem>>, %arg17: memref<2x32x96xf32, #tpu.memory_space<vmem>>, %arg18: memref<2x32x32xf32, #tpu.memory_space<vmem>>, %arg19: memref<2x32x64xf32, #tpu.memory_space<vmem>>, %arg20: memref<2x64x32xf32, #tpu.memory_space<vmem>>, %arg21: memref<2x12x96xf32, #tpu.memory_space<vmem>>, %arg22: memref<2x32xf32, #tpu.memory_space<vmem>>, %arg23: memref<1x8x32xf32, #tpu.memory_space<vmem>>) attributes {dimension_semantics = [#tpu.dimension_semantics<parallel>], iteration_bounds = array<i64: 2>, scalar_prefetch = 2 : i64, scratch_operands = 0 : i64, tpu.core_type = #tpu.core_type<tc>, window_params = [{pipeline_mode = #tpu.pipeline_mode<synchronous>, transform_indices = @transform_0, window_bounds = array<i64: 16, 32>}, {pipeline_mode = #tpu.pipeline_mode<synchronous>, transform_indices = @transform_1, window_bounds = array<i64: 16, 32>}, {pipeline_mode = #tpu.pipeline_mode<synchronous>, transform_indices = @transform_2, window_bounds = array<i64: 8, 32>}, {transform_indices = @transform_3, window_bounds = array<i64: 1, 8, 8>}, {transform_indices = @transform_4, window_bounds = array<i64: 1, 8, 8>}, {transform_indices = @transform_5, window_bounds = array<i64: 1, 8, 8>}, {pipeline_mode = #tpu.pipeline_mode<synchronous>, transform_indices = @transform_6, window_bounds = array<i64: 2, 32, 96>}, {pipeline_mode = #tpu.pipeline_mode<synchronous>, transform_indices = @transform_7, window_bounds = array<i64: 2, 32, 32>}, {pipeline_mode = #tpu.pipeline_mode<synchronous>, transform_indices = @transform_8, window_bounds = array<i64: 2, 32, 64>}, {pipeline_mode = #tpu.pipeline_mode<synchronous>, transform_indices = @transform_9, window_bounds = array<i64: 2, 64, 32>}, {pipeline_mode = #tpu.pipeline_mode<synchronous>, transform_indices = @transform_10, window_bounds = array<i64: 2, 8, 96>}, {pipeline_mode = #tpu.pipeline_mode<synchronous>, transform_indices = @transform_11, window_bounds = array<i64: 2, 32>}, {pipeline_mode = #tpu.pipeline_mode<synchronous>, transform_indices = @transform_12, window_bounds = array<i64: 2, 32, 96>}, {pipeline_mode = #tpu.pipeline_mode<synchronous>, transform_indices = @transform_13, window_bounds = array<i64: 2, 32, 32>}, {pipeline_mode = #tpu.pipeline_mode<synchronous>, transform_indices = @transform_14, window_bounds = array<i64: 2, 32, 96>}, {pipeline_mode = #tpu.pipeline_mode<synchronous>, transform_indices = @transform_15, window_bounds = array<i64: 2, 32, 32>}, {pipeline_mode = #tpu.pipeline_mode<synchronous>, transform_indices = @transform_16, window_bounds = array<i64: 2, 32, 64>}, {pipeline_mode = #tpu.pipeline_mode<synchronous>, transform_indices = @transform_17, window_bounds = array<i64: 2, 64, 32>}, {pipeline_mode = #tpu.pipeline_mode<synchronous>, transform_indices = @transform_18, window_bounds = array<i64: 2, 12, 96>}, {pipeline_mode = #tpu.pipeline_mode<synchronous>, transform_indices = @transform_19, window_bounds = array<i64: 2, 32>}, {transform_indices = @transform_20, window_bounds = array<i64: 1, 8, 32>}]} {
    %c0 = arith.constant 0 : index
    %c0_0 = arith.constant 0 : index
    %0 = vector.load %arg5[%c0, %c0_0] : memref<8x32xf32, #tpu.memory_space<vmem>>, vector<8x32xf32>
    %1 = arith.index_cast %arg0 : i32 to index
    %c0_1 = arith.constant 0 : index
    %2 = memref.load %arg1[%1, %c0_1] : memref<2x8xi32, #tpu.memory_space<smem>>
    %3 = arith.index_cast %2 : i32 to index
    %c0_2 = arith.constant 0 : index
    %4 = vector.load %arg3[%3, %c0_2] : memref<16x32xf32, #tpu.memory_space<vmem>>, vector<1x32xf32>
    %5 = arith.index_cast %arg0 : i32 to index
    %c1 = arith.constant 1 : index
    %6 = memref.load %arg1[%5, %c1] : memref<2x8xi32, #tpu.memory_space<smem>>
    %7 = arith.index_cast %6 : i32 to index
    %c0_3 = arith.constant 0 : index
    %8 = vector.load %arg3[%7, %c0_3] : memref<16x32xf32, #tpu.memory_space<vmem>>, vector<1x32xf32>
    %9 = arith.index_cast %arg0 : i32 to index
    %c2 = arith.constant 2 : index
    %10 = memref.load %arg1[%9, %c2] : memref<2x8xi32, #tpu.memory_space<smem>>
    %11 = arith.index_cast %10 : i32 to index
    %c0_4 = arith.constant 0 : index
    %12 = vector.load %arg3[%11, %c0_4] : memref<16x32xf32, #tpu.memory_space<vmem>>, vector<1x32xf32>
    %13 = arith.index_cast %arg0 : i32 to index
    %c3 = arith.constant 3 : index
    %14 = memref.load %arg1[%13, %c3] : memref<2x8xi32, #tpu.memory_space<smem>>
    %15 = arith.index_cast %14 : i32 to index
    %c0_5 = arith.constant 0 : index
    %16 = vector.load %arg3[%15, %c0_5] : memref<16x32xf32, #tpu.memory_space<vmem>>, vector<1x32xf32>
    %17 = arith.index_cast %arg0 : i32 to index
    %c4 = arith.constant 4 : index
    %18 = memref.load %arg1[%17, %c4] : memref<2x8xi32, #tpu.memory_space<smem>>
    %19 = arith.index_cast %18 : i32 to index
    %c0_6 = arith.constant 0 : index
    %20 = vector.load %arg3[%19, %c0_6] : memref<16x32xf32, #tpu.memory_space<vmem>>, vector<1x32xf32>
    %21 = arith.index_cast %arg0 : i32 to index
    %c5 = arith.constant 5 : index
    %22 = memref.load %arg1[%21, %c5] : memref<2x8xi32, #tpu.memory_space<smem>>
    %23 = arith.index_cast %22 : i32 to index
    %c0_7 = arith.constant 0 : index
    %24 = vector.load %arg3[%23, %c0_7] : memref<16x32xf32, #tpu.memory_space<vmem>>, vector<1x32xf32>
    %25 = arith.index_cast %arg0 : i32 to index
    %c6 = arith.constant 6 : index
    %26 = memref.load %arg1[%25, %c6] : memref<2x8xi32, #tpu.memory_space<smem>>
    %27 = arith.index_cast %26 : i32 to index
    %c0_8 = arith.constant 0 : index
    %28 = vector.load %arg3[%27, %c0_8] : memref<16x32xf32, #tpu.memory_space<vmem>>, vector<1x32xf32>
    %29 = arith.index_cast %arg0 : i32 to index
    %c7 = arith.constant 7 : index
    %30 = memref.load %arg1[%29, %c7] : memref<2x8xi32, #tpu.memory_space<smem>>
    %31 = arith.index_cast %30 : i32 to index
    %c0_9 = arith.constant 0 : index
    %32 = vector.load %arg3[%31, %c0_9] : memref<16x32xf32, #tpu.memory_space<vmem>>, vector<1x32xf32>
    %33 = tpu.concatenate %4, %8, %12, %16, %20, %24, %28, %32 in 0 : vector<1x32xf32>, vector<1x32xf32>, vector<1x32xf32>, vector<1x32xf32>, vector<1x32xf32>, vector<1x32xf32>, vector<1x32xf32>, vector<1x32xf32> -> vector<8x32xf32>
    %cst = arith.constant 5.65685415 : f32
    %34 = vector.broadcast %cst : f32 to vector<8x32xf32>
    %35 = arith.mulf %33, %34 : vector<8x32xf32>
    %36 = arith.addf %35, %0 : vector<8x32xf32>
    %37 = arith.index_cast %arg0 : i32 to index
    %c0_10 = arith.constant 0 : index
    %38 = memref.load %arg2[%37, %c0_10] : memref<2x8xi32, #tpu.memory_space<smem>>
    %39 = arith.index_cast %38 : i32 to index
    %c0_11 = arith.constant 0 : index
    %40 = vector.load %arg4[%39, %c0_11] : memref<16x32xf32, #tpu.memory_space<vmem>>, vector<1x32xf32>
    %41 = arith.index_cast %arg0 : i32 to index
    %c1_12 = arith.constant 1 : index
    %42 = memref.load %arg2[%41, %c1_12] : memref<2x8xi32, #tpu.memory_space<smem>>
    %43 = arith.index_cast %42 : i32 to index
    %c0_13 = arith.constant 0 : index
    %44 = vector.load %arg4[%43, %c0_13] : memref<16x32xf32, #tpu.memory_space<vmem>>, vector<1x32xf32>
    %45 = arith.index_cast %arg0 : i32 to index
    %c2_14 = arith.constant 2 : index
    %46 = memref.load %arg2[%45, %c2_14] : memref<2x8xi32, #tpu.memory_space<smem>>
    %47 = arith.index_cast %46 : i32 to index
    %c0_15 = arith.constant 0 : index
    %48 = vector.load %arg4[%47, %c0_15] : memref<16x32xf32, #tpu.memory_space<vmem>>, vector<1x32xf32>
    %49 = arith.index_cast %arg0 : i32 to index
    %c3_16 = arith.constant 3 : index
    %50 = memref.load %arg2[%49, %c3_16] : memref<2x8xi32, #tpu.memory_space<smem>>
    %51 = arith.index_cast %50 : i32 to index
    %c0_17 = arith.constant 0 : index
    %52 = vector.load %arg4[%51, %c0_17] : memref<16x32xf32, #tpu.memory_space<vmem>>, vector<1x32xf32>
    %53 = arith.index_cast %arg0 : i32 to index
    %c4_18 = arith.constant 4 : index
    %54 = memref.load %arg2[%53, %c4_18] : memref<2x8xi32, #tpu.memory_space<smem>>
    %55 = arith.index_cast %54 : i32 to index
    %c0_19 = arith.constant 0 : index
    %56 = vector.load %arg4[%55, %c0_19] : memref<16x32xf32, #tpu.memory_space<vmem>>, vector<1x32xf32>
    %57 = arith.index_cast %arg0 : i32 to index
    %c5_20 = arith.constant 5 : index
    %58 = memref.load %arg2[%57, %c5_20] : memref<2x8xi32, #tpu.memory_space<smem>>
    %59 = arith.index_cast %58 : i32 to index
    %c0_21 = arith.constant 0 : index
    %60 = vector.load %arg4[%59, %c0_21] : memref<16x32xf32, #tpu.memory_space<vmem>>, vector<1x32xf32>
    %61 = arith.index_cast %arg0 : i32 to index
    %c6_22 = arith.constant 6 : index
    %62 = memref.load %arg2[%61, %c6_22] : memref<2x8xi32, #tpu.memory_space<smem>>
    %63 = arith.index_cast %62 : i32 to index
    %c0_23 = arith.constant 0 : index
    %64 = vector.load %arg4[%63, %c0_23] : memref<16x32xf32, #tpu.memory_space<vmem>>, vector<1x32xf32>
    %65 = arith.index_cast %arg0 : i32 to index
    %c7_24 = arith.constant 7 : index
    %66 = memref.load %arg2[%65, %c7_24] : memref<2x8xi32, #tpu.memory_space<smem>>
    %67 = arith.index_cast %66 : i32 to index
    %c0_25 = arith.constant 0 : index
    %68 = vector.load %arg4[%67, %c0_25] : memref<16x32xf32, #tpu.memory_space<vmem>>, vector<1x32xf32>
    %69 = tpu.concatenate %40, %44, %48, %52, %56, %60, %64, %68 in 0 : vector<1x32xf32>, vector<1x32xf32>, vector<1x32xf32>, vector<1x32xf32>, vector<1x32xf32>, vector<1x32xf32>, vector<1x32xf32>, vector<1x32xf32> -> vector<8x32xf32>
    %cst_26 = arith.constant 5.65685415 : f32
    %70 = vector.broadcast %cst_26 : f32 to vector<8x32xf32>
    %71 = arith.mulf %69, %70 : vector<8x32xf32>
    %72 = arith.addf %71, %0 : vector<8x32xf32>
    %c0_27 = arith.constant 0 : index
    %c0_28 = arith.constant 0 : index
    %c0_29 = arith.constant 0 : index
    %73 = vector.load %arg6[%c0_27, %c0_28, %c0_29] : memref<1x8x8xf32, #tpu.memory_space<vmem>>, vector<1x8x8xf32>
    %74 = vector.shape_cast %73 : vector<1x8x8xf32> to vector<8x8xf32>
    %c0_30 = arith.constant 0 : index
    %c0_31 = arith.constant 0 : index
    %c0_32 = arith.constant 0 : index
    %75 = vector.load %arg13[%c0_30, %c0_31, %c0_32] : memref<2x8x96xf32, #tpu.memory_space<vmem>>, vector<1x8x96xf32>
    %76 = vector.shape_cast %75 : vector<1x8x96xf32> to vector<8x96xf32>
    %77 = vector.extract_strided_slice %76 {offsets = [0, 0], sizes = [1, 96], strides = [1, 1]} : vector<8x96xf32> to vector<1x96xf32>
    %78 = vector.extract_strided_slice %76 {offsets = [1, 0], sizes = [1, 32], strides = [1, 1]} : vector<8x96xf32> to vector<1x32xf32>
    %79 = vector.extract_strided_slice %76 {offsets = [2, 0], sizes = [1, 64], strides = [1, 1]} : vector<8x96xf32> to vector<1x64xf32>
    %80 = vector.extract_strided_slice %76 {offsets = [3, 0], sizes = [1, 32], strides = [1, 1]} : vector<8x96xf32> to vector<1x32xf32>
    %81 = vector.extract_strided_slice %76 {offsets = [4, 0], sizes = [1, 32], strides = [1, 1]} : vector<8x96xf32> to vector<1x32xf32>
    %82 = vector.extract_strided_slice %76 {offsets = [5, 0], sizes = [1, 32], strides = [1, 1]} : vector<8x96xf32> to vector<1x32xf32>
    %83 = vector.extract_strided_slice %76 {offsets = [6, 0], sizes = [1, 32], strides = [1, 1]} : vector<8x96xf32> to vector<1x32xf32>
    %84 = vector.extract_strided_slice %76 {offsets = [7, 0], sizes = [1, 32], strides = [1, 1]} : vector<8x96xf32> to vector<1x32xf32>
    %cst_33 = arith.constant dense<0.000000e+00> : vector<8xf32>
    %85 = vector.multi_reduction <add>, %36, %cst_33 [1] : vector<8x32xf32> to vector<8xf32>
    %86 = vector.shape_cast %85 : vector<8xf32> to vector<8x1xf32>
    %cst_34 = arith.constant 3.200000e+01 : f32
    %87 = vector.broadcast %cst_34 : f32 to vector<8x1xf32>
    %88 = arith.divf %86, %87 : vector<8x1xf32>
    %89 = vector.broadcast %88 : vector<8x1xf32> to vector<8x32xf32>
    %90 = arith.subf %36, %89 : vector<8x32xf32>
    %91 = arith.mulf %90, %90 : vector<8x32xf32>
    %cst_35 = arith.constant dense<0.000000e+00> : vector<8xf32>
    %92 = vector.multi_reduction <add>, %91, %cst_35 [1] : vector<8x32xf32> to vector<8xf32>
    %93 = vector.shape_cast %92 : vector<8xf32> to vector<8x1xf32>
    %cst_36 = arith.constant 0.0322580636 : f32
    %94 = vector.broadcast %cst_36 : f32 to vector<8x1xf32>
    %95 = arith.mulf %93, %94 : vector<8x1xf32>
    %96 = math.sqrt %95 : vector<8x1xf32>
    %cst_37 = arith.constant 9.99999997E-7 : f32
    %97 = vector.broadcast %cst_37 : f32 to vector<8x1xf32>
    %98 = arith.addf %96, %97 : vector<8x1xf32>
    %99 = tpu.reciprocal %98 {approx = true} : vector<8x1xf32> -> vector<8x1xf32>
    %100 = vector.broadcast %81 : vector<1x32xf32> to vector<8x32xf32>
    %101 = arith.mulf %100, %90 : vector<8x32xf32>
    %102 = vector.broadcast %99 : vector<8x1xf32> to vector<8x32xf32>
    %103 = arith.mulf %101, %102 : vector<8x32xf32>
    %104 = vector.broadcast %82 : vector<1x32xf32> to vector<8x32xf32>
    %105 = arith.addf %103, %104 : vector<8x32xf32>
    %c0_38 = arith.constant 0 : index
    %c0_39 = arith.constant 0 : index
    %c0_40 = arith.constant 0 : index
    %106 = vector.load %arg9[%c0_38, %c0_39, %c0_40] : memref<2x32x96xf32, #tpu.memory_space<vmem>>, vector<1x32x96xf32>
    %107 = vector.shape_cast %106 : vector<1x32x96xf32> to vector<32x96xf32>
    %c0_41 = arith.constant 0 : index
    %c0_42 = arith.constant 0 : index
    %c0_43 = arith.constant 0 : index
    %108 = vector.load %arg10[%c0_41, %c0_42, %c0_43] : memref<2x32x32xf32, #tpu.memory_space<vmem>>, vector<1x32x32xf32>
    %109 = vector.shape_cast %108 : vector<1x32x32xf32> to vector<32x32xf32>
    %cst_44 = arith.constant dense<0.000000e+00> : vector<8x96xf32>
    %110 = tpu.matmul %105, %107, %cst_44 {dimension_numbers = #tpu.dot_dimension_numbers<[1], [0], [0], [1], [0, 0, 1, 1], [], []>} : vector<8x32xf32>, vector<32x96xf32>, vector<8x96xf32> -> vector<8x96xf32>
    %111 = vector.broadcast %77 : vector<1x96xf32> to vector<8x96xf32>
    %112 = arith.addf %110, %111 : vector<8x96xf32>
    %113 = vector.extract_strided_slice %112 {offsets = [0, 0], sizes = [8, 32], strides = [1, 1]} : vector<8x96xf32> to vector<8x32xf32>
    %114 = vector.extract_strided_slice %112 {offsets = [0, 32], sizes = [8, 32], strides = [1, 1]} : vector<8x96xf32> to vector<8x32xf32>
    %115 = vector.extract_strided_slice %112 {offsets = [0, 64], sizes = [8, 32], strides = [1, 1]} : vector<8x96xf32> to vector<8x32xf32>
    %116 = vector.extract_strided_slice %113 {offsets = [0, 0], sizes = [8, 8], strides = [1, 1]} : vector<8x32xf32> to vector<8x8xf32>
    %117 = vector.extract_strided_slice %113 {offsets = [0, 8], sizes = [8, 8], strides = [1, 1]} : vector<8x32xf32> to vector<8x8xf32>
    %118 = vector.extract_strided_slice %113 {offsets = [0, 16], sizes = [8, 8], strides = [1, 1]} : vector<8x32xf32> to vector<8x8xf32>
    %119 = vector.extract_strided_slice %113 {offsets = [0, 24], sizes = [8, 8], strides = [1, 1]} : vector<8x32xf32> to vector<8x8xf32>
    %120 = vector.shape_cast %116 : vector<8x8xf32> to vector<1x8x8xf32>
    %121 = vector.shape_cast %117 : vector<8x8xf32> to vector<1x8x8xf32>
    %122 = vector.shape_cast %118 : vector<8x8xf32> to vector<1x8x8xf32>
    %123 = vector.shape_cast %119 : vector<8x8xf32> to vector<1x8x8xf32>
    %124 = tpu.concatenate %120, %121, %122, %123 in 0 : vector<1x8x8xf32>, vector<1x8x8xf32>, vector<1x8x8xf32>, vector<1x8x8xf32> -> vector<4x8x8xf32>
    %125 = vector.extract_strided_slice %114 {offsets = [0, 0], sizes = [8, 8], strides = [1, 1]} : vector<8x32xf32> to vector<8x8xf32>
    %126 = vector.extract_strided_slice %114 {offsets = [0, 8], sizes = [8, 8], strides = [1, 1]} : vector<8x32xf32> to vector<8x8xf32>
    %127 = vector.extract_strided_slice %114 {offsets = [0, 16], sizes = [8, 8], strides = [1, 1]} : vector<8x32xf32> to vector<8x8xf32>
    %128 = vector.extract_strided_slice %114 {offsets = [0, 24], sizes = [8, 8], strides = [1, 1]} : vector<8x32xf32> to vector<8x8xf32>
    %129 = vector.shape_cast %125 : vector<8x8xf32> to vector<1x8x8xf32>
    %130 = vector.shape_cast %126 : vector<8x8xf32> to vector<1x8x8xf32>
    %131 = vector.shape_cast %127 : vector<8x8xf32> to vector<1x8x8xf32>
    %132 = vector.shape_cast %128 : vector<8x8xf32> to vector<1x8x8xf32>
    %133 = tpu.concatenate %129, %130, %131, %132 in 0 : vector<1x8x8xf32>, vector<1x8x8xf32>, vector<1x8x8xf32>, vector<1x8x8xf32> -> vector<4x8x8xf32>
    %134 = vector.extract_strided_slice %115 {offsets = [0, 0], sizes = [8, 8], strides = [1, 1]} : vector<8x32xf32> to vector<8x8xf32>
    %135 = vector.extract_strided_slice %115 {offsets = [0, 8], sizes = [8, 8], strides = [1, 1]} : vector<8x32xf32> to vector<8x8xf32>
    %136 = vector.extract_strided_slice %115 {offsets = [0, 16], sizes = [8, 8], strides = [1, 1]} : vector<8x32xf32> to vector<8x8xf32>
    %137 = vector.extract_strided_slice %115 {offsets = [0, 24], sizes = [8, 8], strides = [1, 1]} : vector<8x32xf32> to vector<8x8xf32>
    %138 = vector.shape_cast %134 : vector<8x8xf32> to vector<1x8x8xf32>
    %139 = vector.shape_cast %135 : vector<8x8xf32> to vector<1x8x8xf32>
    %140 = vector.shape_cast %136 : vector<8x8xf32> to vector<1x8x8xf32>
    %141 = vector.shape_cast %137 : vector<8x8xf32> to vector<1x8x8xf32>
    %142 = tpu.concatenate %138, %139, %140, %141 in 0 : vector<1x8x8xf32>, vector<1x8x8xf32>, vector<1x8x8xf32>, vector<1x8x8xf32> -> vector<4x8x8xf32>
    "tpu.trace_start"() <{level = 10 : i32, message = "hqd,hkd->hqk"}> : () -> ()
    %cst_45 = arith.constant dense<0.000000e+00> : vector<4x8x8xf32>
    %143 = tpu.matmul %124, %133, %cst_45 {dimension_numbers = #tpu.dot_dimension_numbers<[2], [2], [1], [1], [0, 0, 0, 1, 1, 1], [0], [0]>} : vector<4x8x8xf32>, vector<4x8x8xf32>, vector<4x8x8xf32> -> vector<4x8x8xf32>
    "tpu.trace_stop"() : () -> ()
    %144 = vector.shape_cast %74 : vector<8x8xf32> to vector<1x8x8xf32>
    %145 = vector.broadcast %144 : vector<1x8x8xf32> to vector<4x8x8xf32>
    %146 = arith.addf %143, %145 : vector<4x8x8xf32>
    %cst_46 = arith.constant dense<0xFF800000> : vector<4x8xf32>
    %147 = vector.multi_reduction <maximumf>, %146, %cst_46 [2] : vector<4x8x8xf32> to vector<4x8xf32>
    %148 = vector.shape_cast %147 : vector<4x8xf32> to vector<4x8x1xf32>
    %149 = vector.broadcast %148 : vector<4x8x1xf32> to vector<4x8x8xf32>
    %150 = arith.subf %146, %149 : vector<4x8x8xf32>
    %151 = math.exp %150 : vector<4x8x8xf32>
    %cst_47 = arith.constant dense<0.000000e+00> : vector<4x8xf32>
    %152 = vector.multi_reduction <add>, %151, %cst_47 [2] : vector<4x8x8xf32> to vector<4x8xf32>
    %153 = vector.shape_cast %152 : vector<4x8xf32> to vector<4x8x1xf32>
    %154 = tpu.reciprocal %153 {approx = true} : vector<4x8x1xf32> -> vector<4x8x1xf32>
    %155 = vector.broadcast %154 : vector<4x8x1xf32> to vector<4x8x8xf32>
    %156 = arith.mulf %151, %155 : vector<4x8x8xf32>
    "tpu.trace_start"() <{level = 10 : i32, message = "hqk,hkd->hqd"}> : () -> ()
    %cst_48 = arith.constant dense<0.000000e+00> : vector<4x8x8xf32>
    %157 = tpu.matmul %156, %142, %cst_48 {dimension_numbers = #tpu.dot_dimension_numbers<[2], [1], [1], [2], [0, 0, 0, 1, 1, 2], [0], [0]>} : vector<4x8x8xf32>, vector<4x8x8xf32>, vector<4x8x8xf32> -> vector<4x8x8xf32>
    "tpu.trace_stop"() : () -> ()
    %158 = vector.extract_strided_slice %157 {offsets = [0, 0, 0], sizes = [1, 8, 8], strides = [1, 1, 1]} : vector<4x8x8xf32> to vector<1x8x8xf32>
    %159 = vector.shape_cast %158 : vector<1x8x8xf32> to vector<8x8xf32>
    %160 = vector.extract_strided_slice %157 {offsets = [1, 0, 0], sizes = [1, 8, 8], strides = [1, 1, 1]} : vector<4x8x8xf32> to vector<1x8x8xf32>
    %161 = vector.shape_cast %160 : vector<1x8x8xf32> to vector<8x8xf32>
    %162 = vector.extract_strided_slice %157 {offsets = [2, 0, 0], sizes = [1, 8, 8], strides = [1, 1, 1]} : vector<4x8x8xf32> to vector<1x8x8xf32>
    %163 = vector.shape_cast %162 : vector<1x8x8xf32> to vector<8x8xf32>
    %164 = vector.extract_strided_slice %157 {offsets = [3, 0, 0], sizes = [1, 8, 8], strides = [1, 1, 1]} : vector<4x8x8xf32> to vector<1x8x8xf32>
    %165 = vector.shape_cast %164 : vector<1x8x8xf32> to vector<8x8xf32>
    %166 = tpu.concatenate %159, %161, %163, %165 in 1 : vector<8x8xf32>, vector<8x8xf32>, vector<8x8xf32>, vector<8x8xf32> -> vector<8x32xf32>
    %cst_49 = arith.constant dense<0.000000e+00> : vector<8x32xf32>
    %167 = tpu.matmul %166, %109, %cst_49 {dimension_numbers = #tpu.dot_dimension_numbers<[1], [0], [0], [1], [0, 0, 1, 1], [], []>} : vector<8x32xf32>, vector<32x32xf32>, vector<8x32xf32> -> vector<8x32xf32>
    %168 = arith.addf %36, %167 : vector<8x32xf32>
    %169 = vector.broadcast %78 : vector<1x32xf32> to vector<8x32xf32>
    %170 = arith.addf %168, %169 : vector<8x32xf32>
    %cst_50 = arith.constant dense<0.000000e+00> : vector<8xf32>
    %171 = vector.multi_reduction <add>, %170, %cst_50 [1] : vector<8x32xf32> to vector<8xf32>
    %172 = vector.shape_cast %171 : vector<8xf32> to vector<8x1xf32>
    %cst_51 = arith.constant 3.200000e+01 : f32
    %173 = vector.broadcast %cst_51 : f32 to vector<8x1xf32>
    %174 = arith.divf %172, %173 : vector<8x1xf32>
    %175 = vector.broadcast %174 : vector<8x1xf32> to vector<8x32xf32>
    %176 = arith.subf %170, %175 : vector<8x32xf32>
    %177 = arith.mulf %176, %176 : vector<8x32xf32>
    %cst_52 = arith.constant dense<0.000000e+00> : vector<8xf32>
    %178 = vector.multi_reduction <add>, %177, %cst_52 [1] : vector<8x32xf32> to vector<8xf32>
    %179 = vector.shape_cast %178 : vector<8xf32> to vector<8x1xf32>
    %cst_53 = arith.constant 0.0322580636 : f32
    %180 = vector.broadcast %cst_53 : f32 to vector<8x1xf32>
    %181 = arith.mulf %179, %180 : vector<8x1xf32>
    %182 = math.sqrt %181 : vector<8x1xf32>
    %cst_54 = arith.constant 9.99999997E-7 : f32
    %183 = vector.broadcast %cst_54 : f32 to vector<8x1xf32>
    %184 = arith.addf %182, %183 : vector<8x1xf32>
    %185 = tpu.reciprocal %184 {approx = true} : vector<8x1xf32> -> vector<8x1xf32>
    %186 = vector.broadcast %83 : vector<1x32xf32> to vector<8x32xf32>
    %187 = arith.mulf %186, %176 : vector<8x32xf32>
    %188 = vector.broadcast %185 : vector<8x1xf32> to vector<8x32xf32>
    %189 = arith.mulf %187, %188 : vector<8x32xf32>
    %190 = vector.broadcast %84 : vector<1x32xf32> to vector<8x32xf32>
    %191 = arith.addf %189, %190 : vector<8x32xf32>
    %c0_55 = arith.constant 0 : index
    %c0_56 = arith.constant 0 : index
    %c0_57 = arith.constant 0 : index
    %192 = vector.load %arg11[%c0_55, %c0_56, %c0_57] : memref<2x32x64xf32, #tpu.memory_space<vmem>>, vector<1x32x64xf32>
    %193 = vector.shape_cast %192 : vector<1x32x64xf32> to vector<32x64xf32>
    %cst_58 = arith.constant dense<0.000000e+00> : vector<8x64xf32>
    %194 = tpu.matmul %191, %193, %cst_58 {dimension_numbers = #tpu.dot_dimension_numbers<[1], [0], [0], [1], [0, 0, 1, 1], [], []>} : vector<8x32xf32>, vector<32x64xf32>, vector<8x64xf32> -> vector<8x64xf32>
    %195 = vector.broadcast %79 : vector<1x64xf32> to vector<8x64xf32>
    %196 = arith.addf %194, %195 : vector<8x64xf32>
    %cst_59 = arith.constant 0.000000e+00 : f32
    %197 = vector.broadcast %cst_59 : f32 to vector<8x64xf32>
    %198 = arith.maximumf %196, %197 : vector<8x64xf32>
    %c0_60 = arith.constant 0 : index
    %c0_61 = arith.constant 0 : index
    %c0_62 = arith.constant 0 : index
    %199 = vector.load %arg12[%c0_60, %c0_61, %c0_62] : memref<2x64x32xf32, #tpu.memory_space<vmem>>, vector<1x64x32xf32>
    %200 = vector.shape_cast %199 : vector<1x64x32xf32> to vector<64x32xf32>
    %cst_63 = arith.constant dense<0.000000e+00> : vector<8x32xf32>
    %201 = tpu.matmul %198, %200, %cst_63 {dimension_numbers = #tpu.dot_dimension_numbers<[1], [0], [0], [1], [0, 0, 1, 1], [], []>} : vector<8x64xf32>, vector<64x32xf32>, vector<8x32xf32> -> vector<8x32xf32>
    %202 = arith.addf %170, %201 : vector<8x32xf32>
    %203 = vector.broadcast %80 : vector<1x32xf32> to vector<8x32xf32>
    %204 = arith.addf %202, %203 : vector<8x32xf32>
    %c1_64 = arith.constant 1 : index
    %c0_65 = arith.constant 0 : index
    %c0_66 = arith.constant 0 : index
    %205 = vector.load %arg13[%c1_64, %c0_65, %c0_66] : memref<2x8x96xf32, #tpu.memory_space<vmem>>, vector<1x8x96xf32>
    %206 = vector.shape_cast %205 : vector<1x8x96xf32> to vector<8x96xf32>
    %207 = vector.extract_strided_slice %206 {offsets = [0, 0], sizes = [1, 96], strides = [1, 1]} : vector<8x96xf32> to vector<1x96xf32>
    %208 = vector.extract_strided_slice %206 {offsets = [1, 0], sizes = [1, 32], strides = [1, 1]} : vector<8x96xf32> to vector<1x32xf32>
    %209 = vector.extract_strided_slice %206 {offsets = [2, 0], sizes = [1, 64], strides = [1, 1]} : vector<8x96xf32> to vector<1x64xf32>
    %210 = vector.extract_strided_slice %206 {offsets = [3, 0], sizes = [1, 32], strides = [1, 1]} : vector<8x96xf32> to vector<1x32xf32>
    %211 = vector.extract_strided_slice %206 {offsets = [4, 0], sizes = [1, 32], strides = [1, 1]} : vector<8x96xf32> to vector<1x32xf32>
    %212 = vector.extract_strided_slice %206 {offsets = [5, 0], sizes = [1, 32], strides = [1, 1]} : vector<8x96xf32> to vector<1x32xf32>
    %213 = vector.extract_strided_slice %206 {offsets = [6, 0], sizes = [1, 32], strides = [1, 1]} : vector<8x96xf32> to vector<1x32xf32>
    %214 = vector.extract_strided_slice %206 {offsets = [7, 0], sizes = [1, 32], strides = [1, 1]} : vector<8x96xf32> to vector<1x32xf32>
    %cst_67 = arith.constant dense<0.000000e+00> : vector<8xf32>
    %215 = vector.multi_reduction <add>, %204, %cst_67 [1] : vector<8x32xf32> to vector<8xf32>
    %216 = vector.shape_cast %215 : vector<8xf32> to vector<8x1xf32>
    %cst_68 = arith.constant 3.200000e+01 : f32
    %217 = vector.broadcast %cst_68 : f32 to vector<8x1xf32>
    %218 = arith.divf %216, %217 : vector<8x1xf32>
    %219 = vector.broadcast %218 : vector<8x1xf32> to vector<8x32xf32>
    %220 = arith.subf %204, %219 : vector<8x32xf32>
    %221 = arith.mulf %220, %220 : vector<8x32xf32>
    %cst_69 = arith.constant dense<0.000000e+00> : vector<8xf32>
    %222 = vector.multi_reduction <add>, %221, %cst_69 [1] : vector<8x32xf32> to vector<8xf32>
    %223 = vector.shape_cast %222 : vector<8xf32> to vector<8x1xf32>
    %cst_70 = arith.constant 0.0322580636 : f32
    %224 = vector.broadcast %cst_70 : f32 to vector<8x1xf32>
    %225 = arith.mulf %223, %224 : vector<8x1xf32>
    %226 = math.sqrt %225 : vector<8x1xf32>
    %cst_71 = arith.constant 9.99999997E-7 : f32
    %227 = vector.broadcast %cst_71 : f32 to vector<8x1xf32>
    %228 = arith.addf %226, %227 : vector<8x1xf32>
    %229 = tpu.reciprocal %228 {approx = true} : vector<8x1xf32> -> vector<8x1xf32>
    %230 = vector.broadcast %211 : vector<1x32xf32> to vector<8x32xf32>
    %231 = arith.mulf %230, %220 : vector<8x32xf32>
    %232 = vector.broadcast %229 : vector<8x1xf32> to vector<8x32xf32>
    %233 = arith.mulf %231, %232 : vector<8x32xf32>
    %234 = vector.broadcast %212 : vector<1x32xf32> to vector<8x32xf32>
    %235 = arith.addf %233, %234 : vector<8x32xf32>
    %c1_72 = arith.constant 1 : index
    %c0_73 = arith.constant 0 : index
    %c0_74 = arith.constant 0 : index
    %236 = vector.load %arg9[%c1_72, %c0_73, %c0_74] : memref<2x32x96xf32, #tpu.memory_space<vmem>>, vector<1x32x96xf32>
    %237 = vector.shape_cast %236 : vector<1x32x96xf32> to vector<32x96xf32>
    %c1_75 = arith.constant 1 : index
    %c0_76 = arith.constant 0 : index
    %c0_77 = arith.constant 0 : index
    %238 = vector.load %arg10[%c1_75, %c0_76, %c0_77] : memref<2x32x32xf32, #tpu.memory_space<vmem>>, vector<1x32x32xf32>
    %239 = vector.shape_cast %238 : vector<1x32x32xf32> to vector<32x32xf32>
    %cst_78 = arith.constant dense<0.000000e+00> : vector<8x96xf32>
    %240 = tpu.matmul %235, %237, %cst_78 {dimension_numbers = #tpu.dot_dimension_numbers<[1], [0], [0], [1], [0, 0, 1, 1], [], []>} : vector<8x32xf32>, vector<32x96xf32>, vector<8x96xf32> -> vector<8x96xf32>
    %241 = vector.broadcast %207 : vector<1x96xf32> to vector<8x96xf32>
    %242 = arith.addf %240, %241 : vector<8x96xf32>
    %243 = vector.extract_strided_slice %242 {offsets = [0, 0], sizes = [8, 32], strides = [1, 1]} : vector<8x96xf32> to vector<8x32xf32>
    %244 = vector.extract_strided_slice %242 {offsets = [0, 32], sizes = [8, 32], strides = [1, 1]} : vector<8x96xf32> to vector<8x32xf32>
    %245 = vector.extract_strided_slice %242 {offsets = [0, 64], sizes = [8, 32], strides = [1, 1]} : vector<8x96xf32> to vector<8x32xf32>
    %246 = vector.extract_strided_slice %243 {offsets = [0, 0], sizes = [8, 8], strides = [1, 1]} : vector<8x32xf32> to vector<8x8xf32>
    %247 = vector.extract_strided_slice %243 {offsets = [0, 8], sizes = [8, 8], strides = [1, 1]} : vector<8x32xf32> to vector<8x8xf32>
    %248 = vector.extract_strided_slice %243 {offsets = [0, 16], sizes = [8, 8], strides = [1, 1]} : vector<8x32xf32> to vector<8x8xf32>
    %249 = vector.extract_strided_slice %243 {offsets = [0, 24], sizes = [8, 8], strides = [1, 1]} : vector<8x32xf32> to vector<8x8xf32>
    %250 = vector.shape_cast %246 : vector<8x8xf32> to vector<1x8x8xf32>
    %251 = vector.shape_cast %247 : vector<8x8xf32> to vector<1x8x8xf32>
    %252 = vector.shape_cast %248 : vector<8x8xf32> to vector<1x8x8xf32>
    %253 = vector.shape_cast %249 : vector<8x8xf32> to vector<1x8x8xf32>
    %254 = tpu.concatenate %250, %251, %252, %253 in 0 : vector<1x8x8xf32>, vector<1x8x8xf32>, vector<1x8x8xf32>, vector<1x8x8xf32> -> vector<4x8x8xf32>
    %255 = vector.extract_strided_slice %244 {offsets = [0, 0], sizes = [8, 8], strides = [1, 1]} : vector<8x32xf32> to vector<8x8xf32>
    %256 = vector.extract_strided_slice %244 {offsets = [0, 8], sizes = [8, 8], strides = [1, 1]} : vector<8x32xf32> to vector<8x8xf32>
    %257 = vector.extract_strided_slice %244 {offsets = [0, 16], sizes = [8, 8], strides = [1, 1]} : vector<8x32xf32> to vector<8x8xf32>
    %258 = vector.extract_strided_slice %244 {offsets = [0, 24], sizes = [8, 8], strides = [1, 1]} : vector<8x32xf32> to vector<8x8xf32>
    %259 = vector.shape_cast %255 : vector<8x8xf32> to vector<1x8x8xf32>
    %260 = vector.shape_cast %256 : vector<8x8xf32> to vector<1x8x8xf32>
    %261 = vector.shape_cast %257 : vector<8x8xf32> to vector<1x8x8xf32>
    %262 = vector.shape_cast %258 : vector<8x8xf32> to vector<1x8x8xf32>
    %263 = tpu.concatenate %259, %260, %261, %262 in 0 : vector<1x8x8xf32>, vector<1x8x8xf32>, vector<1x8x8xf32>, vector<1x8x8xf32> -> vector<4x8x8xf32>
    %264 = vector.extract_strided_slice %245 {offsets = [0, 0], sizes = [8, 8], strides = [1, 1]} : vector<8x32xf32> to vector<8x8xf32>
    %265 = vector.extract_strided_slice %245 {offsets = [0, 8], sizes = [8, 8], strides = [1, 1]} : vector<8x32xf32> to vector<8x8xf32>
    %266 = vector.extract_strided_slice %245 {offsets = [0, 16], sizes = [8, 8], strides = [1, 1]} : vector<8x32xf32> to vector<8x8xf32>
    %267 = vector.extract_strided_slice %245 {offsets = [0, 24], sizes = [8, 8], strides = [1, 1]} : vector<8x32xf32> to vector<8x8xf32>
    %268 = vector.shape_cast %264 : vector<8x8xf32> to vector<1x8x8xf32>
    %269 = vector.shape_cast %265 : vector<8x8xf32> to vector<1x8x8xf32>
    %270 = vector.shape_cast %266 : vector<8x8xf32> to vector<1x8x8xf32>
    %271 = vector.shape_cast %267 : vector<8x8xf32> to vector<1x8x8xf32>
    %272 = tpu.concatenate %268, %269, %270, %271 in 0 : vector<1x8x8xf32>, vector<1x8x8xf32>, vector<1x8x8xf32>, vector<1x8x8xf32> -> vector<4x8x8xf32>
    "tpu.trace_start"() <{level = 10 : i32, message = "hqd,hkd->hqk"}> : () -> ()
    %cst_79 = arith.constant dense<0.000000e+00> : vector<4x8x8xf32>
    %273 = tpu.matmul %254, %263, %cst_79 {dimension_numbers = #tpu.dot_dimension_numbers<[2], [2], [1], [1], [0, 0, 0, 1, 1, 1], [0], [0]>} : vector<4x8x8xf32>, vector<4x8x8xf32>, vector<4x8x8xf32> -> vector<4x8x8xf32>
    "tpu.trace_stop"() : () -> ()
    %274 = vector.shape_cast %74 : vector<8x8xf32> to vector<1x8x8xf32>
    %275 = vector.broadcast %274 : vector<1x8x8xf32> to vector<4x8x8xf32>
    %276 = arith.addf %273, %275 : vector<4x8x8xf32>
    %cst_80 = arith.constant dense<0xFF800000> : vector<4x8xf32>
    %277 = vector.multi_reduction <maximumf>, %276, %cst_80 [2] : vector<4x8x8xf32> to vector<4x8xf32>
    %278 = vector.shape_cast %277 : vector<4x8xf32> to vector<4x8x1xf32>
    %279 = vector.broadcast %278 : vector<4x8x1xf32> to vector<4x8x8xf32>
    %280 = arith.subf %276, %279 : vector<4x8x8xf32>
    %281 = math.exp %280 : vector<4x8x8xf32>
    %cst_81 = arith.constant dense<0.000000e+00> : vector<4x8xf32>
    %282 = vector.multi_reduction <add>, %281, %cst_81 [2] : vector<4x8x8xf32> to vector<4x8xf32>
    %283 = vector.shape_cast %282 : vector<4x8xf32> to vector<4x8x1xf32>
    %284 = tpu.reciprocal %283 {approx = true} : vector<4x8x1xf32> -> vector<4x8x1xf32>
    %285 = vector.broadcast %284 : vector<4x8x1xf32> to vector<4x8x8xf32>
    %286 = arith.mulf %281, %285 : vector<4x8x8xf32>
    "tpu.trace_start"() <{level = 10 : i32, message = "hqk,hkd->hqd"}> : () -> ()
    %cst_82 = arith.constant dense<0.000000e+00> : vector<4x8x8xf32>
    %287 = tpu.matmul %286, %272, %cst_82 {dimension_numbers = #tpu.dot_dimension_numbers<[2], [1], [1], [2], [0, 0, 0, 1, 1, 2], [0], [0]>} : vector<4x8x8xf32>, vector<4x8x8xf32>, vector<4x8x8xf32> -> vector<4x8x8xf32>
    "tpu.trace_stop"() : () -> ()
    %288 = vector.extract_strided_slice %287 {offsets = [0, 0, 0], sizes = [1, 8, 8], strides = [1, 1, 1]} : vector<4x8x8xf32> to vector<1x8x8xf32>
    %289 = vector.shape_cast %288 : vector<1x8x8xf32> to vector<8x8xf32>
    %290 = vector.extract_strided_slice %287 {offsets = [1, 0, 0], sizes = [1, 8, 8], strides = [1, 1, 1]} : vector<4x8x8xf32> to vector<1x8x8xf32>
    %291 = vector.shape_cast %290 : vector<1x8x8xf32> to vector<8x8xf32>
    %292 = vector.extract_strided_slice %287 {offsets = [2, 0, 0], sizes = [1, 8, 8], strides = [1, 1, 1]} : vector<4x8x8xf32> to vector<1x8x8xf32>
    %293 = vector.shape_cast %292 : vector<1x8x8xf32> to vector<8x8xf32>
    %294 = vector.extract_strided_slice %287 {offsets = [3, 0, 0], sizes = [1, 8, 8], strides = [1, 1, 1]} : vector<4x8x8xf32> to vector<1x8x8xf32>
    %295 = vector.shape_cast %294 : vector<1x8x8xf32> to vector<8x8xf32>
    %296 = tpu.concatenate %289, %291, %293, %295 in 1 : vector<8x8xf32>, vector<8x8xf32>, vector<8x8xf32>, vector<8x8xf32> -> vector<8x32xf32>
    %cst_83 = arith.constant dense<0.000000e+00> : vector<8x32xf32>
    %297 = tpu.matmul %296, %239, %cst_83 {dimension_numbers = #tpu.dot_dimension_numbers<[1], [0], [0], [1], [0, 0, 1, 1], [], []>} : vector<8x32xf32>, vector<32x32xf32>, vector<8x32xf32> -> vector<8x32xf32>
    %298 = arith.addf %204, %297 : vector<8x32xf32>
    %299 = vector.broadcast %208 : vector<1x32xf32> to vector<8x32xf32>
    %300 = arith.addf %298, %299 : vector<8x32xf32>
    %cst_84 = arith.constant dense<0.000000e+00> : vector<8xf32>
    %301 = vector.multi_reduction <add>, %300, %cst_84 [1] : vector<8x32xf32> to vector<8xf32>
    %302 = vector.shape_cast %301 : vector<8xf32> to vector<8x1xf32>
    %cst_85 = arith.constant 3.200000e+01 : f32
    %303 = vector.broadcast %cst_85 : f32 to vector<8x1xf32>
    %304 = arith.divf %302, %303 : vector<8x1xf32>
    %305 = vector.broadcast %304 : vector<8x1xf32> to vector<8x32xf32>
    %306 = arith.subf %300, %305 : vector<8x32xf32>
    %307 = arith.mulf %306, %306 : vector<8x32xf32>
    %cst_86 = arith.constant dense<0.000000e+00> : vector<8xf32>
    %308 = vector.multi_reduction <add>, %307, %cst_86 [1] : vector<8x32xf32> to vector<8xf32>
    %309 = vector.shape_cast %308 : vector<8xf32> to vector<8x1xf32>
    %cst_87 = arith.constant 0.0322580636 : f32
    %310 = vector.broadcast %cst_87 : f32 to vector<8x1xf32>
    %311 = arith.mulf %309, %310 : vector<8x1xf32>
    %312 = math.sqrt %311 : vector<8x1xf32>
    %cst_88 = arith.constant 9.99999997E-7 : f32
    %313 = vector.broadcast %cst_88 : f32 to vector<8x1xf32>
    %314 = arith.addf %312, %313 : vector<8x1xf32>
    %315 = tpu.reciprocal %314 {approx = true} : vector<8x1xf32> -> vector<8x1xf32>
    %316 = vector.broadcast %213 : vector<1x32xf32> to vector<8x32xf32>
    %317 = arith.mulf %316, %306 : vector<8x32xf32>
    %318 = vector.broadcast %315 : vector<8x1xf32> to vector<8x32xf32>
    %319 = arith.mulf %317, %318 : vector<8x32xf32>
    %320 = vector.broadcast %214 : vector<1x32xf32> to vector<8x32xf32>
    %321 = arith.addf %319, %320 : vector<8x32xf32>
    %c1_89 = arith.constant 1 : index
    %c0_90 = arith.constant 0 : index
    %c0_91 = arith.constant 0 : index
    %322 = vector.load %arg11[%c1_89, %c0_90, %c0_91] : memref<2x32x64xf32, #tpu.memory_space<vmem>>, vector<1x32x64xf32>
    %323 = vector.shape_cast %322 : vector<1x32x64xf32> to vector<32x64xf32>
    %cst_92 = arith.constant dense<0.000000e+00> : vector<8x64xf32>
    %324 = tpu.matmul %321, %323, %cst_92 {dimension_numbers = #tpu.dot_dimension_numbers<[1], [0], [0], [1], [0, 0, 1, 1], [], []>} : vector<8x32xf32>, vector<32x64xf32>, vector<8x64xf32> -> vector<8x64xf32>
    %325 = vector.broadcast %209 : vector<1x64xf32> to vector<8x64xf32>
    %326 = arith.addf %324, %325 : vector<8x64xf32>
    %cst_93 = arith.constant 0.000000e+00 : f32
    %327 = vector.broadcast %cst_93 : f32 to vector<8x64xf32>
    %328 = arith.maximumf %326, %327 : vector<8x64xf32>
    %c1_94 = arith.constant 1 : index
    %c0_95 = arith.constant 0 : index
    %c0_96 = arith.constant 0 : index
    %329 = vector.load %arg12[%c1_94, %c0_95, %c0_96] : memref<2x64x32xf32, #tpu.memory_space<vmem>>, vector<1x64x32xf32>
    %330 = vector.shape_cast %329 : vector<1x64x32xf32> to vector<64x32xf32>
    %cst_97 = arith.constant dense<0.000000e+00> : vector<8x32xf32>
    %331 = tpu.matmul %328, %330, %cst_97 {dimension_numbers = #tpu.dot_dimension_numbers<[1], [0], [0], [1], [0, 0, 1, 1], [], []>} : vector<8x64xf32>, vector<64x32xf32>, vector<8x32xf32> -> vector<8x32xf32>
    %332 = arith.addf %300, %331 : vector<8x32xf32>
    %333 = vector.broadcast %210 : vector<1x32xf32> to vector<8x32xf32>
    %334 = arith.addf %332, %333 : vector<8x32xf32>
    %c0_98 = arith.constant 0 : index
    %c0_99 = arith.constant 0 : index
    %335 = vector.load %arg14[%c0_98, %c0_99] : memref<2x32xf32, #tpu.memory_space<vmem>>, vector<2x32xf32>
    %336 = vector.extract_strided_slice %335 {offsets = [0, 0], sizes = [1, 32], strides = [1, 1]} : vector<2x32xf32> to vector<1x32xf32>
    %337 = vector.extract_strided_slice %335 {offsets = [1, 0], sizes = [1, 32], strides = [1, 1]} : vector<2x32xf32> to vector<1x32xf32>
    %cst_100 = arith.constant dense<0.000000e+00> : vector<8xf32>
    %338 = vector.multi_reduction <add>, %334, %cst_100 [1] : vector<8x32xf32> to vector<8xf32>
    %339 = vector.shape_cast %338 : vector<8xf32> to vector<8x1xf32>
    %cst_101 = arith.constant 3.200000e+01 : f32
    %340 = vector.broadcast %cst_101 : f32 to vector<8x1xf32>
    %341 = arith.divf %339, %340 : vector<8x1xf32>
    %342 = vector.broadcast %341 : vector<8x1xf32> to vector<8x32xf32>
    %343 = arith.subf %334, %342 : vector<8x32xf32>
    %344 = arith.mulf %343, %343 : vector<8x32xf32>
    %cst_102 = arith.constant dense<0.000000e+00> : vector<8xf32>
    %345 = vector.multi_reduction <add>, %344, %cst_102 [1] : vector<8x32xf32> to vector<8xf32>
    %346 = vector.shape_cast %345 : vector<8xf32> to vector<8x1xf32>
    %cst_103 = arith.constant 0.0322580636 : f32
    %347 = vector.broadcast %cst_103 : f32 to vector<8x1xf32>
    %348 = arith.mulf %346, %347 : vector<8x1xf32>
    %349 = math.sqrt %348 : vector<8x1xf32>
    %cst_104 = arith.constant 9.99999997E-7 : f32
    %350 = vector.broadcast %cst_104 : f32 to vector<8x1xf32>
    %351 = arith.addf %349, %350 : vector<8x1xf32>
    %352 = tpu.reciprocal %351 {approx = true} : vector<8x1xf32> -> vector<8x1xf32>
    %353 = vector.broadcast %336 : vector<1x32xf32> to vector<8x32xf32>
    %354 = arith.mulf %353, %343 : vector<8x32xf32>
    %355 = vector.broadcast %352 : vector<8x1xf32> to vector<8x32xf32>
    %356 = arith.mulf %354, %355 : vector<8x32xf32>
    %357 = vector.broadcast %337 : vector<1x32xf32> to vector<8x32xf32>
    %358 = arith.addf %356, %357 : vector<8x32xf32>
    %c0_105 = arith.constant 0 : index
    %c0_106 = arith.constant 0 : index
    %c0_107 = arith.constant 0 : index
    %359 = vector.load %arg7[%c0_105, %c0_106, %c0_107] : memref<1x8x8xf32, #tpu.memory_space<vmem>>, vector<1x8x8xf32>
    %360 = vector.shape_cast %359 : vector<1x8x8xf32> to vector<8x8xf32>
    %c0_108 = arith.constant 0 : index
    %c0_109 = arith.constant 0 : index
    %c0_110 = arith.constant 0 : index
    %361 = vector.load %arg8[%c0_108, %c0_109, %c0_110] : memref<1x8x8xf32, #tpu.memory_space<vmem>>, vector<1x8x8xf32>
    %362 = vector.shape_cast %361 : vector<1x8x8xf32> to vector<8x8xf32>
    %c0_111 = arith.constant 0 : index
    %c0_112 = arith.constant 0 : index
    %c0_113 = arith.constant 0 : index
    %363 = vector.load %arg21[%c0_111, %c0_112, %c0_113] : memref<2x12x96xf32, #tpu.memory_space<vmem>>, vector<1x12x96xf32>
    %364 = vector.shape_cast %363 : vector<1x12x96xf32> to vector<12x96xf32>
    %365 = vector.extract_strided_slice %364 {offsets = [0, 0], sizes = [1, 96], strides = [1, 1]} : vector<12x96xf32> to vector<1x96xf32>
    %366 = vector.extract_strided_slice %364 {offsets = [1, 0], sizes = [1, 32], strides = [1, 1]} : vector<12x96xf32> to vector<1x32xf32>
    %367 = vector.extract_strided_slice %364 {offsets = [2, 0], sizes = [1, 96], strides = [1, 1]} : vector<12x96xf32> to vector<1x96xf32>
    %368 = vector.extract_strided_slice %364 {offsets = [3, 0], sizes = [1, 32], strides = [1, 1]} : vector<12x96xf32> to vector<1x32xf32>
    %369 = vector.extract_strided_slice %364 {offsets = [4, 0], sizes = [1, 64], strides = [1, 1]} : vector<12x96xf32> to vector<1x64xf32>
    %370 = vector.extract_strided_slice %364 {offsets = [5, 0], sizes = [1, 32], strides = [1, 1]} : vector<12x96xf32> to vector<1x32xf32>
    %371 = vector.extract_strided_slice %364 {offsets = [6, 0], sizes = [1, 32], strides = [1, 1]} : vector<12x96xf32> to vector<1x32xf32>
    %372 = vector.extract_strided_slice %364 {offsets = [7, 0], sizes = [1, 32], strides = [1, 1]} : vector<12x96xf32> to vector<1x32xf32>
    %373 = vector.extract_strided_slice %364 {offsets = [8, 0], sizes = [1, 32], strides = [1, 1]} : vector<12x96xf32> to vector<1x32xf32>
    %374 = vector.extract_strided_slice %364 {offsets = [9, 0], sizes = [1, 32], strides = [1, 1]} : vector<12x96xf32> to vector<1x32xf32>
    %375 = vector.extract_strided_slice %364 {offsets = [10, 0], sizes = [1, 32], strides = [1, 1]} : vector<12x96xf32> to vector<1x32xf32>
    %376 = vector.extract_strided_slice %364 {offsets = [11, 0], sizes = [1, 32], strides = [1, 1]} : vector<12x96xf32> to vector<1x32xf32>
    %cst_114 = arith.constant dense<0.000000e+00> : vector<8xf32>
    %377 = vector.multi_reduction <add>, %72, %cst_114 [1] : vector<8x32xf32> to vector<8xf32>
    %378 = vector.shape_cast %377 : vector<8xf32> to vector<8x1xf32>
    %cst_115 = arith.constant 3.200000e+01 : f32
    %379 = vector.broadcast %cst_115 : f32 to vector<8x1xf32>
    %380 = arith.divf %378, %379 : vector<8x1xf32>
    %381 = vector.broadcast %380 : vector<8x1xf32> to vector<8x32xf32>
    %382 = arith.subf %72, %381 : vector<8x32xf32>
    %383 = arith.mulf %382, %382 : vector<8x32xf32>
    %cst_116 = arith.constant dense<0.000000e+00> : vector<8xf32>
    %384 = vector.multi_reduction <add>, %383, %cst_116 [1] : vector<8x32xf32> to vector<8xf32>
    %385 = vector.shape_cast %384 : vector<8xf32> to vector<8x1xf32>
    %cst_117 = arith.constant 0.0322580636 : f32
    %386 = vector.broadcast %cst_117 : f32 to vector<8x1xf32>
    %387 = arith.mulf %385, %386 : vector<8x1xf32>
    %388 = math.sqrt %387 : vector<8x1xf32>
    %cst_118 = arith.constant 9.99999997E-7 : f32
    %389 = vector.broadcast %cst_118 : f32 to vector<8x1xf32>
    %390 = arith.addf %388, %389 : vector<8x1xf32>
    %391 = tpu.reciprocal %390 {approx = true} : vector<8x1xf32> -> vector<8x1xf32>
    %392 = vector.broadcast %371 : vector<1x32xf32> to vector<8x32xf32>
    %393 = arith.mulf %392, %382 : vector<8x32xf32>
    %394 = vector.broadcast %391 : vector<8x1xf32> to vector<8x32xf32>
    %395 = arith.mulf %393, %394 : vector<8x32xf32>
    %396 = vector.broadcast %372 : vector<1x32xf32> to vector<8x32xf32>
    %397 = arith.addf %395, %396 : vector<8x32xf32>
    %c0_119 = arith.constant 0 : index
    %c0_120 = arith.constant 0 : index
    %c0_121 = arith.constant 0 : index
    %398 = vector.load %arg15[%c0_119, %c0_120, %c0_121] : memref<2x32x96xf32, #tpu.memory_space<vmem>>, vector<1x32x96xf32>
    %399 = vector.shape_cast %398 : vector<1x32x96xf32> to vector<32x96xf32>
    %c0_122 = arith.constant 0 : index
    %c0_123 = arith.constant 0 : index
    %c0_124 = arith.constant 0 : index
    %400 = vector.load %arg16[%c0_122, %c0_123, %c0_124] : memref<2x32x32xf32, #tpu.memory_space<vmem>>, vector<1x32x32xf32>
    %401 = vector.shape_cast %400 : vector<1x32x32xf32> to vector<32x32xf32>
    %cst_125 = arith.constant dense<0.000000e+00> : vector<8x96xf32>
    %402 = tpu.matmul %397, %399, %cst_125 {dimension_numbers = #tpu.dot_dimension_numbers<[1], [0], [0], [1], [0, 0, 1, 1], [], []>} : vector<8x32xf32>, vector<32x96xf32>, vector<8x96xf32> -> vector<8x96xf32>
    %403 = vector.broadcast %365 : vector<1x96xf32> to vector<8x96xf32>
    %404 = arith.addf %402, %403 : vector<8x96xf32>
    %405 = vector.extract_strided_slice %404 {offsets = [0, 0], sizes = [8, 32], strides = [1, 1]} : vector<8x96xf32> to vector<8x32xf32>
    %406 = vector.extract_strided_slice %404 {offsets = [0, 32], sizes = [8, 32], strides = [1, 1]} : vector<8x96xf32> to vector<8x32xf32>
    %407 = vector.extract_strided_slice %404 {offsets = [0, 64], sizes = [8, 32], strides = [1, 1]} : vector<8x96xf32> to vector<8x32xf32>
    %408 = vector.extract_strided_slice %405 {offsets = [0, 0], sizes = [8, 8], strides = [1, 1]} : vector<8x32xf32> to vector<8x8xf32>
    %409 = vector.extract_strided_slice %405 {offsets = [0, 8], sizes = [8, 8], strides = [1, 1]} : vector<8x32xf32> to vector<8x8xf32>
    %410 = vector.extract_strided_slice %405 {offsets = [0, 16], sizes = [8, 8], strides = [1, 1]} : vector<8x32xf32> to vector<8x8xf32>
    %411 = vector.extract_strided_slice %405 {offsets = [0, 24], sizes = [8, 8], strides = [1, 1]} : vector<8x32xf32> to vector<8x8xf32>
    %412 = vector.shape_cast %408 : vector<8x8xf32> to vector<1x8x8xf32>
    %413 = vector.shape_cast %409 : vector<8x8xf32> to vector<1x8x8xf32>
    %414 = vector.shape_cast %410 : vector<8x8xf32> to vector<1x8x8xf32>
    %415 = vector.shape_cast %411 : vector<8x8xf32> to vector<1x8x8xf32>
    %416 = tpu.concatenate %412, %413, %414, %415 in 0 : vector<1x8x8xf32>, vector<1x8x8xf32>, vector<1x8x8xf32>, vector<1x8x8xf32> -> vector<4x8x8xf32>
    %417 = vector.extract_strided_slice %406 {offsets = [0, 0], sizes = [8, 8], strides = [1, 1]} : vector<8x32xf32> to vector<8x8xf32>
    %418 = vector.extract_strided_slice %406 {offsets = [0, 8], sizes = [8, 8], strides = [1, 1]} : vector<8x32xf32> to vector<8x8xf32>
    %419 = vector.extract_strided_slice %406 {offsets = [0, 16], sizes = [8, 8], strides = [1, 1]} : vector<8x32xf32> to vector<8x8xf32>
    %420 = vector.extract_strided_slice %406 {offsets = [0, 24], sizes = [8, 8], strides = [1, 1]} : vector<8x32xf32> to vector<8x8xf32>
    %421 = vector.shape_cast %417 : vector<8x8xf32> to vector<1x8x8xf32>
    %422 = vector.shape_cast %418 : vector<8x8xf32> to vector<1x8x8xf32>
    %423 = vector.shape_cast %419 : vector<8x8xf32> to vector<1x8x8xf32>
    %424 = vector.shape_cast %420 : vector<8x8xf32> to vector<1x8x8xf32>
    %425 = tpu.concatenate %421, %422, %423, %424 in 0 : vector<1x8x8xf32>, vector<1x8x8xf32>, vector<1x8x8xf32>, vector<1x8x8xf32> -> vector<4x8x8xf32>
    %426 = vector.extract_strided_slice %407 {offsets = [0, 0], sizes = [8, 8], strides = [1, 1]} : vector<8x32xf32> to vector<8x8xf32>
    %427 = vector.extract_strided_slice %407 {offsets = [0, 8], sizes = [8, 8], strides = [1, 1]} : vector<8x32xf32> to vector<8x8xf32>
    %428 = vector.extract_strided_slice %407 {offsets = [0, 16], sizes = [8, 8], strides = [1, 1]} : vector<8x32xf32> to vector<8x8xf32>
    %429 = vector.extract_strided_slice %407 {offsets = [0, 24], sizes = [8, 8], strides = [1, 1]} : vector<8x32xf32> to vector<8x8xf32>
    %430 = vector.shape_cast %426 : vector<8x8xf32> to vector<1x8x8xf32>
    %431 = vector.shape_cast %427 : vector<8x8xf32> to vector<1x8x8xf32>
    %432 = vector.shape_cast %428 : vector<8x8xf32> to vector<1x8x8xf32>
    %433 = vector.shape_cast %429 : vector<8x8xf32> to vector<1x8x8xf32>
    %434 = tpu.concatenate %430, %431, %432, %433 in 0 : vector<1x8x8xf32>, vector<1x8x8xf32>, vector<1x8x8xf32>, vector<1x8x8xf32> -> vector<4x8x8xf32>
    "tpu.trace_start"() <{level = 10 : i32, message = "hqd,hkd->hqk"}> : () -> ()
    %cst_126 = arith.constant dense<0.000000e+00> : vector<4x8x8xf32>
    %435 = tpu.matmul %416, %425, %cst_126 {dimension_numbers = #tpu.dot_dimension_numbers<[2], [2], [1], [1], [0, 0, 0, 1, 1, 1], [0], [0]>} : vector<4x8x8xf32>, vector<4x8x8xf32>, vector<4x8x8xf32> -> vector<4x8x8xf32>
    "tpu.trace_stop"() : () -> ()
    %436 = vector.shape_cast %360 : vector<8x8xf32> to vector<1x8x8xf32>
    %437 = vector.broadcast %436 : vector<1x8x8xf32> to vector<4x8x8xf32>
    %438 = arith.addf %435, %437 : vector<4x8x8xf32>
    %cst_127 = arith.constant dense<0xFF800000> : vector<4x8xf32>
    %439 = vector.multi_reduction <maximumf>, %438, %cst_127 [2] : vector<4x8x8xf32> to vector<4x8xf32>
    %440 = vector.shape_cast %439 : vector<4x8xf32> to vector<4x8x1xf32>
    %441 = vector.broadcast %440 : vector<4x8x1xf32> to vector<4x8x8xf32>
    %442 = arith.subf %438, %441 : vector<4x8x8xf32>
    %443 = math.exp %442 : vector<4x8x8xf32>
    %cst_128 = arith.constant dense<0.000000e+00> : vector<4x8xf32>
    %444 = vector.multi_reduction <add>, %443, %cst_128 [2] : vector<4x8x8xf32> to vector<4x8xf32>
    %445 = vector.shape_cast %444 : vector<4x8xf32> to vector<4x8x1xf32>
    %446 = tpu.reciprocal %445 {approx = true} : vector<4x8x1xf32> -> vector<4x8x1xf32>
    %447 = vector.broadcast %446 : vector<4x8x1xf32> to vector<4x8x8xf32>
    %448 = arith.mulf %443, %447 : vector<4x8x8xf32>
    "tpu.trace_start"() <{level = 10 : i32, message = "hqk,hkd->hqd"}> : () -> ()
    %cst_129 = arith.constant dense<0.000000e+00> : vector<4x8x8xf32>
    %449 = tpu.matmul %448, %434, %cst_129 {dimension_numbers = #tpu.dot_dimension_numbers<[2], [1], [1], [2], [0, 0, 0, 1, 1, 2], [0], [0]>} : vector<4x8x8xf32>, vector<4x8x8xf32>, vector<4x8x8xf32> -> vector<4x8x8xf32>
    "tpu.trace_stop"() : () -> ()
    %450 = vector.extract_strided_slice %449 {offsets = [0, 0, 0], sizes = [1, 8, 8], strides = [1, 1, 1]} : vector<4x8x8xf32> to vector<1x8x8xf32>
    %451 = vector.shape_cast %450 : vector<1x8x8xf32> to vector<8x8xf32>
    %452 = vector.extract_strided_slice %449 {offsets = [1, 0, 0], sizes = [1, 8, 8], strides = [1, 1, 1]} : vector<4x8x8xf32> to vector<1x8x8xf32>
    %453 = vector.shape_cast %452 : vector<1x8x8xf32> to vector<8x8xf32>
    %454 = vector.extract_strided_slice %449 {offsets = [2, 0, 0], sizes = [1, 8, 8], strides = [1, 1, 1]} : vector<4x8x8xf32> to vector<1x8x8xf32>
    %455 = vector.shape_cast %454 : vector<1x8x8xf32> to vector<8x8xf32>
    %456 = vector.extract_strided_slice %449 {offsets = [3, 0, 0], sizes = [1, 8, 8], strides = [1, 1, 1]} : vector<4x8x8xf32> to vector<1x8x8xf32>
    %457 = vector.shape_cast %456 : vector<1x8x8xf32> to vector<8x8xf32>
    %458 = tpu.concatenate %451, %453, %455, %457 in 1 : vector<8x8xf32>, vector<8x8xf32>, vector<8x8xf32>, vector<8x8xf32> -> vector<8x32xf32>
    %cst_130 = arith.constant dense<0.000000e+00> : vector<8x32xf32>
    %459 = tpu.matmul %458, %401, %cst_130 {dimension_numbers = #tpu.dot_dimension_numbers<[1], [0], [0], [1], [0, 0, 1, 1], [], []>} : vector<8x32xf32>, vector<32x32xf32>, vector<8x32xf32> -> vector<8x32xf32>
    %460 = arith.addf %72, %459 : vector<8x32xf32>
    %461 = vector.broadcast %366 : vector<1x32xf32> to vector<8x32xf32>
    %462 = arith.addf %460, %461 : vector<8x32xf32>
    %cst_131 = arith.constant dense<0.000000e+00> : vector<8xf32>
    %463 = vector.multi_reduction <add>, %462, %cst_131 [1] : vector<8x32xf32> to vector<8xf32>
    %464 = vector.shape_cast %463 : vector<8xf32> to vector<8x1xf32>
    %cst_132 = arith.constant 3.200000e+01 : f32
    %465 = vector.broadcast %cst_132 : f32 to vector<8x1xf32>
    %466 = arith.divf %464, %465 : vector<8x1xf32>
    %467 = vector.broadcast %466 : vector<8x1xf32> to vector<8x32xf32>
    %468 = arith.subf %462, %467 : vector<8x32xf32>
    %469 = arith.mulf %468, %468 : vector<8x32xf32>
    %cst_133 = arith.constant dense<0.000000e+00> : vector<8xf32>
    %470 = vector.multi_reduction <add>, %469, %cst_133 [1] : vector<8x32xf32> to vector<8xf32>
    %471 = vector.shape_cast %470 : vector<8xf32> to vector<8x1xf32>
    %cst_134 = arith.constant 0.0322580636 : f32
    %472 = vector.broadcast %cst_134 : f32 to vector<8x1xf32>
    %473 = arith.mulf %471, %472 : vector<8x1xf32>
    %474 = math.sqrt %473 : vector<8x1xf32>
    %cst_135 = arith.constant 9.99999997E-7 : f32
    %475 = vector.broadcast %cst_135 : f32 to vector<8x1xf32>
    %476 = arith.addf %474, %475 : vector<8x1xf32>
    %477 = tpu.reciprocal %476 {approx = true} : vector<8x1xf32> -> vector<8x1xf32>
    %478 = vector.broadcast %373 : vector<1x32xf32> to vector<8x32xf32>
    %479 = arith.mulf %478, %468 : vector<8x32xf32>
    %480 = vector.broadcast %477 : vector<8x1xf32> to vector<8x32xf32>
    %481 = arith.mulf %479, %480 : vector<8x32xf32>
    %482 = vector.broadcast %374 : vector<1x32xf32> to vector<8x32xf32>
    %483 = arith.addf %481, %482 : vector<8x32xf32>
    %c0_136 = arith.constant 0 : index
    %c0_137 = arith.constant 0 : index
    %c0_138 = arith.constant 0 : index
    %484 = vector.load %arg17[%c0_136, %c0_137, %c0_138] : memref<2x32x96xf32, #tpu.memory_space<vmem>>, vector<1x32x96xf32>
    %485 = vector.shape_cast %484 : vector<1x32x96xf32> to vector<32x96xf32>
    %c0_139 = arith.constant 0 : index
    %c0_140 = arith.constant 0 : index
    %c0_141 = arith.constant 0 : index
    %486 = vector.load %arg18[%c0_139, %c0_140, %c0_141] : memref<2x32x32xf32, #tpu.memory_space<vmem>>, vector<1x32x32xf32>
    %487 = vector.shape_cast %486 : vector<1x32x32xf32> to vector<32x32xf32>
    %488 = vector.extract_strided_slice %485 {offsets = [0, 0], sizes = [32, 32], strides = [1, 1]} : vector<32x96xf32> to vector<32x32xf32>
    %cst_142 = arith.constant dense<0.000000e+00> : vector<8x32xf32>
    %489 = tpu.matmul %483, %488, %cst_142 {dimension_numbers = #tpu.dot_dimension_numbers<[1], [0], [0], [1], [0, 0, 1, 1], [], []>} : vector<8x32xf32>, vector<32x32xf32>, vector<8x32xf32> -> vector<8x32xf32>
    %490 = vector.extract_strided_slice %367 {offsets = [0, 0], sizes = [1, 32], strides = [1, 1]} : vector<1x96xf32> to vector<1x32xf32>
    %491 = vector.broadcast %490 : vector<1x32xf32> to vector<8x32xf32>
    %492 = arith.addf %489, %491 : vector<8x32xf32>
    %493 = vector.extract_strided_slice %485 {offsets = [0, 32], sizes = [32, 64], strides = [1, 1]} : vector<32x96xf32> to vector<32x64xf32>
    %cst_143 = arith.constant dense<0.000000e+00> : vector<8x64xf32>
    %494 = tpu.matmul %358, %493, %cst_143 {dimension_numbers = #tpu.dot_dimension_numbers<[1], [0], [0], [1], [0, 0, 1, 1], [], []>} : vector<8x32xf32>, vector<32x64xf32>, vector<8x64xf32> -> vector<8x64xf32>
    %495 = vector.extract_strided_slice %367 {offsets = [0, 32], sizes = [1, 64], strides = [1, 1]} : vector<1x96xf32> to vector<1x64xf32>
    %496 = vector.broadcast %495 : vector<1x64xf32> to vector<8x64xf32>
    %497 = arith.addf %494, %496 : vector<8x64xf32>
    %498 = vector.extract_strided_slice %497 {offsets = [0, 0], sizes = [8, 32], strides = [1, 1]} : vector<8x64xf32> to vector<8x32xf32>
    %499 = vector.extract_strided_slice %497 {offsets = [0, 32], sizes = [8, 32], strides = [1, 1]} : vector<8x64xf32> to vector<8x32xf32>
    %500 = vector.extract_strided_slice %492 {offsets = [0, 0], sizes = [8, 8], strides = [1, 1]} : vector<8x32xf32> to vector<8x8xf32>
    %501 = vector.extract_strided_slice %492 {offsets = [0, 8], sizes = [8, 8], strides = [1, 1]} : vector<8x32xf32> to vector<8x8xf32>
    %502 = vector.extract_strided_slice %492 {offsets = [0, 16], sizes = [8, 8], strides = [1, 1]} : vector<8x32xf32> to vector<8x8xf32>
    %503 = vector.extract_strided_slice %492 {offsets = [0, 24], sizes = [8, 8], strides = [1, 1]} : vector<8x32xf32> to vector<8x8xf32>
    %504 = vector.shape_cast %500 : vector<8x8xf32> to vector<1x8x8xf32>
    %505 = vector.shape_cast %501 : vector<8x8xf32> to vector<1x8x8xf32>
    %506 = vector.shape_cast %502 : vector<8x8xf32> to vector<1x8x8xf32>
    %507 = vector.shape_cast %503 : vector<8x8xf32> to vector<1x8x8xf32>
    %508 = tpu.concatenate %504, %505, %506, %507 in 0 : vector<1x8x8xf32>, vector<1x8x8xf32>, vector<1x8x8xf32>, vector<1x8x8xf32> -> vector<4x8x8xf32>
    %509 = vector.extract_strided_slice %498 {offsets = [0, 0], sizes = [8, 8], strides = [1, 1]} : vector<8x32xf32> to vector<8x8xf32>
    %510 = vector.extract_strided_slice %498 {offsets = [0, 8], sizes = [8, 8], strides = [1, 1]} : vector<8x32xf32> to vector<8x8xf32>
    %511 = vector.extract_strided_slice %498 {offsets = [0, 16], sizes = [8, 8], strides = [1, 1]} : vector<8x32xf32> to vector<8x8xf32>
    %512 = vector.extract_strided_slice %498 {offsets = [0, 24], sizes = [8, 8], strides = [1, 1]} : vector<8x32xf32> to vector<8x8xf32>
    %513 = vector.shape_cast %509 : vector<8x8xf32> to vector<1x8x8xf32>
    %514 = vector.shape_cast %510 : vector<8x8xf32> to vector<1x8x8xf32>
    %515 = vector.shape_cast %511 : vector<8x8xf32> to vector<1x8x8xf32>
    %516 = vector.shape_cast %512 : vector<8x8xf32> to vector<1x8x8xf32>
    %517 = tpu.concatenate %513, %514, %515, %516 in 0 : vector<1x8x8xf32>, vector<1x8x8xf32>, vector<1x8x8xf32>, vector<1x8x8xf32> -> vector<4x8x8xf32>
    %518 = vector.extract_strided_slice %499 {offsets = [0, 0], sizes = [8, 8], strides = [1, 1]} : vector<8x32xf32> to vector<8x8xf32>
    %519 = vector.extract_strided_slice %499 {offsets = [0, 8], sizes = [8, 8], strides = [1, 1]} : vector<8x32xf32> to vector<8x8xf32>
    %520 = vector.extract_strided_slice %499 {offsets = [0, 16], sizes = [8, 8], strides = [1, 1]} : vector<8x32xf32> to vector<8x8xf32>
    %521 = vector.extract_strided_slice %499 {offsets = [0, 24], sizes = [8, 8], strides = [1, 1]} : vector<8x32xf32> to vector<8x8xf32>
    %522 = vector.shape_cast %518 : vector<8x8xf32> to vector<1x8x8xf32>
    %523 = vector.shape_cast %519 : vector<8x8xf32> to vector<1x8x8xf32>
    %524 = vector.shape_cast %520 : vector<8x8xf32> to vector<1x8x8xf32>
    %525 = vector.shape_cast %521 : vector<8x8xf32> to vector<1x8x8xf32>
    %526 = tpu.concatenate %522, %523, %524, %525 in 0 : vector<1x8x8xf32>, vector<1x8x8xf32>, vector<1x8x8xf32>, vector<1x8x8xf32> -> vector<4x8x8xf32>
    "tpu.trace_start"() <{level = 10 : i32, message = "hqd,hkd->hqk"}> : () -> ()
    %cst_144 = arith.constant dense<0.000000e+00> : vector<4x8x8xf32>
    %527 = tpu.matmul %508, %517, %cst_144 {dimension_numbers = #tpu.dot_dimension_numbers<[2], [2], [1], [1], [0, 0, 0, 1, 1, 1], [0], [0]>} : vector<4x8x8xf32>, vector<4x8x8xf32>, vector<4x8x8xf32> -> vector<4x8x8xf32>
    "tpu.trace_stop"() : () -> ()
    %528 = vector.shape_cast %362 : vector<8x8xf32> to vector<1x8x8xf32>
    %529 = vector.broadcast %528 : vector<1x8x8xf32> to vector<4x8x8xf32>
    %530 = arith.addf %527, %529 : vector<4x8x8xf32>
    %cst_145 = arith.constant dense<0xFF800000> : vector<4x8xf32>
    %531 = vector.multi_reduction <maximumf>, %530, %cst_145 [2] : vector<4x8x8xf32> to vector<4x8xf32>
    %532 = vector.shape_cast %531 : vector<4x8xf32> to vector<4x8x1xf32>
    %533 = vector.broadcast %532 : vector<4x8x1xf32> to vector<4x8x8xf32>
    %534 = arith.subf %530, %533 : vector<4x8x8xf32>
    %535 = math.exp %534 : vector<4x8x8xf32>
    %cst_146 = arith.constant dense<0.000000e+00> : vector<4x8xf32>
    %536 = vector.multi_reduction <add>, %535, %cst_146 [2] : vector<4x8x8xf32> to vector<4x8xf32>
    %537 = vector.shape_cast %536 : vector<4x8xf32> to vector<4x8x1xf32>
    %538 = tpu.reciprocal %537 {approx = true} : vector<4x8x1xf32> -> vector<4x8x1xf32>
    %539 = vector.broadcast %538 : vector<4x8x1xf32> to vector<4x8x8xf32>
    %540 = arith.mulf %535, %539 : vector<4x8x8xf32>
    "tpu.trace_start"() <{level = 10 : i32, message = "hqk,hkd->hqd"}> : () -> ()
    %cst_147 = arith.constant dense<0.000000e+00> : vector<4x8x8xf32>
    %541 = tpu.matmul %540, %526, %cst_147 {dimension_numbers = #tpu.dot_dimension_numbers<[2], [1], [1], [2], [0, 0, 0, 1, 1, 2], [0], [0]>} : vector<4x8x8xf32>, vector<4x8x8xf32>, vector<4x8x8xf32> -> vector<4x8x8xf32>
    "tpu.trace_stop"() : () -> ()
    %542 = vector.extract_strided_slice %541 {offsets = [0, 0, 0], sizes = [1, 8, 8], strides = [1, 1, 1]} : vector<4x8x8xf32> to vector<1x8x8xf32>
    %543 = vector.shape_cast %542 : vector<1x8x8xf32> to vector<8x8xf32>
    %544 = vector.extract_strided_slice %541 {offsets = [1, 0, 0], sizes = [1, 8, 8], strides = [1, 1, 1]} : vector<4x8x8xf32> to vector<1x8x8xf32>
    %545 = vector.shape_cast %544 : vector<1x8x8xf32> to vector<8x8xf32>
    %546 = vector.extract_strided_slice %541 {offsets = [2, 0, 0], sizes = [1, 8, 8], strides = [1, 1, 1]} : vector<4x8x8xf32> to vector<1x8x8xf32>
    %547 = vector.shape_cast %546 : vector<1x8x8xf32> to vector<8x8xf32>
    %548 = vector.extract_strided_slice %541 {offsets = [3, 0, 0], sizes = [1, 8, 8], strides = [1, 1, 1]} : vector<4x8x8xf32> to vector<1x8x8xf32>
    %549 = vector.shape_cast %548 : vector<1x8x8xf32> to vector<8x8xf32>
    %550 = tpu.concatenate %543, %545, %547, %549 in 1 : vector<8x8xf32>, vector<8x8xf32>, vector<8x8xf32>, vector<8x8xf32> -> vector<8x32xf32>
    %cst_148 = arith.constant dense<0.000000e+00> : vector<8x32xf32>
    %551 = tpu.matmul %550, %487, %cst_148 {dimension_numbers = #tpu.dot_dimension_numbers<[1], [0], [0], [1], [0, 0, 1, 1], [], []>} : vector<8x32xf32>, vector<32x32xf32>, vector<8x32xf32> -> vector<8x32xf32>
    %552 = arith.addf %462, %551 : vector<8x32xf32>
    %553 = vector.broadcast %368 : vector<1x32xf32> to vector<8x32xf32>
    %554 = arith.addf %552, %553 : vector<8x32xf32>
    %cst_149 = arith.constant dense<0.000000e+00> : vector<8xf32>
    %555 = vector.multi_reduction <add>, %554, %cst_149 [1] : vector<8x32xf32> to vector<8xf32>
    %556 = vector.shape_cast %555 : vector<8xf32> to vector<8x1xf32>
    %cst_150 = arith.constant 3.200000e+01 : f32
    %557 = vector.broadcast %cst_150 : f32 to vector<8x1xf32>
    %558 = arith.divf %556, %557 : vector<8x1xf32>
    %559 = vector.broadcast %558 : vector<8x1xf32> to vector<8x32xf32>
    %560 = arith.subf %554, %559 : vector<8x32xf32>
    %561 = arith.mulf %560, %560 : vector<8x32xf32>
    %cst_151 = arith.constant dense<0.000000e+00> : vector<8xf32>
    %562 = vector.multi_reduction <add>, %561, %cst_151 [1] : vector<8x32xf32> to vector<8xf32>
    %563 = vector.shape_cast %562 : vector<8xf32> to vector<8x1xf32>
    %cst_152 = arith.constant 0.0322580636 : f32
    %564 = vector.broadcast %cst_152 : f32 to vector<8x1xf32>
    %565 = arith.mulf %563, %564 : vector<8x1xf32>
    %566 = math.sqrt %565 : vector<8x1xf32>
    %cst_153 = arith.constant 9.99999997E-7 : f32
    %567 = vector.broadcast %cst_153 : f32 to vector<8x1xf32>
    %568 = arith.addf %566, %567 : vector<8x1xf32>
    %569 = tpu.reciprocal %568 {approx = true} : vector<8x1xf32> -> vector<8x1xf32>
    %570 = vector.broadcast %375 : vector<1x32xf32> to vector<8x32xf32>
    %571 = arith.mulf %570, %560 : vector<8x32xf32>
    %572 = vector.broadcast %569 : vector<8x1xf32> to vector<8x32xf32>
    %573 = arith.mulf %571, %572 : vector<8x32xf32>
    %574 = vector.broadcast %376 : vector<1x32xf32> to vector<8x32xf32>
    %575 = arith.addf %573, %574 : vector<8x32xf32>
    %c0_154 = arith.constant 0 : index
    %c0_155 = arith.constant 0 : index
    %c0_156 = arith.constant 0 : index
    %576 = vector.load %arg19[%c0_154, %c0_155, %c0_156] : memref<2x32x64xf32, #tpu.memory_space<vmem>>, vector<1x32x64xf32>
    %577 = vector.shape_cast %576 : vector<1x32x64xf32> to vector<32x64xf32>
    %cst_157 = arith.constant dense<0.000000e+00> : vector<8x64xf32>
    %578 = tpu.matmul %575, %577, %cst_157 {dimension_numbers = #tpu.dot_dimension_numbers<[1], [0], [0], [1], [0, 0, 1, 1], [], []>} : vector<8x32xf32>, vector<32x64xf32>, vector<8x64xf32> -> vector<8x64xf32>
    %579 = vector.broadcast %369 : vector<1x64xf32> to vector<8x64xf32>
    %580 = arith.addf %578, %579 : vector<8x64xf32>
    %cst_158 = arith.constant 0.000000e+00 : f32
    %581 = vector.broadcast %cst_158 : f32 to vector<8x64xf32>
    %582 = arith.maximumf %580, %581 : vector<8x64xf32>
    %c0_159 = arith.constant 0 : index
    %c0_160 = arith.constant 0 : index
    %c0_161 = arith.constant 0 : index
    %583 = vector.load %arg20[%c0_159, %c0_160, %c0_161] : memref<2x64x32xf32, #tpu.memory_space<vmem>>, vector<1x64x32xf32>
    %584 = vector.shape_cast %583 : vector<1x64x32xf32> to vector<64x32xf32>
    %cst_162 = arith.constant dense<0.000000e+00> : vector<8x32xf32>
    %585 = tpu.matmul %582, %584, %cst_162 {dimension_numbers = #tpu.dot_dimension_numbers<[1], [0], [0], [1], [0, 0, 1, 1], [], []>} : vector<8x64xf32>, vector<64x32xf32>, vector<8x32xf32> -> vector<8x32xf32>
    %586 = arith.addf %554, %585 : vector<8x32xf32>
    %587 = vector.broadcast %370 : vector<1x32xf32> to vector<8x32xf32>
    %588 = arith.addf %586, %587 : vector<8x32xf32>
    %c1_163 = arith.constant 1 : index
    %c0_164 = arith.constant 0 : index
    %c0_165 = arith.constant 0 : index
    %589 = vector.load %arg21[%c1_163, %c0_164, %c0_165] : memref<2x12x96xf32, #tpu.memory_space<vmem>>, vector<1x12x96xf32>
    %590 = vector.shape_cast %589 : vector<1x12x96xf32> to vector<12x96xf32>
    %591 = vector.extract_strided_slice %590 {offsets = [0, 0], sizes = [1, 96], strides = [1, 1]} : vector<12x96xf32> to vector<1x96xf32>
    %592 = vector.extract_strided_slice %590 {offsets = [1, 0], sizes = [1, 32], strides = [1, 1]} : vector<12x96xf32> to vector<1x32xf32>
    %593 = vector.extract_strided_slice %590 {offsets = [2, 0], sizes = [1, 96], strides = [1, 1]} : vector<12x96xf32> to vector<1x96xf32>
    %594 = vector.extract_strided_slice %590 {offsets = [3, 0], sizes = [1, 32], strides = [1, 1]} : vector<12x96xf32> to vector<1x32xf32>
    %595 = vector.extract_strided_slice %590 {offsets = [4, 0], sizes = [1, 64], strides = [1, 1]} : vector<12x96xf32> to vector<1x64xf32>
    %596 = vector.extract_strided_slice %590 {offsets = [5, 0], sizes = [1, 32], strides = [1, 1]} : vector<12x96xf32> to vector<1x32xf32>
    %597 = vector.extract_strided_slice %590 {offsets = [6, 0], sizes = [1, 32], strides = [1, 1]} : vector<12x96xf32> to vector<1x32xf32>
    %598 = vector.extract_strided_slice %590 {offsets = [7, 0], sizes = [1, 32], strides = [1, 1]} : vector<12x96xf32> to vector<1x32xf32>
    %599 = vector.extract_strided_slice %590 {offsets = [8, 0], sizes = [1, 32], strides = [1, 1]} : vector<12x96xf32> to vector<1x32xf32>
    %600 = vector.extract_strided_slice %590 {offsets = [9, 0], sizes = [1, 32], strides = [1, 1]} : vector<12x96xf32> to vector<1x32xf32>
    %601 = vector.extract_strided_slice %590 {offsets = [10, 0], sizes = [1, 32], strides = [1, 1]} : vector<12x96xf32> to vector<1x32xf32>
    %602 = vector.extract_strided_slice %590 {offsets = [11, 0], sizes = [1, 32], strides = [1, 1]} : vector<12x96xf32> to vector<1x32xf32>
    %cst_166 = arith.constant dense<0.000000e+00> : vector<8xf32>
    %603 = vector.multi_reduction <add>, %588, %cst_166 [1] : vector<8x32xf32> to vector<8xf32>
    %604 = vector.shape_cast %603 : vector<8xf32> to vector<8x1xf32>
    %cst_167 = arith.constant 3.200000e+01 : f32
    %605 = vector.broadcast %cst_167 : f32 to vector<8x1xf32>
    %606 = arith.divf %604, %605 : vector<8x1xf32>
    %607 = vector.broadcast %606 : vector<8x1xf32> to vector<8x32xf32>
    %608 = arith.subf %588, %607 : vector<8x32xf32>
    %609 = arith.mulf %608, %608 : vector<8x32xf32>
    %cst_168 = arith.constant dense<0.000000e+00> : vector<8xf32>
    %610 = vector.multi_reduction <add>, %609, %cst_168 [1] : vector<8x32xf32> to vector<8xf32>
    %611 = vector.shape_cast %610 : vector<8xf32> to vector<8x1xf32>
    %cst_169 = arith.constant 0.0322580636 : f32
    %612 = vector.broadcast %cst_169 : f32 to vector<8x1xf32>
    %613 = arith.mulf %611, %612 : vector<8x1xf32>
    %614 = math.sqrt %613 : vector<8x1xf32>
    %cst_170 = arith.constant 9.99999997E-7 : f32
    %615 = vector.broadcast %cst_170 : f32 to vector<8x1xf32>
    %616 = arith.addf %614, %615 : vector<8x1xf32>
    %617 = tpu.reciprocal %616 {approx = true} : vector<8x1xf32> -> vector<8x1xf32>
    %618 = vector.broadcast %597 : vector<1x32xf32> to vector<8x32xf32>
    %619 = arith.mulf %618, %608 : vector<8x32xf32>
    %620 = vector.broadcast %617 : vector<8x1xf32> to vector<8x32xf32>
    %621 = arith.mulf %619, %620 : vector<8x32xf32>
    %622 = vector.broadcast %598 : vector<1x32xf32> to vector<8x32xf32>
    %623 = arith.addf %621, %622 : vector<8x32xf32>
    %c1_171 = arith.constant 1 : index
    %c0_172 = arith.constant 0 : index
    %c0_173 = arith.constant 0 : index
    %624 = vector.load %arg15[%c1_171, %c0_172, %c0_173] : memref<2x32x96xf32, #tpu.memory_space<vmem>>, vector<1x32x96xf32>
    %625 = vector.shape_cast %624 : vector<1x32x96xf32> to vector<32x96xf32>
    %c1_174 = arith.constant 1 : index
    %c0_175 = arith.constant 0 : index
    %c0_176 = arith.constant 0 : index
    %626 = vector.load %arg16[%c1_174, %c0_175, %c0_176] : memref<2x32x32xf32, #tpu.memory_space<vmem>>, vector<1x32x32xf32>
    %627 = vector.shape_cast %626 : vector<1x32x32xf32> to vector<32x32xf32>
    %cst_177 = arith.constant dense<0.000000e+00> : vector<8x96xf32>
    %628 = tpu.matmul %623, %625, %cst_177 {dimension_numbers = #tpu.dot_dimension_numbers<[1], [0], [0], [1], [0, 0, 1, 1], [], []>} : vector<8x32xf32>, vector<32x96xf32>, vector<8x96xf32> -> vector<8x96xf32>
    %629 = vector.broadcast %591 : vector<1x96xf32> to vector<8x96xf32>
    %630 = arith.addf %628, %629 : vector<8x96xf32>
    %631 = vector.extract_strided_slice %630 {offsets = [0, 0], sizes = [8, 32], strides = [1, 1]} : vector<8x96xf32> to vector<8x32xf32>
    %632 = vector.extract_strided_slice %630 {offsets = [0, 32], sizes = [8, 32], strides = [1, 1]} : vector<8x96xf32> to vector<8x32xf32>
    %633 = vector.extract_strided_slice %630 {offsets = [0, 64], sizes = [8, 32], strides = [1, 1]} : vector<8x96xf32> to vector<8x32xf32>
    %634 = vector.extract_strided_slice %631 {offsets = [0, 0], sizes = [8, 8], strides = [1, 1]} : vector<8x32xf32> to vector<8x8xf32>
    %635 = vector.extract_strided_slice %631 {offsets = [0, 8], sizes = [8, 8], strides = [1, 1]} : vector<8x32xf32> to vector<8x8xf32>
    %636 = vector.extract_strided_slice %631 {offsets = [0, 16], sizes = [8, 8], strides = [1, 1]} : vector<8x32xf32> to vector<8x8xf32>
    %637 = vector.extract_strided_slice %631 {offsets = [0, 24], sizes = [8, 8], strides = [1, 1]} : vector<8x32xf32> to vector<8x8xf32>
    %638 = vector.shape_cast %634 : vector<8x8xf32> to vector<1x8x8xf32>
    %639 = vector.shape_cast %635 : vector<8x8xf32> to vector<1x8x8xf32>
    %640 = vector.shape_cast %636 : vector<8x8xf32> to vector<1x8x8xf32>
    %641 = vector.shape_cast %637 : vector<8x8xf32> to vector<1x8x8xf32>
    %642 = tpu.concatenate %638, %639, %640, %641 in 0 : vector<1x8x8xf32>, vector<1x8x8xf32>, vector<1x8x8xf32>, vector<1x8x8xf32> -> vector<4x8x8xf32>
    %643 = vector.extract_strided_slice %632 {offsets = [0, 0], sizes = [8, 8], strides = [1, 1]} : vector<8x32xf32> to vector<8x8xf32>
    %644 = vector.extract_strided_slice %632 {offsets = [0, 8], sizes = [8, 8], strides = [1, 1]} : vector<8x32xf32> to vector<8x8xf32>
    %645 = vector.extract_strided_slice %632 {offsets = [0, 16], sizes = [8, 8], strides = [1, 1]} : vector<8x32xf32> to vector<8x8xf32>
    %646 = vector.extract_strided_slice %632 {offsets = [0, 24], sizes = [8, 8], strides = [1, 1]} : vector<8x32xf32> to vector<8x8xf32>
    %647 = vector.shape_cast %643 : vector<8x8xf32> to vector<1x8x8xf32>
    %648 = vector.shape_cast %644 : vector<8x8xf32> to vector<1x8x8xf32>
    %649 = vector.shape_cast %645 : vector<8x8xf32> to vector<1x8x8xf32>
    %650 = vector.shape_cast %646 : vector<8x8xf32> to vector<1x8x8xf32>
    %651 = tpu.concatenate %647, %648, %649, %650 in 0 : vector<1x8x8xf32>, vector<1x8x8xf32>, vector<1x8x8xf32>, vector<1x8x8xf32> -> vector<4x8x8xf32>
    %652 = vector.extract_strided_slice %633 {offsets = [0, 0], sizes = [8, 8], strides = [1, 1]} : vector<8x32xf32> to vector<8x8xf32>
    %653 = vector.extract_strided_slice %633 {offsets = [0, 8], sizes = [8, 8], strides = [1, 1]} : vector<8x32xf32> to vector<8x8xf32>
    %654 = vector.extract_strided_slice %633 {offsets = [0, 16], sizes = [8, 8], strides = [1, 1]} : vector<8x32xf32> to vector<8x8xf32>
    %655 = vector.extract_strided_slice %633 {offsets = [0, 24], sizes = [8, 8], strides = [1, 1]} : vector<8x32xf32> to vector<8x8xf32>
    %656 = vector.shape_cast %652 : vector<8x8xf32> to vector<1x8x8xf32>
    %657 = vector.shape_cast %653 : vector<8x8xf32> to vector<1x8x8xf32>
    %658 = vector.shape_cast %654 : vector<8x8xf32> to vector<1x8x8xf32>
    %659 = vector.shape_cast %655 : vector<8x8xf32> to vector<1x8x8xf32>
    %660 = tpu.concatenate %656, %657, %658, %659 in 0 : vector<1x8x8xf32>, vector<1x8x8xf32>, vector<1x8x8xf32>, vector<1x8x8xf32> -> vector<4x8x8xf32>
    "tpu.trace_start"() <{level = 10 : i32, message = "hqd,hkd->hqk"}> : () -> ()
    %cst_178 = arith.constant dense<0.000000e+00> : vector<4x8x8xf32>
    %661 = tpu.matmul %642, %651, %cst_178 {dimension_numbers = #tpu.dot_dimension_numbers<[2], [2], [1], [1], [0, 0, 0, 1, 1, 1], [0], [0]>} : vector<4x8x8xf32>, vector<4x8x8xf32>, vector<4x8x8xf32> -> vector<4x8x8xf32>
    "tpu.trace_stop"() : () -> ()
    %662 = vector.shape_cast %360 : vector<8x8xf32> to vector<1x8x8xf32>
    %663 = vector.broadcast %662 : vector<1x8x8xf32> to vector<4x8x8xf32>
    %664 = arith.addf %661, %663 : vector<4x8x8xf32>
    %cst_179 = arith.constant dense<0xFF800000> : vector<4x8xf32>
    %665 = vector.multi_reduction <maximumf>, %664, %cst_179 [2] : vector<4x8x8xf32> to vector<4x8xf32>
    %666 = vector.shape_cast %665 : vector<4x8xf32> to vector<4x8x1xf32>
    %667 = vector.broadcast %666 : vector<4x8x1xf32> to vector<4x8x8xf32>
    %668 = arith.subf %664, %667 : vector<4x8x8xf32>
    %669 = math.exp %668 : vector<4x8x8xf32>
    %cst_180 = arith.constant dense<0.000000e+00> : vector<4x8xf32>
    %670 = vector.multi_reduction <add>, %669, %cst_180 [2] : vector<4x8x8xf32> to vector<4x8xf32>
    %671 = vector.shape_cast %670 : vector<4x8xf32> to vector<4x8x1xf32>
    %672 = tpu.reciprocal %671 {approx = true} : vector<4x8x1xf32> -> vector<4x8x1xf32>
    %673 = vector.broadcast %672 : vector<4x8x1xf32> to vector<4x8x8xf32>
    %674 = arith.mulf %669, %673 : vector<4x8x8xf32>
    "tpu.trace_start"() <{level = 10 : i32, message = "hqk,hkd->hqd"}> : () -> ()
    %cst_181 = arith.constant dense<0.000000e+00> : vector<4x8x8xf32>
    %675 = tpu.matmul %674, %660, %cst_181 {dimension_numbers = #tpu.dot_dimension_numbers<[2], [1], [1], [2], [0, 0, 0, 1, 1, 2], [0], [0]>} : vector<4x8x8xf32>, vector<4x8x8xf32>, vector<4x8x8xf32> -> vector<4x8x8xf32>
    "tpu.trace_stop"() : () -> ()
    %676 = vector.extract_strided_slice %675 {offsets = [0, 0, 0], sizes = [1, 8, 8], strides = [1, 1, 1]} : vector<4x8x8xf32> to vector<1x8x8xf32>
    %677 = vector.shape_cast %676 : vector<1x8x8xf32> to vector<8x8xf32>
    %678 = vector.extract_strided_slice %675 {offsets = [1, 0, 0], sizes = [1, 8, 8], strides = [1, 1, 1]} : vector<4x8x8xf32> to vector<1x8x8xf32>
    %679 = vector.shape_cast %678 : vector<1x8x8xf32> to vector<8x8xf32>
    %680 = vector.extract_strided_slice %675 {offsets = [2, 0, 0], sizes = [1, 8, 8], strides = [1, 1, 1]} : vector<4x8x8xf32> to vector<1x8x8xf32>
    %681 = vector.shape_cast %680 : vector<1x8x8xf32> to vector<8x8xf32>
    %682 = vector.extract_strided_slice %675 {offsets = [3, 0, 0], sizes = [1, 8, 8], strides = [1, 1, 1]} : vector<4x8x8xf32> to vector<1x8x8xf32>
    %683 = vector.shape_cast %682 : vector<1x8x8xf32> to vector<8x8xf32>
    %684 = tpu.concatenate %677, %679, %681, %683 in 1 : vector<8x8xf32>, vector<8x8xf32>, vector<8x8xf32>, vector<8x8xf32> -> vector<8x32xf32>
    %cst_182 = arith.constant dense<0.000000e+00> : vector<8x32xf32>
    %685 = tpu.matmul %684, %627, %cst_182 {dimension_numbers = #tpu.dot_dimension_numbers<[1], [0], [0], [1], [0, 0, 1, 1], [], []>} : vector<8x32xf32>, vector<32x32xf32>, vector<8x32xf32> -> vector<8x32xf32>
    %686 = arith.addf %588, %685 : vector<8x32xf32>
    %687 = vector.broadcast %592 : vector<1x32xf32> to vector<8x32xf32>
    %688 = arith.addf %686, %687 : vector<8x32xf32>
    %cst_183 = arith.constant dense<0.000000e+00> : vector<8xf32>
    %689 = vector.multi_reduction <add>, %688, %cst_183 [1] : vector<8x32xf32> to vector<8xf32>
    %690 = vector.shape_cast %689 : vector<8xf32> to vector<8x1xf32>
    %cst_184 = arith.constant 3.200000e+01 : f32
    %691 = vector.broadcast %cst_184 : f32 to vector<8x1xf32>
    %692 = arith.divf %690, %691 : vector<8x1xf32>
    %693 = vector.broadcast %692 : vector<8x1xf32> to vector<8x32xf32>
    %694 = arith.subf %688, %693 : vector<8x32xf32>
    %695 = arith.mulf %694, %694 : vector<8x32xf32>
    %cst_185 = arith.constant dense<0.000000e+00> : vector<8xf32>
    %696 = vector.multi_reduction <add>, %695, %cst_185 [1] : vector<8x32xf32> to vector<8xf32>
    %697 = vector.shape_cast %696 : vector<8xf32> to vector<8x1xf32>
    %cst_186 = arith.constant 0.0322580636 : f32
    %698 = vector.broadcast %cst_186 : f32 to vector<8x1xf32>
    %699 = arith.mulf %697, %698 : vector<8x1xf32>
    %700 = math.sqrt %699 : vector<8x1xf32>
    %cst_187 = arith.constant 9.99999997E-7 : f32
    %701 = vector.broadcast %cst_187 : f32 to vector<8x1xf32>
    %702 = arith.addf %700, %701 : vector<8x1xf32>
    %703 = tpu.reciprocal %702 {approx = true} : vector<8x1xf32> -> vector<8x1xf32>
    %704 = vector.broadcast %599 : vector<1x32xf32> to vector<8x32xf32>
    %705 = arith.mulf %704, %694 : vector<8x32xf32>
    %706 = vector.broadcast %703 : vector<8x1xf32> to vector<8x32xf32>
    %707 = arith.mulf %705, %706 : vector<8x32xf32>
    %708 = vector.broadcast %600 : vector<1x32xf32> to vector<8x32xf32>
    %709 = arith.addf %707, %708 : vector<8x32xf32>
    %c1_188 = arith.constant 1 : index
    %c0_189 = arith.constant 0 : index
    %c0_190 = arith.constant 0 : index
    %710 = vector.load %arg17[%c1_188, %c0_189, %c0_190] : memref<2x32x96xf32, #tpu.memory_space<vmem>>, vector<1x32x96xf32>
    %711 = vector.shape_cast %710 : vector<1x32x96xf32> to vector<32x96xf32>
    %c1_191 = arith.constant 1 : index
    %c0_192 = arith.constant 0 : index
    %c0_193 = arith.constant 0 : index
    %712 = vector.load %arg18[%c1_191, %c0_192, %c0_193] : memref<2x32x32xf32, #tpu.memory_space<vmem>>, vector<1x32x32xf32>
    %713 = vector.shape_cast %712 : vector<1x32x32xf32> to vector<32x32xf32>
    %714 = vector.extract_strided_slice %711 {offsets = [0, 0], sizes = [32, 32], strides = [1, 1]} : vector<32x96xf32> to vector<32x32xf32>
    %cst_194 = arith.constant dense<0.000000e+00> : vector<8x32xf32>
    %715 = tpu.matmul %709, %714, %cst_194 {dimension_numbers = #tpu.dot_dimension_numbers<[1], [0], [0], [1], [0, 0, 1, 1], [], []>} : vector<8x32xf32>, vector<32x32xf32>, vector<8x32xf32> -> vector<8x32xf32>
    %716 = vector.extract_strided_slice %593 {offsets = [0, 0], sizes = [1, 32], strides = [1, 1]} : vector<1x96xf32> to vector<1x32xf32>
    %717 = vector.broadcast %716 : vector<1x32xf32> to vector<8x32xf32>
    %718 = arith.addf %715, %717 : vector<8x32xf32>
    %719 = vector.extract_strided_slice %711 {offsets = [0, 32], sizes = [32, 64], strides = [1, 1]} : vector<32x96xf32> to vector<32x64xf32>
    %cst_195 = arith.constant dense<0.000000e+00> : vector<8x64xf32>
    %720 = tpu.matmul %358, %719, %cst_195 {dimension_numbers = #tpu.dot_dimension_numbers<[1], [0], [0], [1], [0, 0, 1, 1], [], []>} : vector<8x32xf32>, vector<32x64xf32>, vector<8x64xf32> -> vector<8x64xf32>
    %721 = vector.extract_strided_slice %593 {offsets = [0, 32], sizes = [1, 64], strides = [1, 1]} : vector<1x96xf32> to vector<1x64xf32>
    %722 = vector.broadcast %721 : vector<1x64xf32> to vector<8x64xf32>
    %723 = arith.addf %720, %722 : vector<8x64xf32>
    %724 = vector.extract_strided_slice %723 {offsets = [0, 0], sizes = [8, 32], strides = [1, 1]} : vector<8x64xf32> to vector<8x32xf32>
    %725 = vector.extract_strided_slice %723 {offsets = [0, 32], sizes = [8, 32], strides = [1, 1]} : vector<8x64xf32> to vector<8x32xf32>
    %726 = vector.extract_strided_slice %718 {offsets = [0, 0], sizes = [8, 8], strides = [1, 1]} : vector<8x32xf32> to vector<8x8xf32>
    %727 = vector.extract_strided_slice %718 {offsets = [0, 8], sizes = [8, 8], strides = [1, 1]} : vector<8x32xf32> to vector<8x8xf32>
    %728 = vector.extract_strided_slice %718 {offsets = [0, 16], sizes = [8, 8], strides = [1, 1]} : vector<8x32xf32> to vector<8x8xf32>
    %729 = vector.extract_strided_slice %718 {offsets = [0, 24], sizes = [8, 8], strides = [1, 1]} : vector<8x32xf32> to vector<8x8xf32>
    %730 = vector.shape_cast %726 : vector<8x8xf32> to vector<1x8x8xf32>
    %731 = vector.shape_cast %727 : vector<8x8xf32> to vector<1x8x8xf32>
    %732 = vector.shape_cast %728 : vector<8x8xf32> to vector<1x8x8xf32>
    %733 = vector.shape_cast %729 : vector<8x8xf32> to vector<1x8x8xf32>
    %734 = tpu.concatenate %730, %731, %732, %733 in 0 : vector<1x8x8xf32>, vector<1x8x8xf32>, vector<1x8x8xf32>, vector<1x8x8xf32> -> vector<4x8x8xf32>
    %735 = vector.extract_strided_slice %724 {offsets = [0, 0], sizes = [8, 8], strides = [1, 1]} : vector<8x32xf32> to vector<8x8xf32>
    %736 = vector.extract_strided_slice %724 {offsets = [0, 8], sizes = [8, 8], strides = [1, 1]} : vector<8x32xf32> to vector<8x8xf32>
    %737 = vector.extract_strided_slice %724 {offsets = [0, 16], sizes = [8, 8], strides = [1, 1]} : vector<8x32xf32> to vector<8x8xf32>
    %738 = vector.extract_strided_slice %724 {offsets = [0, 24], sizes = [8, 8], strides = [1, 1]} : vector<8x32xf32> to vector<8x8xf32>
    %739 = vector.shape_cast %735 : vector<8x8xf32> to vector<1x8x8xf32>
    %740 = vector.shape_cast %736 : vector<8x8xf32> to vector<1x8x8xf32>
    %741 = vector.shape_cast %737 : vector<8x8xf32> to vector<1x8x8xf32>
    %742 = vector.shape_cast %738 : vector<8x8xf32> to vector<1x8x8xf32>
    %743 = tpu.concatenate %739, %740, %741, %742 in 0 : vector<1x8x8xf32>, vector<1x8x8xf32>, vector<1x8x8xf32>, vector<1x8x8xf32> -> vector<4x8x8xf32>
    %744 = vector.extract_strided_slice %725 {offsets = [0, 0], sizes = [8, 8], strides = [1, 1]} : vector<8x32xf32> to vector<8x8xf32>
    %745 = vector.extract_strided_slice %725 {offsets = [0, 8], sizes = [8, 8], strides = [1, 1]} : vector<8x32xf32> to vector<8x8xf32>
    %746 = vector.extract_strided_slice %725 {offsets = [0, 16], sizes = [8, 8], strides = [1, 1]} : vector<8x32xf32> to vector<8x8xf32>
    %747 = vector.extract_strided_slice %725 {offsets = [0, 24], sizes = [8, 8], strides = [1, 1]} : vector<8x32xf32> to vector<8x8xf32>
    %748 = vector.shape_cast %744 : vector<8x8xf32> to vector<1x8x8xf32>
    %749 = vector.shape_cast %745 : vector<8x8xf32> to vector<1x8x8xf32>
    %750 = vector.shape_cast %746 : vector<8x8xf32> to vector<1x8x8xf32>
    %751 = vector.shape_cast %747 : vector<8x8xf32> to vector<1x8x8xf32>
    %752 = tpu.concatenate %748, %749, %750, %751 in 0 : vector<1x8x8xf32>, vector<1x8x8xf32>, vector<1x8x8xf32>, vector<1x8x8xf32> -> vector<4x8x8xf32>
    "tpu.trace_start"() <{level = 10 : i32, message = "hqd,hkd->hqk"}> : () -> ()
    %cst_196 = arith.constant dense<0.000000e+00> : vector<4x8x8xf32>
    %753 = tpu.matmul %734, %743, %cst_196 {dimension_numbers = #tpu.dot_dimension_numbers<[2], [2], [1], [1], [0, 0, 0, 1, 1, 1], [0], [0]>} : vector<4x8x8xf32>, vector<4x8x8xf32>, vector<4x8x8xf32> -> vector<4x8x8xf32>
    "tpu.trace_stop"() : () -> ()
    %754 = vector.shape_cast %362 : vector<8x8xf32> to vector<1x8x8xf32>
    %755 = vector.broadcast %754 : vector<1x8x8xf32> to vector<4x8x8xf32>
    %756 = arith.addf %753, %755 : vector<4x8x8xf32>
    %cst_197 = arith.constant dense<0xFF800000> : vector<4x8xf32>
    %757 = vector.multi_reduction <maximumf>, %756, %cst_197 [2] : vector<4x8x8xf32> to vector<4x8xf32>
    %758 = vector.shape_cast %757 : vector<4x8xf32> to vector<4x8x1xf32>
    %759 = vector.broadcast %758 : vector<4x8x1xf32> to vector<4x8x8xf32>
    %760 = arith.subf %756, %759 : vector<4x8x8xf32>
    %761 = math.exp %760 : vector<4x8x8xf32>
    %cst_198 = arith.constant dense<0.000000e+00> : vector<4x8xf32>
    %762 = vector.multi_reduction <add>, %761, %cst_198 [2] : vector<4x8x8xf32> to vector<4x8xf32>
    %763 = vector.shape_cast %762 : vector<4x8xf32> to vector<4x8x1xf32>
    %764 = tpu.reciprocal %763 {approx = true} : vector<4x8x1xf32> -> vector<4x8x1xf32>
    %765 = vector.broadcast %764 : vector<4x8x1xf32> to vector<4x8x8xf32>
    %766 = arith.mulf %761, %765 : vector<4x8x8xf32>
    "tpu.trace_start"() <{level = 10 : i32, message = "hqk,hkd->hqd"}> : () -> ()
    %cst_199 = arith.constant dense<0.000000e+00> : vector<4x8x8xf32>
    %767 = tpu.matmul %766, %752, %cst_199 {dimension_numbers = #tpu.dot_dimension_numbers<[2], [1], [1], [2], [0, 0, 0, 1, 1, 2], [0], [0]>} : vector<4x8x8xf32>, vector<4x8x8xf32>, vector<4x8x8xf32> -> vector<4x8x8xf32>
    "tpu.trace_stop"() : () -> ()
    %768 = vector.extract_strided_slice %767 {offsets = [0, 0, 0], sizes = [1, 8, 8], strides = [1, 1, 1]} : vector<4x8x8xf32> to vector<1x8x8xf32>
    %769 = vector.shape_cast %768 : vector<1x8x8xf32> to vector<8x8xf32>
    %770 = vector.extract_strided_slice %767 {offsets = [1, 0, 0], sizes = [1, 8, 8], strides = [1, 1, 1]} : vector<4x8x8xf32> to vector<1x8x8xf32>
    %771 = vector.shape_cast %770 : vector<1x8x8xf32> to vector<8x8xf32>
    %772 = vector.extract_strided_slice %767 {offsets = [2, 0, 0], sizes = [1, 8, 8], strides = [1, 1, 1]} : vector<4x8x8xf32> to vector<1x8x8xf32>
    %773 = vector.shape_cast %772 : vector<1x8x8xf32> to vector<8x8xf32>
    %774 = vector.extract_strided_slice %767 {offsets = [3, 0, 0], sizes = [1, 8, 8], strides = [1, 1, 1]} : vector<4x8x8xf32> to vector<1x8x8xf32>
    %775 = vector.shape_cast %774 : vector<1x8x8xf32> to vector<8x8xf32>
    %776 = tpu.concatenate %769, %771, %773, %775 in 1 : vector<8x8xf32>, vector<8x8xf32>, vector<8x8xf32>, vector<8x8xf32> -> vector<8x32xf32>
    %cst_200 = arith.constant dense<0.000000e+00> : vector<8x32xf32>
    %777 = tpu.matmul %776, %713, %cst_200 {dimension_numbers = #tpu.dot_dimension_numbers<[1], [0], [0], [1], [0, 0, 1, 1], [], []>} : vector<8x32xf32>, vector<32x32xf32>, vector<8x32xf32> -> vector<8x32xf32>
    %778 = arith.addf %688, %777 : vector<8x32xf32>
    %779 = vector.broadcast %594 : vector<1x32xf32> to vector<8x32xf32>
    %780 = arith.addf %778, %779 : vector<8x32xf32>
    %cst_201 = arith.constant dense<0.000000e+00> : vector<8xf32>
    %781 = vector.multi_reduction <add>, %780, %cst_201 [1] : vector<8x32xf32> to vector<8xf32>
    %782 = vector.shape_cast %781 : vector<8xf32> to vector<8x1xf32>
    %cst_202 = arith.constant 3.200000e+01 : f32
    %783 = vector.broadcast %cst_202 : f32 to vector<8x1xf32>
    %784 = arith.divf %782, %783 : vector<8x1xf32>
    %785 = vector.broadcast %784 : vector<8x1xf32> to vector<8x32xf32>
    %786 = arith.subf %780, %785 : vector<8x32xf32>
    %787 = arith.mulf %786, %786 : vector<8x32xf32>
    %cst_203 = arith.constant dense<0.000000e+00> : vector<8xf32>
    %788 = vector.multi_reduction <add>, %787, %cst_203 [1] : vector<8x32xf32> to vector<8xf32>
    %789 = vector.shape_cast %788 : vector<8xf32> to vector<8x1xf32>
    %cst_204 = arith.constant 0.0322580636 : f32
    %790 = vector.broadcast %cst_204 : f32 to vector<8x1xf32>
    %791 = arith.mulf %789, %790 : vector<8x1xf32>
    %792 = math.sqrt %791 : vector<8x1xf32>
    %cst_205 = arith.constant 9.99999997E-7 : f32
    %793 = vector.broadcast %cst_205 : f32 to vector<8x1xf32>
    %794 = arith.addf %792, %793 : vector<8x1xf32>
    %795 = tpu.reciprocal %794 {approx = true} : vector<8x1xf32> -> vector<8x1xf32>
    %796 = vector.broadcast %601 : vector<1x32xf32> to vector<8x32xf32>
    %797 = arith.mulf %796, %786 : vector<8x32xf32>
    %798 = vector.broadcast %795 : vector<8x1xf32> to vector<8x32xf32>
    %799 = arith.mulf %797, %798 : vector<8x32xf32>
    %800 = vector.broadcast %602 : vector<1x32xf32> to vector<8x32xf32>
    %801 = arith.addf %799, %800 : vector<8x32xf32>
    %c1_206 = arith.constant 1 : index
    %c0_207 = arith.constant 0 : index
    %c0_208 = arith.constant 0 : index
    %802 = vector.load %arg19[%c1_206, %c0_207, %c0_208] : memref<2x32x64xf32, #tpu.memory_space<vmem>>, vector<1x32x64xf32>
    %803 = vector.shape_cast %802 : vector<1x32x64xf32> to vector<32x64xf32>
    %cst_209 = arith.constant dense<0.000000e+00> : vector<8x64xf32>
    %804 = tpu.matmul %801, %803, %cst_209 {dimension_numbers = #tpu.dot_dimension_numbers<[1], [0], [0], [1], [0, 0, 1, 1], [], []>} : vector<8x32xf32>, vector<32x64xf32>, vector<8x64xf32> -> vector<8x64xf32>
    %805 = vector.broadcast %595 : vector<1x64xf32> to vector<8x64xf32>
    %806 = arith.addf %804, %805 : vector<8x64xf32>
    %cst_210 = arith.constant 0.000000e+00 : f32
    %807 = vector.broadcast %cst_210 : f32 to vector<8x64xf32>
    %808 = arith.maximumf %806, %807 : vector<8x64xf32>
    %c1_211 = arith.constant 1 : index
    %c0_212 = arith.constant 0 : index
    %c0_213 = arith.constant 0 : index
    %809 = vector.load %arg20[%c1_211, %c0_212, %c0_213] : memref<2x64x32xf32, #tpu.memory_space<vmem>>, vector<1x64x32xf32>
    %810 = vector.shape_cast %809 : vector<1x64x32xf32> to vector<64x32xf32>
    %cst_214 = arith.constant dense<0.000000e+00> : vector<8x32xf32>
    %811 = tpu.matmul %808, %810, %cst_214 {dimension_numbers = #tpu.dot_dimension_numbers<[1], [0], [0], [1], [0, 0, 1, 1], [], []>} : vector<8x64xf32>, vector<64x32xf32>, vector<8x32xf32> -> vector<8x32xf32>
    %812 = arith.addf %780, %811 : vector<8x32xf32>
    %813 = vector.broadcast %596 : vector<1x32xf32> to vector<8x32xf32>
    %814 = arith.addf %812, %813 : vector<8x32xf32>
    %c0_215 = arith.constant 0 : index
    %c0_216 = arith.constant 0 : index
    %815 = vector.load %arg22[%c0_215, %c0_216] : memref<2x32xf32, #tpu.memory_space<vmem>>, vector<2x32xf32>
    %816 = vector.extract_strided_slice %815 {offsets = [0, 0], sizes = [1, 32], strides = [1, 1]} : vector<2x32xf32> to vector<1x32xf32>
    %817 = vector.extract_strided_slice %815 {offsets = [1, 0], sizes = [1, 32], strides = [1, 1]} : vector<2x32xf32> to vector<1x32xf32>
    %cst_217 = arith.constant dense<0.000000e+00> : vector<8xf32>
    %818 = vector.multi_reduction <add>, %814, %cst_217 [1] : vector<8x32xf32> to vector<8xf32>
    %819 = vector.shape_cast %818 : vector<8xf32> to vector<8x1xf32>
    %cst_218 = arith.constant 3.200000e+01 : f32
    %820 = vector.broadcast %cst_218 : f32 to vector<8x1xf32>
    %821 = arith.divf %819, %820 : vector<8x1xf32>
    %822 = vector.broadcast %821 : vector<8x1xf32> to vector<8x32xf32>
    %823 = arith.subf %814, %822 : vector<8x32xf32>
    %824 = arith.mulf %823, %823 : vector<8x32xf32>
    %cst_219 = arith.constant dense<0.000000e+00> : vector<8xf32>
    %825 = vector.multi_reduction <add>, %824, %cst_219 [1] : vector<8x32xf32> to vector<8xf32>
    %826 = vector.shape_cast %825 : vector<8xf32> to vector<8x1xf32>
    %cst_220 = arith.constant 0.0322580636 : f32
    %827 = vector.broadcast %cst_220 : f32 to vector<8x1xf32>
    %828 = arith.mulf %826, %827 : vector<8x1xf32>
    %829 = math.sqrt %828 : vector<8x1xf32>
    %cst_221 = arith.constant 9.99999997E-7 : f32
    %830 = vector.broadcast %cst_221 : f32 to vector<8x1xf32>
    %831 = arith.addf %829, %830 : vector<8x1xf32>
    %832 = tpu.reciprocal %831 {approx = true} : vector<8x1xf32> -> vector<8x1xf32>
    %833 = vector.broadcast %816 : vector<1x32xf32> to vector<8x32xf32>
    %834 = arith.mulf %833, %823 : vector<8x32xf32>
    %835 = vector.broadcast %832 : vector<8x1xf32> to vector<8x32xf32>
    %836 = arith.mulf %834, %835 : vector<8x32xf32>
    %837 = vector.broadcast %817 : vector<1x32xf32> to vector<8x32xf32>
    %838 = arith.addf %836, %837 : vector<8x32xf32>
    %c0_222 = arith.constant 0 : index
    %c0_223 = arith.constant 0 : index
    %c0_224 = arith.constant 0 : index
    %839 = vector.load %arg23[%c0_222, %c0_223, %c0_224] : memref<1x8x32xf32, #tpu.memory_space<vmem>>, vector<1x8x32xf32>
    %840 = vector.shape_cast %839 : vector<1x8x32xf32> to vector<8x32xf32>
    %841 = vector.shape_cast %838 : vector<8x32xf32> to vector<1x8x32xf32>
    tpu.vector_store %arg23[%c0_222, %c0_223, %c0_224], %841 {strides = array<i32>} : memref<1x8x32xf32, #tpu.memory_space<vmem>>, vector<1x8x32xf32>,
    return
  }
  func.func @transform_0(%arg0: i32, %arg1: memref<2x8xi32, #tpu.memory_space<smem>>, %arg2: memref<2x8xi32, #tpu.memory_space<smem>>) -> (i32, i32) {
    %c0_i32 = arith.constant 0 : i32
    %c0_i32_0 = arith.constant 0 : i32
    %c0_i32_1 = arith.constant 0 : i32
    return %c0_i32, %c0_i32_0 : i32, i32
  }
  func.func @transform_1(%arg0: i32, %arg1: memref<2x8xi32, #tpu.memory_space<smem>>, %arg2: memref<2x8xi32, #tpu.memory_space<smem>>) -> (i32, i32) {
    %c0_i32 = arith.constant 0 : i32
    %c0_i32_0 = arith.constant 0 : i32
    %c0_i32_1 = arith.constant 0 : i32
    return %c0_i32, %c0_i32_0 : i32, i32
  }
  func.func @transform_2(%arg0: i32, %arg1: memref<2x8xi32, #tpu.memory_space<smem>>, %arg2: memref<2x8xi32, #tpu.memory_space<smem>>) -> (i32, i32) {
    %c0_i32 = arith.constant 0 : i32
    %c0_i32_0 = arith.constant 0 : i32
    %c0_i32_1 = arith.constant 0 : i32
    return %c0_i32, %c0_i32_0 : i32, i32
  }
  func.func @transform_3(%arg0: i32, %arg1: memref<2x8xi32, #tpu.memory_space<smem>>, %arg2: memref<2x8xi32, #tpu.memory_space<smem>>) -> (i32, i32, i32) {
    %c0_i32 = arith.constant 0 : i32
    %c0_i32_0 = arith.constant 0 : i32
    %c0_i32_1 = arith.constant 0 : i32
    return %arg0, %c0_i32, %c0_i32_0 : i32, i32, i32
  }
  func.func @transform_4(%arg0: i32, %arg1: memref<2x8xi32, #tpu.memory_space<smem>>, %arg2: memref<2x8xi32, #tpu.memory_space<smem>>) -> (i32, i32, i32) {
    %c0_i32 = arith.constant 0 : i32
    %c0_i32_0 = arith.constant 0 : i32
    %c0_i32_1 = arith.constant 0 : i32
    return %arg0, %c0_i32, %c0_i32_0 : i32, i32, i32
  }
  func.func @transform_5(%arg0: i32, %arg1: memref<2x8xi32, #tpu.memory_space<smem>>, %arg2: memref<2x8xi32, #tpu.memory_space<smem>>) -> (i32, i32, i32) {
    %c0_i32 = arith.constant 0 : i32
    %c0_i32_0 = arith.constant 0 : i32
    %c0_i32_1 = arith.constant 0 : i32
    return %arg0, %c0_i32, %c0_i32_0 : i32, i32, i32
  }
  func.func @transform_6(%arg0: i32, %arg1: memref<2x8xi32, #tpu.memory_space<smem>>, %arg2: memref<2x8xi32, #tpu.memory_space<smem>>) -> (i32, i32, i32) {
    %c0_i32 = arith.constant 0 : i32
    %c0_i32_0 = arith.constant 0 : i32
    %c0_i32_1 = arith.constant 0 : i32
    %c0_i32_2 = arith.constant 0 : i32
    return %c0_i32, %c0_i32_0, %c0_i32_1 : i32, i32, i32
  }
  func.func @transform_7(%arg0: i32, %arg1: memref<2x8xi32, #tpu.memory_space<smem>>, %arg2: memref<2x8xi32, #tpu.memory_space<smem>>) -> (i32, i32, i32) {
    %c0_i32 = arith.constant 0 : i32
    %c0_i32_0 = arith.constant 0 : i32
    %c0_i32_1 = arith.constant 0 : i32
    %c0_i32_2 = arith.constant 0 : i32
    return %c0_i32, %c0_i32_0, %c0_i32_1 : i32, i32, i32
  }
  func.func @transform_8(%arg0: i32, %arg1: memref<2x8xi32, #tpu.memory_space<smem>>, %arg2: memref<2x8xi32, #tpu.memory_space<smem>>) -> (i32, i32, i32) {
    %c0_i32 = arith.constant 0 : i32
    %c0_i32_0 = arith.constant 0 : i32
    %c0_i32_1 = arith.constant 0 : i32
    %c0_i32_2 = arith.constant 0 : i32
    return %c0_i32, %c0_i32_0, %c0_i32_1 : i32, i32, i32
  }
  func.func @transform_9(%arg0: i32, %arg1: memref<2x8xi32, #tpu.memory_space<smem>>, %arg2: memref<2x8xi32, #tpu.memory_space<smem>>) -> (i32, i32, i32) {
    %c0_i32 = arith.constant 0 : i32
    %c0_i32_0 = arith.constant 0 : i32
    %c0_i32_1 = arith.constant 0 : i32
    %c0_i32_2 = arith.constant 0 : i32
    return %c0_i32, %c0_i32_0, %c0_i32_1 : i32, i32, i32
  }
  func.func @transform_10(%arg0: i32, %arg1: memref<2x8xi32, #tpu.memory_space<smem>>, %arg2: memref<2x8xi32, #tpu.memory_space<smem>>) -> (i32, i32, i32) {
    %c0_i32 = arith.constant 0 : i32
    %c0_i32_0 = arith.constant 0 : i32
    %c0_i32_1 = arith.constant 0 : i32
    %c0_i32_2 = arith.constant 0 : i32
    return %c0_i32, %c0_i32_0, %c0_i32_1 : i32, i32, i32
  }
  func.func @transform_11(%arg0: i32, %arg1: memref<2x8xi32, #tpu.memory_space<smem>>, %arg2: memref<2x8xi32, #tpu.memory_space<smem>>) -> (i32, i32) {
    %c0_i32 = arith.constant 0 : i32
    %c0_i32_0 = arith.constant 0 : i32
    %c0_i32_1 = arith.constant 0 : i32
    return %c0_i32, %c0_i32_0 : i32, i32
  }
  func.func @transform_12(%arg0: i32, %arg1: memref<2x8xi32, #tpu.memory_space<smem>>, %arg2: memref<2x8xi32, #tpu.memory_space<smem>>) -> (i32, i32, i32) {
    %c0_i32 = arith.constant 0 : i32
    %c0_i32_0 = arith.constant 0 : i32
    %c0_i32_1 = arith.constant 0 : i32
    %c0_i32_2 = arith.constant 0 : i32
    return %c0_i32, %c0_i32_0, %c0_i32_1 : i32, i32, i32
  }
  func.func @transform_13(%arg0: i32, %arg1: memref<2x8xi32, #tpu.memory_space<smem>>, %arg2: memref<2x8xi32, #tpu.memory_space<smem>>) -> (i32, i32, i32) {
    %c0_i32 = arith.constant 0 : i32
    %c0_i32_0 = arith.constant 0 : i32
    %c0_i32_1 = arith.constant 0 : i32
    %c0_i32_2 = arith.constant 0 : i32
    return %c0_i32, %c0_i32_0, %c0_i32_1 : i32, i32, i32
  }
  func.func @transform_14(%arg0: i32, %arg1: memref<2x8xi32, #tpu.memory_space<smem>>, %arg2: memref<2x8xi32, #tpu.memory_space<smem>>) -> (i32, i32, i32) {
    %c0_i32 = arith.constant 0 : i32
    %c0_i32_0 = arith.constant 0 : i32
    %c0_i32_1 = arith.constant 0 : i32
    %c0_i32_2 = arith.constant 0 : i32
    return %c0_i32, %c0_i32_0, %c0_i32_1 : i32, i32, i32
  }
  func.func @transform_15(%arg0: i32, %arg1: memref<2x8xi32, #tpu.memory_space<smem>>, %arg2: memref<2x8xi32, #tpu.memory_space<smem>>) -> (i32, i32, i32) {
    %c0_i32 = arith.constant 0 : i32
    %c0_i32_0 = arith.constant 0 : i32
    %c0_i32_1 = arith.constant 0 : i32
    %c0_i32_2 = arith.constant 0 : i32
    return %c0_i32, %c0_i32_0, %c0_i32_1 : i32, i32, i32
  }
  func.func @transform_16(%arg0: i32, %arg1: memref<2x8xi32, #tpu.memory_space<smem>>, %arg2: memref<2x8xi32, #tpu.memory_space<smem>>) -> (i32, i32, i32) {
    %c0_i32 = arith.constant 0 : i32
    %c0_i32_0 = arith.constant 0 : i32
    %c0_i32_1 = arith.constant 0 : i32
    %c0_i32_2 = arith.constant 0 : i32
    return %c0_i32, %c0_i32_0, %c0_i32_1 : i32, i32, i32
  }
  func.func @transform_17(%arg0: i32, %arg1: memref<2x8xi32, #tpu.memory_space<smem>>, %arg2: memref<2x8xi32, #tpu.memory_space<smem>>) -> (i32, i32, i32) {
    %c0_i32 = arith.constant 0 : i32
    %c0_i32_0 = arith.constant 0 : i32
    %c0_i32_1 = arith.constant 0 : i32
    %c0_i32_2 = arith.constant 0 : i32
    return %c0_i32, %c0_i32_0, %c0_i32_1 : i32, i32, i32
  }
  func.func @transform_18(%arg0: i32, %arg1: memref<2x8xi32, #tpu.memory_space<smem>>, %arg2: memref<2x8xi32, #tpu.memory_space<smem>>) -> (i32, i32, i32) {
    %c0_i32 = arith.constant 0 : i32
    %c0_i32_0 = arith.constant 0 : i32
    %c0_i32_1 = arith.constant 0 : i32
    %c0_i32_2 = arith.constant 0 : i32
    return %c0_i32, %c0_i32_0, %c0_i32_1 : i32, i32, i32
  }
  func.func @transform_19(%arg0: i32, %arg1: memref<2x8xi32, #tpu.memory_space<smem>>, %arg2: memref<2x8xi32, #tpu.memory_space<smem>>) -> (i32, i32) {
    %c0_i32 = arith.constant 0 : i32
    %c0_i32_0 = arith.constant 0 : i32
    %c0_i32_1 = arith.constant 0 : i32
    return %c0_i32, %c0_i32_0 : i32, i32
  }
  func.func @transform_20(%arg0: i32, %arg1: memref<2x8xi32, #tpu.memory_space<smem>>, %arg2: memref<2x8xi32, #tpu.memory_space<smem>>) -> (i32, i32, i32) {
    %c0_i32 = arith.constant 0 : i32
    %c0_i32_0 = arith.constant 0 : i32
    %c0_i32_1 = arith.constant 0 : i32
    return %arg0, %c0_i32, %c0_i32_0 : i32, i32, i32
  }
}

</mosaic_0001>

<bundles_post_ra>
// kernel: transformer_forward.1
= control target key start
LH: loop header
LB: loop body
LE: loop exit
PB: predicated region body
PF: predicated region fallthrough
CT: control target
= control target key end

     0   :  { %s4322_s23 = smov [#allocation3]   ;;  %s5476_s0 = inlined_call_operand.vmem [shape: s32[2,8], index: 0, kind: input, shape index: {}]   ;;  %s5477_s2 = inlined_call_operand.vmem [shape: f32[16,32], index: 2, kind: input, shape index: {}]   ;;  %s5478_s3 = inlined_call_operand.vmem [shape: f32[16,32], index: 3, kind: input, shape index: {}]   ;;  %s5479_s4 = inlined_call_operand.vmem [shape: f32[8,32], index: 4, kind: input, shape index: {}]   ;;  %s5480_s5 = inlined_call_operand.vmem [shape: f32[2,8,8], index: 5, kind: input, shape index: {}, may-alias: {5,7}]   ;;  %s5481_s6 = inlined_call_operand.vmem [shape: f32[2,8,8], index: 6, kind: input, shape index: {}]   ;;  %s5482_s7 = inlined_call_operand.vmem [shape: f32[2,8,8], index: 7, kind: input, shape index: {}, may-alias: {5,7}]   ;;  %s5483_s8 = inlined_call_operand.vmem [shape: f32[2,32,96], index: 8, kind: input, shape index: {}]   ;;  %s5484_s9 = inlined_call_operand.vmem [shape: f32[2,32,32], index: 9, kind: input, shape index: {}]   ;;  %s5485_s10 = inlined_call_operand.vmem [shape: f32[2,32,64], index: 10, kind: input, shape index: {}]   ;;  %s5486_s11 = inlined_call_operand.vmem [shape: f32[2,64,32], index: 11, kind: input, shape index: {}]   ;;  %s5487_s12 = inlined_call_operand.vmem [shape: f32[2,8,96], index: 12, kind: input, shape index: {}]   ;;  %s5488_s13 = inlined_call_operand.vmem [shape: f32[2,32], index: 13, kind: input, shape index: {}]   ;;  %s5489_s14 = inlined_call_operand.vmem [shape: f32[2,32,96], index: 14, kind: input, shape index: {}]   ;;  %s5490_s15 = inlined_call_operand.vmem [shape: f32[2,32,32], index: 15, kind: input, shape index: {}]   ;;  %s5491_s16 = inlined_call_operand.hbm [shape: f32[2,32,96], index: 16, kind: input, shape index: {}]   ;;  %s5492_s17 = inlined_call_operand.hbm [shape: f32[2,32,32], index: 17, kind: input, shape index: {}]   ;;  %s5493_s18 = inlined_call_operand.hbm [shape: f32[2,32,64], index: 18, kind: input, shape index: {}]   ;;  %s5494_s19 = inlined_call_operand.vmem [shape: f32[2,64,32], index: 19, kind: input, shape index: {}]   ;;  %s5495_s20 = inlined_call_operand.vmem [shape: f32[2,12,96], index: 20, kind: input, shape index: {}]   ;;  %s5496_s21 = inlined_call_operand.vmem [shape: f32[2,32], index: 21, kind: input, shape index: {}]   ;;  %s5497_s22 = inlined_call_operand.hbm [shape: f32[2,8,32], index: 22, kind: output, shape index: {}]   ;;  %s5498_s1 = inlined_call_operand.vmem [shape: s32[2,8], index: 1, kind: input, shape index: {}]  }
   0x1   :  { %5536 = sst [smem:[#allocation25_spill]] %s5476_s0  ;;  %s33_s0 = sshll.u32 %s5498_s1, 4  ;;  %s34_s0 = int_to_ptr.vmem [resolvable:$true] %s33_s0 }
   0x2   :  { %5537 = sst [smem:[#allocation26_spill]] %s5477_s2  ;;  %s4323_s2 = smov [#allocation4]  }
   0x3   :  { %5538 = sst [smem:[#allocation27_spill]] %s5478_s3 }
   0x4   :  { %5539 = sst [smem:[#allocation28_spill]] %s5479_s4 }
   0x5   :  { %5540 = sst [smem:[#allocation29_spill]] %s5480_s5 }
   0x6   :  { %5541 = sst [smem:[#allocation30_spill]] %s5481_s6 }
   0x7   :  { %5542 = sst [smem:[#allocation31_spill]] %s5482_s7 }
   0x8   :  { %5543 = sst [smem:[#allocation32_spill]] %s5483_s8 }
   0x9   :  { %5544 = sst [smem:[#allocation33_spill]] %s5487_s12 }
   0xa   :  { %5545 = sst [smem:[#allocation34_spill]] %s5488_s13 }
   0xb   :  { %5546 = sst [smem:[#allocation35_spill]] %s5490_s15 }
   0xc   :  { %5547 = sst [smem:[#allocation36_spill]] %s5491_s16 }
   0xd   :  { %5548 = sst [smem:[#allocation37_spill]] %s5492_s17 }
   0xe   :  { %5549 = sst [smem:[#allocation38_spill]] %s5493_s18 }
   0xf   :  { %5550 = sst [smem:[#allocation39_spill]] %s5494_s19 }
  0x10   :  { %5551 = sst [smem:[#allocation40_spill]] %s5496_s21 }
  0x11   :  { %5552 = sst [smem:[#allocation41_spill]] %s5497_s22 }
  0x12   :  { %s5553_s29 = sld [smem:[#allocation25_spill]] }
  0x18   :  { %s28_s13 = sshll.u32 %s5553_s29, 4  ;;  %s29_s13 = int_to_ptr.vmem [resolvable:$true] %s28_s13 }
  0x19   :  { %31 = dma.vmem_to_smem %s29_s13, 32, %s4322_s23, [#allocation2] }
  0x1a   :  { %36 = dma.vmem_to_smem %s34_s0, 32, %s4323_s2, [#allocation2] }
  0x1b   :  { %4292 = dma.done.wait [#allocation2], 64 }
  0x1c   :  { %4293 = vsyncadd [#allocation2], 4294967232 }
  0x1d   :  { %39 = sfence }
  0x1e   :  { %40 = vsyncpa [#allocation6], 0 }
  0x1f   :  { %41 = vsyncpa [#allocation9], 0 }
  0x20   :  { %42 = vsyncpa [#allocation7], 0 }
  0x21   :  { %44 = vsyncpa [#allocation7 + $0x1], 0  ;;  %s4459_s6 = smov 0   ;;  %s4461_s24 = smov 0  }
  0x22   :  { %s4463_s7 = smov 0   ;;  %s4465_s1 = smov 0  }
  0x23 LB: > { %5554 = sst [smem:[#allocation16_spill]] %s4308_s6  ;;  %s4480_s13 = sadd.s32 4294967295, %s4320_s1   ;;  %s4320_s1 = sphi %s4465_s1, %s5602_s1   ;;  %s4316_s7 = sphi %s4463_s7, %s5605_s7   ;;  %s4312_s24 = sphi %s4461_s24, %s5604_s24   ;;  %s4308_s6 = sphi %s4459_s6, %s5603_s6  }
  0x24   : > { %5555 = sst [smem:[#allocation17_spill]] %s4312_s24  ;;  %s3703_s25 = sadd.s32 4294967294, %s4320_s1  }
  0x25   : > { %5556 = sst [smem:[#allocation18_spill]] %s4316_s7  ;;  %s4484_s26 = sadd.s32 1, %s4320_s1  }
  0x26   : > { %5557 = sst [smem:[#allocation19_spill]] %s4320_s1  ;;  %s492_s3 = sadd.s32 1, %s4316_s7 }
  0x27   : > { %5558 = sst [smem:[#allocation20_spill]] %s4480_s13  ;;  %s489_s27 = ssub.s32 %s4320_s1, %s4484_s26 }
  0x28   : > { %5559 = sst [smem:[#allocation21_spill]] %s4484_s26  ;;  %p502_p0 = scmp.ne.s32.totalorder %s4316_s7, %s4312_s24 }
  0x29   : > { %p490_p1 = scmp.eq.s32.totalorder %s489_s27, 0  ;;  %p503_p2 = scmp.eq.s32.totalorder %s4480_s13, 1 }
  0x2a   : > { %p508_p3 = scmp.ne.s32.totalorder %s4312_s24, %s4308_s6  ;;  %p509_p4 = scmp.eq.s32.totalorder %s3703_s25, 1 }
  0x2b   : > { %s4495_s4 = scalar_select %p490_p1, %s4316_s7, %s492_s3  }
  0x2c   : > { %p4497_p5 = por %p503_p2, %p502_p0  ;;  %p4501_p6 = por %p509_p4, %p508_p3 }
  0x2d   : > { %5560 = sst [smem:[#allocation22_spill]] %s4495_s4  ;;  %p3704_p7 = scmp.ge.s32.totalorder %s4320_s1, 1 }
  0x2e   : > { %s5561_s28 = scalar_select %p4497_p5, 1, 0 }
  0x2f   : > { %s5563_s29 = scalar_select %p4501_p6, 1, 0 }
  0x30   : > { %5562 = sst [smem:[#allocation23_spill]] %s5561_s28  ;;  %p516_p8 = scmp.lt.s32.totalorder %s4320_s1, 3 }
  0x31   : > { %5564 = sst [smem:[#allocation24_spill]] %s5563_s29  ;;  %p3883_p9 = scmp.eq.s32.totalorder %s4480_s13, 0 }
  0x32   : > { %p4508_p10 = pnand %p3704_p7, %p516_p8  ;;  %s5566_s17 = sld [smem:[#allocation37_spill]] }
  0x33   : > { %s5567_s16 = sld [smem:[#allocation36_spill]]  ;;  %s4324_s4 = smov [#allocation8]  }
  0x34   : > { %p3869_p11 = pneg %p4508_p10  ;;  %s576_s7 = sshll.u32 %s4324_s4, 4  ;;  %s577_s7 = int_to_ptr.vmem [resolvable:$true] %s576_s7 }
  0x35   : > { %s4325_s5 = smov 128   ;;  %s4326_s0 = smov 8  }
  0x36   : > { %p4522_p12 = pnand %p3883_p9, %p3869_p11  ;;  %s5569_s18 = sld [smem:[#allocation38_spill]] }
  0x37   : > { %s4328_s29 = smov [#allocation10]  }
  0x38   : > { %s574_s23 = sshll.u32 %s5566_s17, 4  ;;  %s4327_s17 = smov [#allocation5]   ;;  %s575_s23 = int_to_ptr.hbm [resolvable:$true] %s574_s23 }
  0x39   : > { %s560_s3 = sshll.u32 %s5567_s16, 4  ;;  %s562_s26 = sshll.u32 %s4327_s17, 4  ;;  %s561_s3 = int_to_ptr.hbm [resolvable:$true] %s560_s3  ;;  %s563_s26 = int_to_ptr.vmem [resolvable:$true] %s562_s26 }
  0x3a   : > { %3875 = dma.hbm_to_vmem [thread:$0]  (!%p4522_p12), %s575_s23, 1024, %s577_s7, [#allocation9], %s4325_s5, %s4325_s5, %s4326_s0  }
  0x3b   : > { %3872 = dma.hbm_to_vmem [thread:$0]  (!%p4522_p12), %s561_s3, 1024, %s563_s26, [#allocation6], %s4325_s5, %s4325_s5, %s4326_s0  }
  0x3c   : > { %s588_s16 = sshll.u32 %s5569_s18, 4  ;;  %s590_s6 = sshll.u32 %s4328_s29, 4  ;;  %s589_s16 = int_to_ptr.hbm [resolvable:$true] %s588_s16  ;;  %s591_s6 = int_to_ptr.vmem [resolvable:$true] %s590_s6 }
  0x3d   : > { %3878 = dma.hbm_to_vmem [thread:$0]  (!%p4522_p12), %s589_s16, 1024, %s591_s6, [#allocation9], %s4325_s5, %s4325_s5, %s4326_s0  }
  0x3e   : > { %636 = sbr.rel (%p4508_p10) target bundleno = 9930 (0x26ca), region = 100 }
  0x43   : > { %4295 = dma.done.wait (%p3883_p9), [#allocation6], 1024  }
  0x44   : > { %4297 = vsyncadd (%p3883_p9), [#allocation6], 4294966272 }
  0x45   : > { %4299 = dma.done.wait (%p3883_p9), [#allocation9], 2048  }
  0x46   : > { %4301 = vsyncadd (%p3883_p9), [#allocation9], 4294965248  ;;  %s4546_s17 = sshll.u32 %s4480_s13, 7  ;;  %s5570_s18 = sld [smem:[#allocation26_spill]]  ;;  %vm778_vm0 = vcmask 1040384   ;;  %vm780_vm1 = vcmask 1041408  }
  0x47   : > { %s726_s16 = sld [smem:[#allocation3 + %s4546_s17]]  ;;  %s5507_s6 = sadd.s32 1, %s4546_s17  ;;  %vm782_vm2 = vcmask 1042432   ;;  %vm784_vm3 = vcmask 1043456   ;;  %vm786_vm4 = vcmask 1044480   ;;  %vm788_vm5 = vcmask 1045504  }
  0x48   : > { %s730_s7 = sld [smem:[#allocation3 + %s5507_s6]]  ;;  %s5511_s26 = sadd.s32 2, %s4546_s17  ;;  %vm790_vm6 = vcmask 1046528   ;;  %vm850_vm7 = vcmask 261120   ;;  %v4329_v26 = vmov 32.0   ;;  %vm928_vm11 = vcmask 64512  }
  0x49   : > { %s734_s4 = sld [smem:[#allocation3 + %s5511_s26]]  ;;  %s5512_s29 = sadd.s32 3, %s4546_s17  ;;  %3988 = vrcp.f32 %v4329_v26  ;;  %vm1192_vm12 = vcmask 130048   ;;  %vm1194_vm13 = vcmask 195584  }
  0x4a   : > { %s738_s30 = sld [smem:[#allocation3 + %s5512_s29]]  ;;  %s5514_s23 = sadd.s32 4, %s4546_s17 }
  0x4b   : > { %s742_s3 = sld [smem:[#allocation3 + %s5514_s23]]  ;;  %s5515_s27 = sadd.s32 5, %s4546_s17 }
  0x4c   : > { %s746_s5 = sld [smem:[#allocation3 + %s5515_s27]]  ;;  %s749_s0 = sadd.s32 6, %s4546_s17 }
  0x4d   : > { %s727_s1 = scalar_lea.vmem %s5570_s18, %s726_s16  ;;  %s750_s6 = sld [smem:[#allocation3 + %s749_s0]] }
  0x4e   : > { %s731_s26 = scalar_lea.vmem %s5570_s18, %s730_s7  ;;  %s753_s21 = sadd.s32 7, %s4546_s17  ;;  %v728_v0 = vld [vmem:[%s727_s1] sm:$0x1] }
  0x4f   : > { %v732_v1 = vld [vmem:[%s731_s26] sm:$0x1]  ;;  %s735_s23 = scalar_lea.vmem %s5570_s18, %s734_s4  ;;  %s754_s27 = sld [smem:[#allocation3 + %s753_s21]]  ;;  %v3989_v27 = vpop.eup %3988 }
  0x50   : > { %v736_v2 = vld [vmem:[%s735_s23] sm:$0x1]  ;;  %s739_s16 = scalar_lea.vmem %s5570_s18, %s738_s30  ;;  %v758_v3 = vrot.slane %v732_v1, 7  ;;  %s5571_s25 = sld [smem:[#allocation28_spill]]  ;;  %v855_v28 = vmul.f32 32.0, %v3989_v27  ;;  %vm859_vm8 = vweird.f32 %v3989_v27 }
  0x51   : > { %v740_v4 = vld [vmem:[%s739_s16] sm:$0x1]  ;;  %s743_s1 = scalar_lea.vmem %s5570_s18, %s742_s3  ;;  %v761_v5 = vrot.slane %v736_v2, 6  ;;  %s5572_s8 = sld [smem:[#allocation32_spill]] }
  0x52   : > { %v744_v6 = vld [vmem:[%s743_s1] sm:$0x1]  ;;  %s747_s26 = scalar_lea.vmem %s5570_s18, %s746_s5  ;;  %v764_v7 = vrot.slane %v740_v4, 5  ;;  %v779_v8 = vsel %vm778_vm0, %v728_v0, %v758_v3  ;;  %v856_v29 = vsub.f32 1.0, %v855_v28  ;;  %s5573_s12 = sld [smem:[#allocation33_spill]] }
  0x53   : > { %v748_v9 = vld [vmem:[%s747_s26] sm:$0x1]  ;;  %s751_s29 = scalar_lea.vmem %s5570_s18, %s750_s6  ;;  %v767_v10 = vrot.slane %v744_v6, 4  ;;  %v781_v11 = vsel %vm780_vm1, %v779_v8, %v761_v5  ;;  %s5519_s4 = smov 104  }
  0x54   : > { %v752_v12 = vld [vmem:[%s751_s29] sm:$0x1]  ;;  %v770_v13 = vrot.slane %v748_v9, 3  ;;  %v783_v14 = vsel %vm782_vm2, %v781_v11, %v764_v7  ;;  %v857_v30 = vmul.f32 %v3989_v27, %v856_v29  ;;  %s5523_s29 = smov 120   ;;  %s5517_s30 = smov 96  }
  0x55   : > { %s755_s3 = scalar_lea.vmem %s5570_s18, %s754_s27  ;;  %v773_v15 = vrot.slane %v752_v12, 2  ;;  %v785_v16 = vsel %vm784_vm3, %v783_v14, %v767_v10  ;;  %s5521_s23 = smov 112  }
  0x56   : > { %v756_v17 = vld [vmem:[%s755_s3] sm:$0x1]  ;;  %v787_v18 = vsel %vm786_vm4, %v785_v16, %v770_v13  ;;  %v858_v31 = vadd.f32 %v3989_v27, %v857_v30  ;;  %p712_p13 = scmp.lt.s32.totalorder %s4480_s13, 1  ;;  %s5574_s27 = sld [smem:[#allocation29_spill]] }
  0x57   : > { %v776_v19 = vrot.slane %v756_v17, 1  ;;  %v789_v20 = vsel %vm788_vm5, %v787_v18, %v773_v15  ;;  %v4603_v21 = vld [vmem:[%s5571_s25] sm:$0xff]  ;;  %v890_v38 = vld [vmem:[%s5572_s8 + $0x18] sm:$0xff]  ;;  %v889_v39 = vld [vmem:[%s5572_s8 + $0x10] sm:$0xff]  ;;  %s5529_s16 = smov 64   ;;  %s5527_s22 = smov 8  }
  0x58   : > { %v4611_v32 = vsel %vm859_vm8, %v3989_v27, %v858_v31  ;;  %911 = vmatpush.msra.mxu0 %v890_v38  ;;  %v888_v40 = vld [vmem:[%s5572_s8 + $0x8] sm:$0xff]  ;;  %v887_v41 = vld [vmem:[%s5572_s8] sm:$0xff]  ;;  %s713_s3 = scalar_select %p712_p13, %s4480_s13, 1  ;;  %vm1288_vm8 = vcmask 523264  }
  0x59   : > { %v791_v22 = vsel %vm790_vm6, %v789_v20, %v776_v19  ;;  %v4631_v54 = vld [vmem:[%s5573_s12] sm:$0xff]  ;;  %s5531_s28 = smov 16   ;;  %s5525_s1 = smov 24  }
  0x5a   : > { %v792_v23 = vmul.f32 5.656854, %v791_v22  ;;  %912 = vmatpush.msra.mxu0 %v889_v39  ;;  %v882_v56 = vperm.slane %v4631_v54, 4  ;;  %v885_v58 = vperm.slane %v4631_v54, 5  ;;  %v895_v62 = vperm.slane %v4631_v54, 0  ;;  %s4669_s6 = sshll.u32 %s713_s3, 3 }
  0x5b   : > { %s794_s25 = sld [smem:[#allocation4 + %s4546_s17]]  ;;  %s5576_s24 = sadd.s32 2, %s4546_s17 }
  0x5c   : > { %v4607_v24 = vadd.f32 %v792_v23, %v4603_v21  ;;  %913 = vmatpush.msra.mxu0 %v888_v40  ;;  %s715_s2 = scalar_lea.vmem %s5574_s27, %s4669_s6  ;;  %s5575_s27 = sadd.s32 1, %s4546_s17 }
  0x5d   : > { %v4675_v8 = vld [vmem:[%s715_s2] sm:$0xff]  ;;  %s797_s2 = sld [smem:[#allocation4 + %s5575_s27]]  ;;  %s5577_s26 = sadd.s32 3, %s4546_s17 }
  0x5e   : > { %v851_v25 = vsel %vm850_vm7, %v4607_v24, 0.0  ;;  %914 = vmatpush.msra.mxu0 %v887_v41  ;;  %s800_s7 = sld [smem:[#allocation4 + %s5576_s24]]  ;;  %s5578_s3 = sadd.s32 4, %s4546_s17 }
  0x5f   : > { %852 = vadd.xlane.f32.xlu0 %v851_v25  ;;  %s803_s19 = sld [smem:[#allocation4 + %s5577_s26]]  ;;  %s5581_s15 = smov 16  }
  0x60   : > { %s806_s5 = sld [smem:[#allocation4 + %s5578_s3]] }
  0x61   : > { %s5591_s26 = sld [smem:[#allocation34_spill]] }
  0xd2   : > { %v853_v33 = vpop.xlane.xlu0 %852 }
  0xd3   : > { %v861_v34 = vmul.f32 %v4611_v32, %v853_v33 }
  0xd5   : > { %v862_v35 = vsub.f32 %v4607_v24, %v861_v34 }
  0xd7   : > { %v863_v36 = vmul.f32 %v862_v35, %v862_v35  ;;  %v883_v57 = vmul.f32 %v882_v56, %v862_v35 }
  0xd9   : > { %v864_v37 = vsel %vm850_vm7, %v863_v36, 0.0 }
  0xda   : > { %865 = vadd.xlane.f32.xlu0 %v864_v37 }
 0x14d   : > { %v866_v42 = vpop.xlane.xlu0 %865 }
 0x14e   : > { %v867_v43 = vmul.f32 0.032258064, %v866_v42 }
 0x150   : > { %3990 = vrsqrt.f32 %v867_v43  ;;  %vm875_vm9 = vcmp.eq.f32.partialorder %v867_v43, inf  ;;  %v878_v51 = vand.u32 2147483648, %v867_v43  ;;  %vm877_vm10 = vcmp.eq.f32.partialorder %v867_v43, 0.0 }
 0x156   : > { %v3991_v44 = vpop.eup %3990 }
 0x157   : > { %v869_v45 = vmul.f32 %v3991_v44, %v867_v43 }
 0x159   : > { %v870_v46 = vmul.f32 %v3991_v44, %v869_v45 }
 0x15b   : > { %v871_v47 = vmul.f32 0.5, %v870_v46 }
 0x15d   : > { %v872_v48 = vsub.f32 1.5, %v871_v47 }
 0x15f   : > { %v873_v49 = vmul.f32 %v3991_v44, %v872_v48 }
 0x161   : > { %v874_v50 = vmul.f32 %v873_v49, %v867_v43 }
 0x163   : > { %v876_v52 = vsel %vm875_vm9, %v867_v43, %v874_v50 }
 0x164   : > { %v879_v53 = vsel %vm877_vm10, %v878_v51, %v876_v52 }
 0x165   : > { %v880_v55 = vadd.f32 1e-06, %v879_v53 }
 0x167   : > { %3992 = vrcp.f32 %v880_v55 }
 0x16d   : > { %v3993_v59 = vpop.eup %3992 }
 0x16e   : > { %v884_v60 = vmul.f32 %v3993_v59, %v883_v57 }
 0x170   : > { %v886_v61 = vadd.f32 %v885_v58, %v884_v60 }
 0x172   : > { %3718 = vmatmul.msk.f32.vlgmr.msra.gmra.mxu0 %vm850_vm7, %v886_v61 }
 0x1ef   : > { %v916_v63 = vpop.f32.mrf.mxu0 }
 0x1f0   : > { %v4637_v0 = vadd.f32 %v916_v63, %v895_v62 }
 0x1f2   : > { %924 = vrot.lane.b32.xlu2 %v4637_v0, %s5519_s4  ;;  %920 = vrot.lane.b32.xlu1 %v4637_v0, %s5523_s29 }
 0x1fa   : > { %926 = vrot.lane.b32.xlu2 %v4637_v0, %s5517_s30  ;;  %922 = vrot.lane.b32.xlu1 %v4637_v0, %s5521_s23 }
 0x24c   : > { %v4647_v1 = vpop.permute.xlu2 %924 }
 0x24d   : > { %1005 = vrot.lane.b32.xlu2 %v4647_v1, %s5517_s30 }
 0x254   : > { %v927_v2 = vpop.permute.xlu2 %926 }
 0x255   : > { %3719 = vmatpush.xpose.msk.msra.mxu2 %vm928_vm11, %v927_v2  ;;  %v894_v2 = vld [vmem:[%s5484_s9 + $0x18] sm:$0xff] }
 0x258   : > { %3720 = vmatmul.msk.f32.vlgmr.msra.gmra.mxu2 %vm928_vm11, %v4637_v0 }
 0x264   : > { %v921_v3 = vpop.permute.xlu1 %920 }
 0x265   : > { %953 = vrot.lane.b32.xlu0 %v921_v3, %s5517_s30 }
 0x26c   : > { %v4655_v4 = vpop.permute.xlu1 %922 }
 0x26d   : > { %979 = vrot.lane.b32.xlu1 %v4655_v4, %s5517_s30  ;;  %v3938_v45 = vpack.i.bf16 %v4647_v1, %v4655_v4 }
 0x2a7   : > { %v1006_v5 = vpop.permute.xlu2 %1005 }
 0x2a8   : > { %3725 = vmatpush.xpose.msk.msra.mxu1 %vm928_vm11, %v1006_v5  ;;  %v891_v5 = vld [vmem:[%s5484_s9] sm:$0xff] }
 0x2ab   : > { %3726 = vmatmul.msk.f32.vlgmr.msra.gmra.mxu1 %vm928_vm11, %v4647_v1 }
 0x2d7   : > { %v954_v6 = vpop.permute.xlu0 %953 }
 0x2d8   : > { %3721 = vmatpush.xpose.msk.msrb.mxu2 %vm928_vm11, %v954_v6 }
 0x2db   : > { %3722 = vmatmul.msk.f32.vlgmr.msrb.gmra.mxu2 %vm928_vm11, %v921_v3  ;;  %v950_v12 = vpop.f32.mrf.mxu2 }
 0x2dc   : > { %v951_v19 = vadd.f32 %v950_v12, %v4675_v8 }
 0x2de   : > { %v1031_v20 = vsel %vm928_vm11, %v951_v19, -inf }
 0x2df   : > { %v980_v7 = vpop.permute.xlu1 %979 }
 0x2e0   : > { %3723 = vmatpush.xpose.msk.msra.mxu3 %vm928_vm11, %v980_v7 }
 0x2e3   : > { %3724 = vmatmul.msk.f32.vlgmr.msra.gmra.mxu3 %vm928_vm11, %v4655_v4  ;;  %v892_v4 = vld [vmem:[%s5484_s9 + $0x8] sm:$0xff] }
 0x328   : > { %v1028_v9 = vpop.f32.mrf.mxu1 }
 0x329   : > { %v1029_v10 = vadd.f32 %v1028_v9, %v4675_v8 }
 0x32b   : > { %v1040_v11 = vsel %vm928_vm11, %v1029_v10, -inf }
 0x32c   : > { %1041 = vmax.xlane.f32.xlu0 %v1040_v11 }
 0x340   : > { %1101 = vrot.lane.b32.xlu0 %v921_v3, %s5529_s16  ;;  %v893_v3 = vld [vmem:[%s5484_s9 + $0x10] sm:$0xff] }
 0x35e   : > { %v976_v13 = vpop.f32.mrf.mxu2 }
 0x35f   : > { %v977_v14 = vadd.f32 %v976_v13, %v4675_v8 }
 0x361   : > { %v1034_v15 = vsel %vm928_vm11, %v977_v14, -inf }
 0x362   : > { %1035 = vmax.xlane.f32.xlu1 %v1034_v15 }
 0x366   : > { %v1002_v16 = vpop.f32.mrf.mxu3 }
 0x367   : > { %v1003_v17 = vadd.f32 %v1002_v16, %v4675_v8 }
 0x369   : > { %v1037_v18 = vsel %vm928_vm11, %v1003_v17, -inf }
 0x36a   : > { %1038 = vmax.xlane.f32.xlu2 %v1037_v18 }
 0x372   : > { %1032 = vmax.xlane.f32.xlu2 %v1031_v20 }
 0x39f   : > { %v1042_v22 = vpop.xlane.xlu0 %1041 }
 0x3a0   : > { %v1046_v23 = vsub.f32 %v1029_v10, %v1042_v22 }
 0x3a2   : > { %v1053_v25 = vmul.f32 1.442695, %v1046_v23 }
 0x3a4   : > { %3994 = vpow2.f32 %v1053_v25 }
 0x3aa   : > { %v3995_v26 = vpop.eup %3994 }
 0x3ab   : > { %v1064_v27 = vsel %vm928_vm11, %v3995_v26, 0.0 }
 0x3ac   : > { %1065 = vadd.xlane.f32.xlu1 %v1064_v27  ;;  %v1252_v27 = vld [vmem:[%s5485_s10 + $0x8] sm:$0xff] }
 0x3b2   : > { %v1102_v28 = vpop.permute.xlu0 %1101 }
 0x3b3   : > { %1122 = vmatpush.msrb.mxu3 %v1102_v28  ;;  %v1251_v28 = vld [vmem:[%s5485_s10] sm:$0xff] }
 0x3d5   : > { %v1036_v29 = vpop.xlane.xlu1 %1035 }
 0x3d6   : > { %v1044_v30 = vsub.f32 %v977_v14, %v1036_v29  ;;  %v1220_v14 = vperm.slane %v4631_v54, 1 }
 0x3d8   : > { %v1049_v31 = vmul.f32 1.442695, %v1044_v30 }
 0x3da   : > { %3996 = vpow2.f32 %v1049_v31  ;;  %v1287_v31 = vld [vmem:[%s5486_s11 + $0x38] sm:$0xff] }
 0x3dd   : > { %v1039_v33 = vpop.xlane.xlu2 %1038 }
 0x3de   : > { %v1045_v34 = vsub.f32 %v1003_v17, %v1039_v33  ;;  %v1286_v33 = vld [vmem:[%s5486_s11 + $0x30] sm:$0xff] }
 0x3e0   : > { %v3997_v35 = vpop.eup %3996  ;;  %v1051_v36 = vmul.f32 1.442695, %v1045_v34  ;;  %v1285_v34 = vld [vmem:[%s5486_s11 + $0x28] sm:$0xff] }
 0x3e1   : > { %v1058_v37 = vsel %vm928_vm11, %v3997_v35, 0.0 }
 0x3e2   : > { %3998 = vpow2.f32 %v1051_v36  ;;  %1059 = vadd.xlane.f32.xlu1 %v1058_v37  ;;  %v1284_v36 = vld [vmem:[%s5486_s11 + $0x20] sm:$0xff] }
 0x3e5   : > { %v1033_v38 = vpop.xlane.xlu2 %1032 }
 0x3e6   : > { %v1043_v39 = vsub.f32 %v951_v19, %v1033_v38  ;;  %v1283_v38 = vld [vmem:[%s5486_s11 + $0x18] sm:$0xff] }
 0x3e8   : > { %v3999_v40 = vpop.eup %3998  ;;  %v1047_v41 = vmul.f32 1.442695, %v1043_v39 }
 0x3e9   : > { %v1061_v42 = vsel %vm928_vm11, %v3999_v40, 0.0 }
 0x3ea   : > { %4000 = vpow2.f32 %v1047_v41  ;;  %1062 = vadd.xlane.f32.xlu2 %v1061_v42 }
 0x3f0   : > { %v4001_v43 = vpop.eup %4000 }
 0x3f1   : > { %v1055_v44 = vsel %vm928_vm11, %v4001_v43, 0.0 }
 0x3f2   : > { %1056 = vadd.xlane.f32.xlu1 %v1055_v44 }
 0x402   : > { %3939 = vrot.lane.b32.xlu2 %v3938_v45, %s5529_s16 }
 0x40b   : > { %1075 = vrot.lane.b32.xlu1 %v4637_v0, %s5529_s16 }
 0x41f   : > { %v1066_v46 = vpop.xlane.xlu1 %1065 }
 0x455   : > { %v1060_v47 = vpop.xlane.xlu1 %1059 }
 0x456   : > { %4002 = vrcp.f32 %v1060_v47 }
 0x457   : > { %4004 = vrcp.f32 %v1066_v46 }
 0x45c   : > { %v4003_v48 = vpop.eup %4002 }
 0x45d   : > { %v1063_v49 = vpop.xlane.xlu2 %1062  ;;  %v1072_v50 = vmul.f32 %v4003_v48, %v3997_v35  ;;  %v4005_v51 = vpop.eup %4004  ;;  %v1246_v48 = vperm.slane %v4631_v54, 6 }
 0x45e   : > { %4006 = vrcp.f32 %v1063_v49  ;;  %v1074_v58 = vmul.f32 %v4005_v51, %v3995_v26  ;;  %v1254_v26 = vld [vmem:[%s5485_s10 + $0x18] sm:$0xff] }
 0x45f   : > { %3728 = vmatmul.msk.f32.vlgmr.msrb.gmra.mxu3 %vm928_vm11, %v1072_v50  ;;  %v1249_v50 = vperm.slane %v4631_v54, 7 }
 0x460   : > { %1271 = vmatpush.msra.mxu3 %v1254_v26  ;;  %v4792_v26 = vld [vmem:[%s5573_s12 + $0x8] sm:$0xff]  ;;  %s5584_s12 = smov 120  }
 0x464   : > { %v4007_v52 = vpop.eup %4006 }
 0x465   : > { %v3940_v53 = vpop.permute.xlu2 %3939  ;;  %v1073_v57 = vmul.f32 %v4007_v52, %v3999_v40  ;;  %v1057_v59 = vpop.xlane.xlu1 %1056 }
 0x466   : > { %v3941_v55 = vunpack.i.l.bf16 %v3940_v53  ;;  %v3942_v56 = vunpack.i.h.bf16 %v3940_v53  ;;  %4008 = vrcp.f32 %v1057_v59 }
 0x468   : > { %1148 = vmatpush.msrb.mxu0 %v3941_v55  ;;  %1174 = vmatpush.msrb.mxu1 %v3942_v56  ;;  %v1282_v55 = vld [vmem:[%s5486_s11 + $0x10] sm:$0xff]  ;;  %v1281_v56 = vld [vmem:[%s5486_s11 + $0x8] sm:$0xff] }
 0x469   : > { %3729 = vmatmul.msk.f32.vlgmr.msrb.gmra.mxu0 %vm928_vm11, %v1073_v57  ;;  %3730 = vmatmul.msk.f32.vlgmr.msrb.gmra.mxu1 %vm928_vm11, %v1074_v58  ;;  %v1280_v57 = vld [vmem:[%s5486_s11] sm:$0xff]  ;;  %v1255_v58 = vperm.slane %v4631_v54, 2 }
 0x46a   : > { %1300 = vmatpush.msra.mxu0 %v1287_v31 }
 0x46c   : > { %v4009_v60 = vpop.eup %4008  ;;  %1301 = vmatpush.msra.mxu0 %v1286_v33 }
 0x46d   : > { %v1071_v61 = vmul.f32 %v4009_v60, %v4001_v43 }
 0x46e   : > { %1302 = vmatpush.msra.mxu0 %v1285_v34  ;;  %v1356_v34 = vperm.slane %v4792_v26, 0 }
 0x470   : > { %1303 = vmatpush.msra.mxu0 %v1284_v36 }
 0x472   : > { %1304 = vmatpush.msra.mxu0 %v1283_v38 }
 0x474   : > { %1305 = vmatpush.msra.mxu0 %v1282_v55 }
 0x476   : > { %1306 = vmatpush.msra.mxu0 %v1281_v56 }
 0x478   : > { %1307 = vmatpush.msra.mxu0 %v1280_v57 }
 0x47d   : > { %v1076_v62 = vpop.permute.xlu1 %1075 }
 0x47e   : > { %1096 = vmatpush.msra.mxu2 %v1076_v62  ;;  %v1313_v62 = vperm.slane %v4631_v54, 3  ;;  %v3738_v54 = vld [vmem:[%s5572_s8 + $0x38] sm:$0xff] }
 0x47f   : > { %3727 = vmatmul.msk.f32.vlgmr.msra.gmra.mxu2 %vm928_vm11, %v1071_v61  ;;  %1372 = vmatpush.msra.mxu1 %v3738_v54 }
 0x480   : > { %1211 = vmatpush.msrb.mxu2 %v894_v2 }
 0x482   : > { %1212 = vmatpush.msrb.mxu2 %v893_v3 }
 0x484   : > { %1213 = vmatpush.msrb.mxu2 %v892_v4 }
 0x486   : > { %1214 = vmatpush.msrb.mxu2 %v891_v5 }
 0x4e2   : > { %v1124_v63 = vpop.f32.mrf.mxu3 }
 0x4e3   : > { %1180 = vrot.lane.b32.xlu0 %v1124_v63, %s5527_s22  ;;  %s5592_s22 = sld [smem:[#allocation31_spill]] }
 0x4e6   : > { %v1150_v0 = vpop.f32.mrf.mxu0  ;;  %v1176_v1 = vpop.f32.mrf.mxu1 }
 0x4e7   : > { %1184 = vrot.lane.b32.xlu2 %v1150_v0, %s5531_s28 }
 0x4eb   : > { %1188 = vrot.lane.b32.xlu0 %v1176_v1, %s5525_s1 }
 0x502   : > { %v1098_v7 = vpop.f32.mrf.mxu2 }
 0x541   : > { %v1185_v10 = vpop.permute.xlu2 %1184 }
 0x555   : > { %v1181_v6 = vpop.permute.xlu0 %1180 }
 0x556   : > { %v1191_v9 = vsel %vm928_vm11, %v1098_v7, %v1181_v6 }
 0x557   : > { %v1193_v12 = vsel %vm1192_vm12, %v1191_v9, %v1185_v10  ;;  %v3737_v9 = vld [vmem:[%s5572_s8 + $0x30] sm:$0xff]  ;;  %v3736_v10 = vld [vmem:[%s5572_s8 + $0x28] sm:$0xff] }
 0x558   : > { %1373 = vmatpush.msra.mxu1 %v3737_v9 }
 0x55a   : > { %1374 = vmatpush.msra.mxu1 %v3736_v10 }
 0x55d   : > { %v1189_v11 = vpop.permute.xlu0 %1188 }
 0x55e   : > { %v1195_v13 = vsel %vm1194_vm13, %v1193_v12, %v1189_v11  ;;  %v3735_v11 = vld [vmem:[%s5572_s8 + $0x20] sm:$0xff] }
 0x55f   : > { %3731 = vmatmul.msk.f32.vlgmr.msrb.gmra.mxu2 %vm850_vm7, %v1195_v13  ;;  %1375 = vmatpush.msra.mxu1 %v3735_v11 }
 0x5e2   : > { %v1216_v15 = vpop.f32.mrf.mxu2 }
 0x5e3   : > { %v1219_v16 = vadd.f32 %v1216_v15, %v4607_v24  ;;  %v1253_v24 = vld [vmem:[%s5485_s10 + $0x10] sm:$0xff] }
 0x5e4   : > { %1272 = vmatpush.msra.mxu3 %v1253_v24 }
 0x5e5   : > { %v4720_v17 = vadd.f32 %v1220_v14, %v1219_v16 }
 0x5e6   : > { %1273 = vmatpush.msra.mxu3 %v1252_v27  ;;  %v1341_v27 = vperm.slane %v4792_v26, 4 }
 0x5e7   : > { %v1222_v18 = vsel %vm850_vm7, %v4720_v17, 0.0 }
 0x5e8   : > { %1223 = vadd.xlane.f32.xlu2 %v1222_v18  ;;  %1274 = vmatpush.msra.mxu3 %v1251_v28 }
 0x65b   : > { %v1224_v19 = vpop.xlane.xlu2 %1223 }
 0x65c   : > { %v1225_v20 = vmul.f32 %v1224_v19, %v4611_v32 }
 0x65e   : > { %v1226_v22 = vsub.f32 %v4720_v17, %v1225_v20 }
 0x660   : > { %v1227_v23 = vmul.f32 %v1226_v22, %v1226_v22  ;;  %v1247_v49 = vmul.f32 %v1246_v48, %v1226_v22 }
 0x662   : > { %v1228_v25 = vsel %vm850_vm7, %v1227_v23, 0.0 }
 0x663   : > { %1229 = vadd.xlane.f32.xlu0 %v1228_v25 }
 0x6d6   : > { %v1230_v29 = vpop.xlane.xlu0 %1229 }
 0x6d7   : > { %v1231_v30 = vmul.f32 0.032258064, %v1230_v29  ;;  %v1344_v29 = vperm.slane %v4792_v26, 5 }
 0x6d9   : > { %4010 = vrsqrt.f32 %v1231_v30  ;;  %vm1239_vm14 = vcmp.eq.f32.partialorder %v1231_v30, inf  ;;  %v1242_v44 = vand.u32 2147483648, %v1231_v30  ;;  %vm1241_vm15 = vcmp.eq.f32.partialorder %v1231_v30, 0.0 }
 0x6df   : > { %v4011_v35 = vpop.eup %4010 }
 0x6e0   : > { %v1233_v37 = vmul.f32 %v4011_v35, %v1231_v30 }
 0x6e2   : > { %v1234_v39 = vmul.f32 %v4011_v35, %v1233_v37 }
 0x6e4   : > { %v1235_v40 = vmul.f32 0.5, %v1234_v39 }
 0x6e6   : > { %v1236_v41 = vsub.f32 1.5, %v1235_v40 }
 0x6e8   : > { %v1237_v42 = vmul.f32 %v4011_v35, %v1236_v41 }
 0x6ea   : > { %v1238_v43 = vmul.f32 %v1237_v42, %v1231_v30 }
 0x6ec   : > { %v1240_v45 = vsel %vm1239_vm14, %v1231_v30, %v1238_v43 }
 0x6ed   : > { %v1243_v46 = vsel %vm1241_vm15, %v1242_v44, %v1240_v45 }
 0x6ee   : > { %v1244_v47 = vadd.f32 1e-06, %v1243_v46 }
 0x6f0   : > { %4012 = vrcp.f32 %v1244_v47 }
 0x6f6   : > { %v4013_v51 = vpop.eup %4012 }
 0x6f7   : > { %v1248_v52 = vmul.f32 %v4013_v51, %v1247_v49 }
 0x6f9   : > { %v1250_v53 = vadd.f32 %v1249_v50, %v1248_v52 }
 0x6fb   : > { %3732 = vmatmul.msk.f32.vlgmr.msra.gmra.mxu3 %vm850_vm7, %v1250_v53 }
 0x77e   : > { %v1276_v59 = vpop.f32.mrf.mxu3 }
 0x77f   : > { %v1277_v60 = vadd.f32 %v1276_v59, %v1255_v58 }
 0x781   : > { %v1279_v61 = vmax.f32 %v1277_v60, 0.0 }
 0x783   : > { %3733 = vmatmul.msk.f32.vlgmr.msra.gmra.mxu0 %vm1288_vm8, %v1279_v61 }
 0x800   : > { %v1309_v63 = vpop.f32.mrf.mxu0 }
 0x801   : > { %v1312_v0 = vadd.f32 %v1309_v63, %v4720_v17 }
 0x803   : > { %v4770_v1 = vadd.f32 %v1313_v62, %v1312_v0 }
 0x805   : > { %v1317_v2 = vsel %vm850_vm7, %v4770_v1, 0.0 }
 0x806   : > { %1318 = vadd.xlane.f32.xlu1 %v1317_v2 }
 0x879   : > { %v1319_v3 = vpop.xlane.xlu1 %1318 }
 0x87a   : > { %v1320_v4 = vmul.f32 %v1319_v3, %v4611_v32 }
 0x87c   : > { %v1321_v5 = vsub.f32 %v4770_v1, %v1320_v4 }
 0x87e   : > { %v1322_v6 = vmul.f32 %v1321_v5, %v1321_v5  ;;  %v1342_v28 = vmul.f32 %v1341_v27, %v1321_v5 }
 0x880   : > { %v1323_v7 = vsel %vm850_vm7, %v1322_v6, 0.0 }
 0x881   : > { %1324 = vadd.xlane.f32.xlu2 %v1323_v7 }
 0x8f4   : > { %v1325_v12 = vpop.xlane.xlu2 %1324 }
 0x8f5   : > { %v1326_v13 = vmul.f32 0.032258064, %v1325_v12 }
 0x8f7   : > { %4014 = vrsqrt.f32 %v1326_v13  ;;  %vm1334_vm9 = vcmp.eq.f32.partialorder %v1326_v13, inf  ;;  %v1337_v22 = vand.u32 2147483648, %v1326_v13  ;;  %vm1336_vm10 = vcmp.eq.f32.partialorder %v1326_v13, 0.0 }
 0x8fd   : > { %v4015_v14 = vpop.eup %4014 }
 0x8fe   : > { %v1328_v15 = vmul.f32 %v4015_v14, %v1326_v13 }
 0x900   : > { %v1329_v16 = vmul.f32 %v4015_v14, %v1328_v15 }
 0x902   : > { %v1330_v17 = vmul.f32 0.5, %v1329_v16 }
 0x904   : > { %v1331_v18 = vsub.f32 1.5, %v1330_v17 }
 0x906   : > { %v1332_v19 = vmul.f32 %v4015_v14, %v1331_v18 }
 0x908   : > { %v1333_v20 = vmul.f32 %v1332_v19, %v1326_v13 }
 0x90a   : > { %v1335_v23 = vsel %vm1334_vm9, %v1326_v13, %v1333_v20 }
 0x90b   : > { %v1338_v25 = vsel %vm1336_vm10, %v1337_v22, %v1335_v23 }
 0x90c   : > { %v1339_v24 = vadd.f32 1e-06, %v1338_v25 }
 0x90e   : > { %4016 = vrcp.f32 %v1339_v24 }
 0x914   : > { %v4017_v30 = vpop.eup %4016 }
 0x915   : > { %v1343_v31 = vmul.f32 %v4017_v30, %v1342_v28 }
 0x917   : > { %v1345_v33 = vadd.f32 %v1344_v29, %v1343_v31 }
 0x919   : > { %3743 = vmatmul.msk.f32.vlgmr.msra.gmra.mxu1 %vm850_vm7, %v1345_v33 }
 0x996   : > { %v1377_v35 = vpop.f32.mrf.mxu1 }
 0x997   : > { %v4798_v36 = vadd.f32 %v1377_v35, %v1356_v34 }
 0x999   : > { %1383 = vrot.lane.b32.xlu2 %v4798_v36, %s5521_s23  ;;  %1381 = vrot.lane.b32.xlu1 %v4798_v36, %s5523_s29  ;;  %s812_s23 = sld [smem:[#allocation4 + %s749_s0]]  ;;  %s5589_s0 = smov 64  }
 0x99a   : > { %1385 = vrot.lane.b32.xlu0 %v4798_v36, %s5519_s4  ;;  %s815_s29 = sld [smem:[#allocation4 + %s753_s21]] }
 0x9a2   : > { %1387 = vrot.lane.b32.xlu0 %v4798_v36, %s5517_s30 }
 0x9f3   : > { %v4808_v37 = vpop.permute.xlu2 %1383 }
 0x9f4   : > { %1439 = vrot.lane.b32.xlu2 %v4808_v37, %s5517_s30 }
 0xa0b   : > { %v1382_v38 = vpop.permute.xlu1 %1381 }
 0xa0c   : > { %v1386_v39 = vpop.permute.xlu0 %1385  ;;  %1413 = vrot.lane.b32.xlu0 %v1382_v38, %s5517_s30 }
 0xa0d   : > { %1465 = vrot.lane.b32.xlu1 %v1386_v39, %s5517_s30  ;;  %v3943_v13 = vpack.i.bf16 %v1382_v38, %v1386_v39  ;;  %s5579_s30 = sadd.s32 5, %s4546_s17 }
 0xa0e   : > { %s809_s4 = sld [smem:[#allocation4 + %s5579_s30]] }
 0xa14   : > { %v1388_v40 = vpop.permute.xlu0 %1387 }
 0xa15   : > { %3744 = vmatpush.xpose.msk.msra.mxu2 %vm928_vm11, %v1388_v40 }
 0xa18   : > { %3745 = vmatmul.msk.f32.vlgmr.msra.gmra.mxu2 %vm928_vm11, %v4798_v36 }
 0xa4e   : > { %v1440_v41 = vpop.permute.xlu2 %1439 }
 0xa4f   : > { %3748 = vmatpush.xpose.msk.msrb.mxu1 %vm928_vm11, %v1440_v41 }
 0xa52   : > { %3749 = vmatmul.msk.f32.vlgmr.msrb.gmra.mxu1 %vm928_vm11, %v4808_v37 }
 0xa7e   : > { %v1414_v42 = vpop.permute.xlu0 %1413 }
 0xa7f   : > { %v1466_v43 = vpop.permute.xlu1 %1465  ;;  %3746 = vmatpush.xpose.msk.msrb.mxu3 %vm928_vm11, %v1414_v42 }
 0xa80   : > { %3750 = vmatpush.xpose.msk.msrb.mxu2 %vm928_vm11, %v1466_v43 }
 0xa82   : > { %3747 = vmatmul.msk.f32.vlgmr.msrb.gmra.mxu3 %vm928_vm11, %v1382_v38 }
 0xa83   : > { %3751 = vmatmul.msk.f32.vlgmr.msrb.gmra.mxu2 %vm928_vm11, %v1386_v39 }
 0xa9b   : > { %v1410_v47 = vpop.f32.mrf.mxu2 }
 0xa9c   : > { %v1411_v55 = vadd.f32 %v1410_v47, %v4675_v8 }
 0xa9e   : > { %v1491_v56 = vsel %vm928_vm11, %v1411_v55, -inf }
 0xacf   : > { %v1462_v44 = vpop.f32.mrf.mxu1 }
 0xad0   : > { %v1463_v45 = vadd.f32 %v1462_v44, %v4675_v8 }
 0xad2   : > { %v1497_v46 = vsel %vm928_vm11, %v1463_v45, -inf }
 0xad3   : > { %1498 = vmax.xlane.f32.xlu2 %v1497_v46 }
 0xb05   : > { %v1436_v48 = vpop.f32.mrf.mxu3 }
 0xb06   : > { %v1437_v49 = vadd.f32 %v1436_v48, %v4675_v8  ;;  %v1488_v50 = vpop.f32.mrf.mxu2 }
 0xb07   : > { %v1489_v51 = vadd.f32 %v1488_v50, %v4675_v8 }
 0xb08   : > { %v1494_v52 = vsel %vm928_vm11, %v1437_v49, -inf }
 0xb09   : > { %v1500_v53 = vsel %vm928_vm11, %v1489_v51, -inf  ;;  %1495 = vmax.xlane.f32.xlu0 %v1494_v52 }
 0xb0a   : > { %1501 = vmax.xlane.f32.xlu1 %v1500_v53 }
 0xb12   : > { %1492 = vmax.xlane.f32.xlu1 %v1491_v56 }
 0xb46   : > { %v1499_v57 = vpop.xlane.xlu2 %1498 }
 0xb47   : > { %v1505_v58 = vsub.f32 %v1463_v45, %v1499_v57 }
 0xb49   : > { %v1511_v59 = vmul.f32 1.442695, %v1505_v58 }
 0xb4b   : > { %4018 = vpow2.f32 %v1511_v59 }
 0xb51   : > { %v4832_v60 = vpop.eup %4018 }
 0xb52   : > { %v1521_v61 = vsel %vm928_vm11, %v4832_v60, 0.0 }
 0xb53   : > { %1522 = vadd.xlane.f32.xlu1 %v1521_v61 }
 0xb7c   : > { %v1496_v62 = vpop.xlane.xlu0 %1495 }
 0xb7d   : > { %v1502_v63 = vpop.xlane.xlu1 %1501  ;;  %v1504_v0 = vsub.f32 %v1437_v49, %v1496_v62 }
 0xb7e   : > { %v1506_v2 = vsub.f32 %v1489_v51, %v1502_v63 }
 0xb7f   : > { %v1509_v3 = vmul.f32 1.442695, %v1504_v0 }
 0xb80   : > { %v1513_v4 = vmul.f32 1.442695, %v1506_v2 }
 0xb81   : > { %4020 = vpow2.f32 %v1509_v3 }
 0xb82   : > { %4022 = vpow2.f32 %v1513_v4  ;;  %v3742_v4 = vld [vmem:[%s5484_s9 + $0x38] sm:$0xff] }
 0xb85   : > { %v1493_v8 = vpop.xlane.xlu1 %1492 }
 0xb86   : > { %v1503_v5 = vsub.f32 %v1411_v55, %v1493_v8  ;;  %v3741_v8 = vld [vmem:[%s5484_s9 + $0x30] sm:$0xff] }
 0xb87   : > { %v4836_v6 = vpop.eup %4020 }
 0xb88   : > { %v4838_v7 = vpop.eup %4022  ;;  %v1507_v54 = vmul.f32 1.442695, %v1503_v5  ;;  %v1518_v9 = vsel %vm928_vm11, %v4836_v6, 0.0  ;;  %v3740_v5 = vld [vmem:[%s5484_s9 + $0x28] sm:$0xff] }
 0xb89   : > { %v1524_v10 = vsel %vm928_vm11, %v4838_v7, 0.0  ;;  %1519 = vadd.xlane.f32.xlu2 %v1518_v9 }
 0xb8a   : > { %4024 = vpow2.f32 %v1507_v54  ;;  %1525 = vadd.xlane.f32.xlu0 %v1524_v10 }
 0xb90   : > { %v4844_v11 = vpop.eup %4024 }
 0xb91   : > { %v1515_v12 = vsel %vm928_vm11, %v4844_v11, 0.0 }
 0xb92   : > { %1516 = vadd.xlane.f32.xlu1 %v1515_v12 }
 0xb9e   : > { %3944 = vrot.lane.b32.xlu0 %v3943_v13, %s5529_s16 }
 0xba1   : > { %1587 = vrot.lane.b32.xlu2 %v4808_v37, %s5529_s16 }
 0xbab   : > { %1535 = vrot.lane.b32.xlu1 %v4798_v36, %s5529_s16  ;;  %s5580_s16 = sld [smem:[#allocation27_spill]] }
 0xbb1   : > { %s795_s28 = scalar_lea.vmem %s5580_s16, %s794_s25  ;;  %s798_s24 = scalar_lea.vmem %s5580_s16, %s797_s2 }
 0xbb2   : > { %s801_s3 = scalar_lea.vmem %s5580_s16, %s800_s7  ;;  %s804_s17 = scalar_lea.vmem %s5580_s16, %s803_s19  ;;  %v796_v16 = vld [vmem:[%s795_s28] sm:$0x1] }
 0xbb3   : > { %s807_s13 = scalar_lea.vmem %s5580_s16, %s806_s5  ;;  %s810_s1 = scalar_lea.vmem %s5580_s16, %s809_s4  ;;  %v799_v17 = vld [vmem:[%s798_s24] sm:$0x1] }
 0xbb4   : > { %s813_s2 = scalar_lea.vmem %s5580_s16, %s812_s23  ;;  %v802_v18 = vld [vmem:[%s801_s3] sm:$0x1]  ;;  %s816_s18 = scalar_lea.vmem %s5580_s16, %s815_s29  ;;  %v819_v24 = vrot.slane %v799_v17, 7 }
 0xbb5   : > { %v805_v19 = vld [vmem:[%s804_s17] sm:$0x1]  ;;  %v822_v27 = vrot.slane %v802_v18, 6  ;;  %s5583_s4 = smov 24   ;;  %s5585_s7 = smov 112  }
 0xbb6   : > { %v808_v20 = vld [vmem:[%s807_s13] sm:$0x1]  ;;  %v825_v29 = vrot.slane %v805_v19, 5  ;;  %v839_v33 = vsel %vm778_vm0, %v796_v16, %v819_v24  ;;  %s5582_s13 = smov 8   ;;  %v1838_v16 = vld [vmem:[%s5489_s14 + $0x8] sm:$0xff]  ;;  %s5587_s29 = smov 96  }
 0xbb7   : > { %v811_v22 = vld [vmem:[%s810_s1] sm:$0x1]  ;;  %v828_v30 = vrot.slane %v808_v20, 4  ;;  %v840_v37 = vsel %vm780_vm1, %v839_v33, %v822_v27  ;;  %s5588_s17 = sld [smem:[#allocation30_spill]]  ;;  %s723_s1 = scalar_lea.vmem %s5592_s22, %s4669_s6 }
 0xbb8   : > { %v814_v25 = vld [vmem:[%s813_s2] sm:$0x1]  ;;  %v831_v31 = vrot.slane %v811_v22, 3  ;;  %v841_v39 = vsel %vm782_vm2, %v840_v37, %v825_v29  ;;  %s5590_s25 = sld [smem:[#allocation35_spill]] }
 0xbb9   : > { %v817_v28 = vld [vmem:[%s816_s18] sm:$0x1]  ;;  %v834_v36 = vrot.slane %v814_v25, 2  ;;  %v842_v41 = vsel %vm784_vm3, %v841_v39, %v828_v30  ;;  %s5586_s18 = smov 104   ;;  %s5593_s2 = sld [smem:[#allocation39_spill]] }
 0xbba   : > { %v837_v38 = vrot.slane %v817_v28, 1  ;;  %v843_v42 = vsel %vm786_vm4, %v842_v41, %v831_v31  ;;  %v1837_v17 = vld [vmem:[%s5489_s14] sm:$0xff]  ;;  %v1678_v41 = vperm.slane %v4792_v26, 1  ;;  %s5594_s22 = sld [smem:[#allocation17_spill]] }
 0xbbb   : > { %v844_v43 = vsel %vm788_vm5, %v843_v42, %v834_v36  ;;  %v4949_v33 = vld [vmem:[%s5495_s20] sm:$0xff]  ;;  %s5596_s28 = sld [smem:[#allocation40_spill]] }
 0xbbc   : > { %v845_v44 = vsel %vm790_vm6, %v844_v43, %v837_v38  ;;  %v1835_v37 = vperm.slane %v4949_v33, 7 }
 0xbbd   : > { %v846_v45 = vmul.f32 5.656854, %v845_v44  ;;  %s719_s21 = scalar_lea.vmem %s5588_s17, %s4669_s6 }
 0xbbf   : > { %v4902_v46 = vadd.f32 %v846_v45, %v4603_v21 }
 0xbc0   : > { %s709_s6 = sand.u32 1, %s5594_s22  }
 0xbc1   : > { %v1808_v48 = vsel %vm850_vm7, %v4902_v46, 0.0  ;;  %s3713_s19 = sshll.u32 %s709_s6, 3  ;;  %s3558_s24 = scalar_lea.sflag [#allocation7], %s709_s6 }
 0xbc6   : > { %v1523_v14 = vpop.xlane.xlu1 %1522 }
 0xbc7   : > { %4026 = vrcp.f32 %v1523_v14  ;;  %v1840_v14 = vld [vmem:[%s5489_s14 + $0x18] sm:$0xff] }
 0xbc8   : > { %1809 = vadd.xlane.f32.xlu0 %v1808_v48 }
 0xbcd   : > { %v4027_v23 = vpop.eup %4026 }
 0xbce   : > { %v1533_v34 = vmul.f32 %v4027_v23, %v4832_v60 }
 0xbfc   : > { %v1520_v15 = vpop.xlane.xlu2 %1519 }
 0xbfd   : > { %v1526_v40 = vpop.xlane.xlu0 %1525  ;;  %4028 = vrcp.f32 %v1520_v15  ;;  %v1839_v15 = vld [vmem:[%s5489_s14 + $0x10] sm:$0xff] }
 0xbfe   : > { %4030 = vrcp.f32 %v1526_v40 }
 0xc03   : > { %v4029_v47 = vpop.eup %4028 }
 0xc04   : > { %v1588_v35 = vpop.permute.xlu2 %1587  ;;  %v4031_v49 = vpop.eup %4030  ;;  %v1532_v55 = vmul.f32 %v4029_v47, %v4836_v6  ;;  %v3739_v6 = vld [vmem:[%s5484_s9 + $0x20] sm:$0xff]  ;;  %v1845_v47 = vperm.slane %v4949_v33, 0 }
 0xc05   : > { %1608 = vmatpush.msra.mxu1 %v1588_v35  ;;  %v1517_v51 = vpop.xlane.xlu1 %1516  ;;  %v1534_v56 = vmul.f32 %v4031_v49, %v4838_v7  ;;  %v1832_v35 = vperm.slane %v4949_v33, 6 }
 0xc06   : > { %3754 = vmatmul.msk.f32.vlgmr.msra.gmra.mxu1 %vm928_vm11, %v1533_v34  ;;  %4032 = vrcp.f32 %v1517_v51 }
 0xc0c   : > { %v4033_v21 = vpop.eup %4032 }
 0xc0d   : > { %v1531_v57 = vmul.f32 %v4033_v21, %v4844_v11 }
 0xc10   : > { %v3945_v50 = vpop.permute.xlu0 %3944 }
 0xc11   : > { %v3947_v52 = vunpack.i.h.bf16 %v3945_v50  ;;  %v3946_v53 = vunpack.i.l.bf16 %v3945_v50 }
 0xc13   : > { %1582 = vmatpush.msrb.mxu0 %v3947_v52  ;;  %1634 = vmatpush.msra.mxu2 %v3946_v53 }
 0xc14   : > { %3753 = vmatmul.msk.f32.vlgmr.msrb.gmra.mxu0 %vm928_vm11, %v1532_v55  ;;  %3755 = vmatmul.msk.f32.vlgmr.msra.gmra.mxu2 %vm928_vm11, %v1534_v56 }
 0xc15   : > { %1861 = vmatpush.msrb.mxu2 %v1840_v14 }
 0xc17   : > { %1862 = vmatpush.msrb.mxu2 %v1839_v15 }
 0xc19   : > { %1863 = vmatpush.msrb.mxu2 %v1838_v16 }
 0xc1b   : > { %1864 = vmatpush.msrb.mxu2 %v1837_v17 }
 0xc1d   : > { %v1536_v58 = vpop.permute.xlu1 %1535 }
 0xc1e   : > { %1556 = vmatpush.msra.mxu3 %v1536_v58  ;;  %v3760_v58 = vld [vmem:[%s5485_s10 + $0x38] sm:$0xff] }
 0xc1f   : > { %3752 = vmatmul.msk.f32.vlgmr.msra.gmra.mxu3 %vm928_vm11, %v1531_v57  ;;  %1730 = vmatpush.msra.mxu0 %v3760_v58 }
 0xc20   : > { %1669 = vmatpush.msrb.mxu3 %v3742_v4 }
 0xc22   : > { %1670 = vmatpush.msrb.mxu3 %v3741_v8 }
 0xc24   : > { %1671 = vmatpush.msrb.mxu3 %v3740_v5 }
 0xc26   : > { %1672 = vmatpush.msrb.mxu3 %v3739_v6 }
 0xc3b   : > { %v1810_v62 = vpop.xlane.xlu0 %1809 }
 0xc3c   : > { %v1811_v63 = vmul.f32 %v1810_v62, %v4611_v32 }
 0xc3e   : > { %v1812_v0 = vsub.f32 %v4902_v46, %v1811_v63  ;;  %v3757_v63 = vld [vmem:[%s5485_s10 + $0x20] sm:$0xff] }
 0xc40   : > { %v1813_v2 = vmul.f32 %v1812_v0, %v1812_v0  ;;  %v1833_v36 = vmul.f32 %v1832_v35, %v1812_v0 }
 0xc42   : > { %v1814_v3 = vsel %vm850_vm7, %v1813_v2, 0.0 }
 0xc83   : > { %v1610_v59 = vpop.f32.mrf.mxu1 }
 0xc84   : > { %1644 = vrot.lane.b32.xlu2 %v1610_v59, %s5581_s15  ;;  %v3759_v59 = vld [vmem:[%s5485_s10 + $0x30] sm:$0xff] }
 0xc85   : > { %1731 = vmatpush.msra.mxu0 %v3759_v59 }
 0xc91   : > { %v1584_v60 = vpop.f32.mrf.mxu0 }
 0xc92   : > { %1640 = vrot.lane.b32.xlu2 %v1584_v60, %s5582_s13  ;;  %v3758_v60 = vld [vmem:[%s5485_s10 + $0x28] sm:$0xff] }
 0xc93   : > { %1732 = vmatpush.msra.mxu0 %v3758_v60 }
 0xc95   : > { %1733 = vmatpush.msra.mxu0 %v3757_v63 }
 0xc97   : > { %v1636_v61 = vpop.f32.mrf.mxu2 }
 0xc98   : > { %1648 = vrot.lane.b32.xlu1 %v1636_v61, %s5583_s4 }
 0xca2   : > { %v1558_v9 = vpop.f32.mrf.mxu3 }
 0xcbb   : > { %1815 = vadd.xlane.f32.xlu2 %v1814_v3 }
 0xcde   : > { %v1645_v7 = vpop.permute.xlu2 %1644 }
 0xcec   : > { %v1641_v54 = vpop.permute.xlu2 %1640 }
 0xced   : > { %v1651_v10 = vsel %vm928_vm11, %v1558_v9, %v1641_v54 }
 0xcee   : > { %v1652_v11 = vsel %vm1192_vm12, %v1651_v10, %v1645_v7 }
 0xd0a   : > { %v1649_v12 = vpop.permute.xlu1 %1648 }
 0xd0b   : > { %v1653_v13 = vsel %vm1194_vm13, %v1652_v11, %v1649_v12  ;;  %v1704_v11 = vperm.slane %v4792_v26, 6 }
 0xd0c   : > { %3756 = vmatmul.msk.f32.vlgmr.msrb.gmra.mxu3 %vm850_vm7, %v1653_v13  ;;  %v1707_v13 = vperm.slane %v4792_v26, 7 }
 0xd2e   : > { %v1816_v18 = vpop.xlane.xlu2 %1815 }
 0xd2f   : > { %v1817_v19 = vmul.f32 0.032258064, %v1816_v18  ;;  %v3769_v18 = vld [vmem:[%s5486_s11 + $0x78] sm:$0xff] }
 0xd30   : > { %1759 = vmatpush.msrb.mxu1 %v3769_v18 }
 0xd31   : > { %4034 = vrsqrt.f32 %v1817_v19  ;;  %vm1825_vm0 = vcmp.eq.f32.partialorder %v1817_v19, inf  ;;  %v1828_v29 = vand.u32 2147483648, %v1817_v19  ;;  %vm1827_vm1 = vcmp.eq.f32.partialorder %v1817_v19, 0.0 }
 0xd37   : > { %v4035_v20 = vpop.eup %4034 }
 0xd38   : > { %v1819_v22 = vmul.f32 %v4035_v20, %v1817_v19 }
 0xd3a   : > { %v1820_v23 = vmul.f32 %v4035_v20, %v1819_v22 }
 0xd3c   : > { %v1821_v25 = vmul.f32 0.5, %v1820_v23  ;;  %v3766_v23 = vld [vmem:[%s5486_s11 + $0x60] sm:$0xff] }
 0xd3e   : > { %v1822_v24 = vsub.f32 1.5, %v1821_v25  ;;  %v3765_v25 = vld [vmem:[%s5486_s11 + $0x58] sm:$0xff] }
 0xd40   : > { %v1823_v27 = vmul.f32 %v4035_v20, %v1822_v24  ;;  %v3767_v20 = vld [vmem:[%s5486_s11 + $0x68] sm:$0xff] }
 0xd42   : > { %v1824_v28 = vmul.f32 %v1823_v27, %v1817_v19  ;;  %v3764_v27 = vld [vmem:[%s5486_s11 + $0x50] sm:$0xff] }
 0xd44   : > { %v1826_v30 = vsel %vm1825_vm0, %v1817_v19, %v1824_v28  ;;  %v3768_v19 = vld [vmem:[%s5486_s11 + $0x70] sm:$0xff]  ;;  %v3763_v28 = vld [vmem:[%s5486_s11 + $0x48] sm:$0xff] }
 0xd45   : > { %v1829_v31 = vsel %vm1827_vm1, %v1828_v29, %v1826_v30  ;;  %1760 = vmatpush.msrb.mxu1 %v3768_v19  ;;  %v3762_v29 = vld [vmem:[%s5486_s11 + $0x40] sm:$0xff]  ;;  %v1714_v30 = vperm.slane %v4792_v26, 2 }
 0xd46   : > { %v1830_v34 = vadd.f32 1e-06, %v1829_v31 }
 0xd47   : > { %1761 = vmatpush.msrb.mxu1 %v3767_v20 }
 0xd48   : > { %4036 = vrcp.f32 %v1830_v34 }
 0xd49   : > { %1762 = vmatpush.msrb.mxu1 %v3766_v23 }
 0xd4b   : > { %1763 = vmatpush.msrb.mxu1 %v3765_v25 }
 0xd4d   : > { %1764 = vmatpush.msrb.mxu1 %v3764_v27 }
 0xd4e   : > { %v4037_v38 = vpop.eup %4036 }
 0xd4f   : > { %v1834_v39 = vmul.f32 %v4037_v38, %v1833_v36  ;;  %1765 = vmatpush.msrb.mxu1 %v3763_v28  ;;  %v5043_v36 = vld [vmem:[%s719_s21] sm:$0xff] }
 0xd51   : > { %v1836_v40 = vadd.f32 %v1835_v37, %v1834_v39  ;;  %1766 = vmatpush.msrb.mxu1 %v3762_v29 }
 0xd53   : > { %3771 = vmatmul.msk.f32.vlgmr.msrb.gmra.mxu2 %vm850_vm7, %v1836_v40 }
 0xd8f   : > { %v1674_v42 = vpop.f32.mrf.mxu3 }
 0xd90   : > { %v1677_v43 = vadd.f32 %v1674_v42, %v4770_v1 }
 0xd92   : > { %v4956_v44 = vadd.f32 %v1678_v41, %v1677_v43 }
 0xd94   : > { %v1680_v45 = vsel %vm850_vm7, %v4956_v44, 0.0 }
 0xd95   : > { %1681 = vadd.xlane.f32.xlu1 %v1680_v45 }
 0xdd6   : > { %v1866_v48 = vpop.f32.mrf.mxu2 }
 0xdd7   : > { %v4961_v49 = vadd.f32 %v1866_v48, %v1845_v47 }
 0xdd9   : > { %1870 = vrot.lane.b32.xlu1 %v4961_v49, %s5584_s12  ;;  %1872 = vrot.lane.b32.xlu0 %v4961_v49, %s5585_s7 }
 0xde1   : > { %1874 = vrot.lane.b32.xlu0 %v4961_v49, %s5586_s18 }
 0xde9   : > { %1876 = vrot.lane.b32.xlu0 %v4961_v49, %s5587_s29 }
 0xe08   : > { %v1682_v1 = vpop.xlane.xlu1 %1681 }
 0xe09   : > { %v1683_v50 = vmul.f32 %v1682_v1, %v4611_v32 }
 0xe0b   : > { %v1684_v51 = vsub.f32 %v4956_v44, %v1683_v50 }
 0xe0d   : > { %v1685_v52 = vmul.f32 %v1684_v51, %v1684_v51  ;;  %v1705_v12 = vmul.f32 %v1704_v11, %v1684_v51 }
 0xe0f   : > { %v1686_v53 = vsel %vm850_vm7, %v1685_v52, 0.0 }
 0xe10   : > { %1687 = vadd.xlane.f32.xlu2 %v1686_v53 }
 0xe4b   : > { %v4974_v55 = vpop.permute.xlu0 %1872  ;;  %v4982_v21 = vpop.permute.xlu1 %1870 }
 0xe4c   : > { %1928 = vrot.lane.b32.xlu2 %v4974_v55, %s5587_s29 }
 0xe53   : > { %v4978_v56 = vpop.permute.xlu0 %1874 }
 0xe54   : > { %1954 = vrot.lane.b32.xlu0 %v4978_v56, %s5587_s29  ;;  %v3948_v59 = vpack.i.bf16 %v4978_v56, %v4974_v55 }
 0xe5b   : > { %v1877_v57 = vpop.permute.xlu0 %1876 }
 0xe5c   : > { %1902 = vrot.lane.b32.xlu0 %v4982_v21, %s5587_s29  ;;  %3772 = vmatpush.xpose.msk.msra.mxu3 %vm928_vm11, %v1877_v57 }
 0xe5f   : > { %3773 = vmatmul.msk.f32.vlgmr.msra.gmra.mxu3 %vm928_vm11, %v4961_v49 }
 0xe83   : > { %v1688_v61 = vpop.xlane.xlu2 %1687 }
 0xe84   : > { %v1689_v62 = vmul.f32 0.032258064, %v1688_v61 }
 0xe86   : > { %4038 = vrsqrt.f32 %v1689_v62  ;;  %vm1697_vm2 = vcmp.eq.f32.partialorder %v1689_v62, inf  ;;  %v1700_v7 = vand.u32 2147483648, %v1689_v62  ;;  %vm1699_vm3 = vcmp.eq.f32.partialorder %v1689_v62, 0.0 }
 0xe8c   : > { %v4039_v0 = vpop.eup %4038 }
 0xe8d   : > { %v1691_v2 = vmul.f32 %v4039_v0, %v1689_v62 }
 0xe8f   : > { %v1692_v3 = vmul.f32 %v4039_v0, %v1691_v2 }
 0xe91   : > { %v1693_v4 = vmul.f32 0.5, %v1692_v3 }
 0xe93   : > { %v1694_v8 = vsub.f32 1.5, %v1693_v4 }
 0xe95   : > { %v1695_v5 = vmul.f32 %v4039_v0, %v1694_v8 }
 0xe97   : > { %v1696_v6 = vmul.f32 %v1695_v5, %v1689_v62 }
 0xe99   : > { %v1698_v54 = vsel %vm1697_vm2, %v1689_v62, %v1696_v6 }
 0xe9a   : > { %v1701_v9 = vsel %vm1699_vm3, %v1700_v7, %v1698_v54 }
 0xe9b   : > { %v1702_v10 = vadd.f32 1e-06, %v1701_v9 }
 0xe9d   : > { %4040 = vrcp.f32 %v1702_v10 }
 0xea3   : > { %v4041_v14 = vpop.eup %4040 }
 0xea4   : > { %v1706_v15 = vmul.f32 %v4041_v14, %v1705_v12 }
 0xea6   : > { %v1929_v16 = vpop.permute.xlu2 %1928  ;;  %v1708_v17 = vadd.f32 %v1707_v13, %v1706_v15 }
 0xea7   : > { %3776 = vmatpush.xpose.msk.msra.mxu2 %vm928_vm11, %v1929_v16 }
 0xea8   : > { %3761 = vmatmul.msk.f32.vlgmr.msra.gmra.mxu0 %vm850_vm7, %v1708_v17 }
 0xeaa   : > { %3777 = vmatmul.msk.f32.vlgmr.msra.gmra.mxu2 %vm928_vm11, %v4974_v55 }
 0xec6   : > { %v1955_v22 = vpop.permute.xlu0 %1954 }
 0xec7   : > { %3778 = vmatpush.xpose.msk.msrb.mxu3 %vm928_vm11, %v1955_v22 }
 0xeca   : > { %3779 = vmatmul.msk.f32.vlgmr.msrb.gmra.mxu3 %vm928_vm11, %v4978_v56 }
 0xece   : > { %v1903_v24 = vpop.permute.xlu0 %1902 }
 0xecf   : > { %3774 = vmatpush.xpose.msk.msrb.mxu0 %vm928_vm11, %v1903_v24 }
 0xed2   : > { %3775 = vmatmul.msk.f32.vlgmr.msrb.gmra.mxu0 %vm928_vm11, %v4982_v21 }
 0xee2   : > { %v1899_v40 = vpop.f32.mrf.mxu3 }
 0xee3   : > { %v1900_v1 = vadd.f32 %v1899_v40, %v5043_v36 }
 0xee5   : > { %v1980_v50 = vsel %vm928_vm11, %v1900_v1, -inf }
 0xf25   : > { %v1735_v31 = vpop.f32.mrf.mxu0 }
 0xf26   : > { %v1736_v34 = vadd.f32 %v1735_v31, %v1714_v30  ;;  %v1772_v30 = vperm.slane %v4792_v26, 3  ;;  %v1842_v26 = vld [vmem:[%s5590_s25 + $0x8] sm:$0xff] }
 0xf28   : > { %v1738_v35 = vmax.f32 %v1736_v34, 0.0 }
 0xf2a   : > { %3770 = vmatmul.msk.f32.vlgmr.msrb.gmra.mxu1 %vm1288_vm8, %v1738_v35 }
 0xf2d   : > { %v1951_v37 = vpop.f32.mrf.mxu2 }
 0xf2e   : > { %v1952_v38 = vadd.f32 %v1951_v37, %v5043_v36  ;;  %v1844_v37 = vld [vmem:[%s5590_s25 + $0x18] sm:$0xff] }
 0xf30   : > { %v1986_v39 = vsel %vm928_vm11, %v1952_v38, -inf }
 0xf31   : > { %1987 = vmax.xlane.f32.xlu0 %v1986_v39 }
 0xf4d   : > { %v1977_v41 = vpop.f32.mrf.mxu3 }
 0xf4e   : > { %v1978_v42 = vadd.f32 %v1977_v41, %v5043_v36 }
 0xf4f   : > { %v1925_v43 = vpop.f32.mrf.mxu0 }
 0xf50   : > { %v1926_v45 = vadd.f32 %v1925_v43, %v5043_v36  ;;  %v1989_v47 = vsel %vm928_vm11, %v1978_v42, -inf }
 0xf51   : > { %1990 = vmax.xlane.f32.xlu1 %v1989_v47 }
 0xf52   : > { %v1983_v48 = vsel %vm928_vm11, %v1926_v45, -inf }
 0xf53   : > { %1984 = vmax.xlane.f32.xlu2 %v1983_v48 }
 0xf5b   : > { %1981 = vmax.xlane.f32.xlu2 %v1980_v50 }
 0xfa4   : > { %v1988_v51 = vpop.xlane.xlu0 %1987 }
 0xfa5   : > { %v1994_v52 = vsub.f32 %v1952_v38, %v1988_v51  ;;  %v1843_v38 = vld [vmem:[%s5590_s25 + $0x10] sm:$0xff] }
 0xfa7   : > { %v2000_v53 = vmul.f32 1.442695, %v1994_v52  ;;  %v1768_v27 = vpop.f32.mrf.mxu1 }
 0xfa8   : > { %v1771_v29 = vadd.f32 %v1768_v27, %v4956_v44  ;;  %v1841_v44 = vld [vmem:[%s5590_s25] sm:$0xff] }
 0xfa9   : > { %4042 = vpow2.f32 %v2000_v53  ;;  %v2201_v53 = vld [vmem:[#allocation5 + $0x18] sm:$0xff] }
 0xfaa   : > { %v1773_v34 = vadd.f32 %v1772_v30, %v1771_v29 }
 0xfac   : > { %v1775_v35 = vsel %vm850_vm7, %v1773_v34, 0.0 }
 0xfaf   : > { %v4043_v57 = vpop.eup %4042 }
 0xfb0   : > { %v2010_v58 = vsel %vm928_vm11, %v4043_v57, 0.0 }
 0xfb1   : > { %2011 = vadd.xlane.f32.xlu0 %v2010_v58  ;;  %v2198_v58 = vld [vmem:[#allocation5] sm:$0xff] }
 0xfc4   : > { %v1991_v60 = vpop.xlane.xlu1 %1990 }
 0xfc5   : > { %v1995_v61 = vsub.f32 %v1978_v42, %v1991_v60  ;;  %3949 = vrot.lane.b32.xlu0 %v3948_v59, %s5589_s0  ;;  %v2199_v59 = vld [vmem:[#allocation5 + $0x8] sm:$0xff] }
 0xfc6   : > { %v1985_v62 = vpop.xlane.xlu2 %1984  ;;  %v3958_v60 = vpack.i.bf16 %v2198_v58, %v2199_v59 }
 0xfc7   : > { %v2002_v63 = vmul.f32 1.442695, %v1995_v61  ;;  %v1993_v0 = vsub.f32 %v1926_v45, %v1985_v62  ;;  %v2167_v61 = vperm.slane %v4949_v33, 1 }
 0xfc9   : > { %4044 = vpow2.f32 %v2002_v63  ;;  %v1998_v2 = vmul.f32 1.442695, %v1993_v0 }
 0xfcb   : > { %4046 = vpow2.f32 %v1998_v2 }
 0xfce   : > { %v1982_v3 = vpop.xlane.xlu2 %1981 }
 0xfcf   : > { %v4045_v4 = vpop.eup %4044  ;;  %v1992_v8 = vsub.f32 %v1900_v1, %v1982_v3 }
 0xfd0   : > { %v2013_v5 = vsel %vm928_vm11, %v4045_v4, 0.0 }
 0xfd1   : > { %v4047_v6 = vpop.eup %4046  ;;  %v1996_v7 = vmul.f32 1.442695, %v1992_v8  ;;  %2014 = vadd.xlane.f32.xlu1 %v2013_v5 }
 0xfd2   : > { %v2007_v55 = vsel %vm928_vm11, %v4047_v6, 0.0 }
 0xfd3   : > { %4048 = vpow2.f32 %v1996_v7  ;;  %2008 = vadd.xlane.f32.xlu2 %v2007_v55 }
 0xfd9   : > { %v4049_v56 = vpop.eup %4048 }
 0xfda   : > { %v2004_v54 = vsel %vm928_vm11, %v4049_v56, 0.0 }
 0xfdb   : > { %2005 = vadd.xlane.f32.xlu2 %v2004_v54 }
 0xfea   : > { %2050 = vrot.lane.b32.xlu1 %v4982_v21, %s5589_s0 }
 0xff3   : > { %2024 = vrot.lane.b32.xlu2 %v4961_v49, %s5589_s0 }
0x1024   : > { %v2012_v9 = vpop.xlane.xlu0 %2011 }
0x1025   : > { %4050 = vrcp.f32 %v2012_v9 }
0x102b   : > { %v4051_v10 = vpop.eup %4050 }
0x102c   : > { %v2022_v14 = vmul.f32 %v4051_v10, %v4043_v57  ;;  %v2200_v57 = vld [vmem:[#allocation5 + $0x10] sm:$0xff] }
0x102d   : > { %v3953_v3 = vpack.i.bf16 %v2200_v57, %v2201_v53 }
0x1037   : > { %v3950_v11 = vpop.permute.xlu0 %3949 }
0x1038   : > { %v3952_v12 = vunpack.i.h.bf16 %v3950_v11  ;;  %v3951_v13 = vunpack.i.l.bf16 %v3950_v11 }
0x103a   : > { %2097 = vmatpush.msrb.mxu2 %v3951_v13  ;;  %2123 = vmatpush.msra.mxu3 %v3952_v12 }
0x103b   : > { %3782 = vmatmul.msk.f32.vlgmr.msrb.gmra.mxu2 %vm928_vm11, %v2022_v14 }
0x1044   : > { %v2015_v15 = vpop.xlane.xlu1 %2014 }
0x1045   : > { %4052 = vrcp.f32 %v2015_v15 }
0x1046   : > { %v2009_v16 = vpop.xlane.xlu2 %2008 }
0x104b   : > { %v4053_v17 = vpop.eup %4052 }
0x104c   : > { %v2023_v18 = vmul.f32 %v4053_v17, %v4045_v4 }
0x104e   : > { %v2006_v21 = vpop.xlane.xlu2 %2005  ;;  %3783 = vmatmul.msk.f32.vlgmr.msra.gmra.mxu3 %vm928_vm11, %v2023_v18  ;;  %v1774_v18 = vld [vmem:[%s5591_s26] sm:$0x3] }
0x104f   : > { %4054 = vrcp.f32 %v2006_v21  ;;  %v1799_v21 = vperm.slane %v1774_v18, 0  ;;  %v1802_v27 = vperm.slane %v1774_v18, 1 }
0x1050   : > { %4056 = vrcp.f32 %v2009_v16 }
0x1055   : > { %v4055_v49 = vpop.eup %4054 }
0x1056   : > { %v2020_v19 = vmul.f32 %v4055_v49, %v4049_v56  ;;  %v2025_v20 = vpop.permute.xlu2 %2024  ;;  %v4057_v22 = vpop.eup %4056 }
0x1057   : > { %2045 = vmatpush.msra.mxu0 %v2025_v20  ;;  %v2021_v23 = vmul.f32 %v4057_v22, %v4047_v6 }
0x1058   : > { %3780 = vmatmul.msk.f32.vlgmr.msra.gmra.mxu0 %vm928_vm11, %v2020_v19 }
0x1059   : > { %2158 = vmatpush.msrb.mxu0 %v1844_v37 }
0x105b   : > { %2159 = vmatpush.msrb.mxu0 %v1843_v38 }
0x105c   : > { %v2051_v25 = vpop.permute.xlu1 %2050 }
0x105d   : > { %2071 = vmatpush.msra.mxu1 %v2051_v25  ;;  %2160 = vmatpush.msrb.mxu0 %v1842_v26 }
0x105e   : > { %3781 = vmatmul.msk.f32.vlgmr.msra.gmra.mxu1 %vm928_vm11, %v2021_v23 }
0x105f   : > { %2161 = vmatpush.msrb.mxu0 %v1841_v44  ;;  %2222 = vmatpush.msrb.mxu1 %v2201_v53 }
0x1061   : > { %2223 = vmatpush.msrb.mxu1 %v2200_v57 }
0x1063   : > { %2224 = vmatpush.msrb.mxu1 %v2199_v59 }
0x1065   : > { %2225 = vmatpush.msrb.mxu1 %v2198_v58 }
0x10be   : > { %v2099_v24 = vpop.f32.mrf.mxu2 }
0x10bf   : > { %2133 = vrot.lane.b32.xlu1 %v2099_v24, %s5581_s15 }
0x10d1   : > { %v2125_v31 = vpop.f32.mrf.mxu3 }
0x10d5   : > { %v2047_v40 = vpop.f32.mrf.mxu0 }
0x10db   : > { %v2073_v28 = vpop.f32.mrf.mxu1 }
0x10dc   : > { %2129 = vrot.lane.b32.xlu0 %v2073_v28, %s5582_s13 }
0x10e4   : > { %2137 = vrot.lane.b32.xlu0 %v2125_v31, %s5583_s4  ;;  %v2206_v31 = vperm.slane %v4949_v33, 2 }
0x10e9   : > { %1776 = vadd.xlane.f32.xlu1 %v1775_v35 }
0x1131   : > { %v2134_v42 = vpop.permute.xlu1 %2133 }
0x114e   : > { %v2130_v39 = vpop.permute.xlu0 %2129 }
0x114f   : > { %v2140_v41 = vsel %vm928_vm11, %v2047_v40, %v2130_v39 }
0x1150   : > { %v2141_v45 = vsel %vm1192_vm12, %v2140_v41, %v2134_v42 }
0x1156   : > { %v2138_v43 = vpop.permute.xlu0 %2137 }
0x1157   : > { %v2142_v47 = vsel %vm1194_vm13, %v2141_v45, %v2138_v43 }
0x1158   : > { %3784 = vmatmul.msk.f32.vlgmr.msrb.gmra.mxu0 %vm850_vm7, %v2142_v47  ;;  %v5115_v47 = vld [vmem:[%s5495_s20 + $0x8] sm:$0xf] }
0x115c   : > { %v1777_v48 = vpop.xlane.xlu1 %1776 }
0x115d   : > { %v1778_v1 = vmul.f32 %v1777_v48, %v4611_v32 }
0x115f   : > { %v1779_v50 = vsub.f32 %v1773_v34, %v1778_v1  ;;  %v2193_v1 = vperm.slane %v5115_v47, 0 }
0x1161   : > { %v1780_v51 = vmul.f32 %v1779_v50, %v1779_v50  ;;  %v1800_v25 = vmul.f32 %v1799_v21, %v1779_v50 }
0x1163   : > { %v1781_v52 = vsel %vm850_vm7, %v1780_v51, 0.0  ;;  %v2196_v51 = vperm.slane %v5115_v47, 1 }
0x1164   : > { %1782 = vadd.xlane.f32.xlu2 %v1781_v52 }
0x117c   : > { %3959 = vrot.lane.b32.xlu2 %v3958_v60, %s5587_s29 }
0x11d5   : > { %v2163_v62 = vpop.f32.mrf.mxu0 }
0x11d6   : > { %v2166_v63 = vadd.f32 %v2163_v62, %v4902_v46 }
0x11d7   : > { %v1783_v4 = vpop.xlane.xlu2 %1782 }
0x11d8   : > { %v5095_v0 = vadd.f32 %v2167_v61, %v2166_v63  ;;  %v1784_v8 = vmul.f32 0.032258064, %v1783_v4 }
0x11da   : > { %v2169_v2 = vsel %vm850_vm7, %v5095_v0, 0.0  ;;  %4058 = vrsqrt.f32 %v1784_v8  ;;  %vm1792_vm4 = vcmp.eq.f32.partialorder %v1784_v8, inf  ;;  %v1795_v13 = vand.u32 2147483648, %v1784_v8 }
0x11db   : > { %2170 = vadd.xlane.f32.xlu0 %v2169_v2  ;;  %vm1794_vm5 = vcmp.eq.f32.partialorder %v1784_v8, 0.0 }
0x11df   : > { %v3960_v19 = vpop.permute.xlu2 %3959 }
0x11e0   : > { %v4059_v5 = vpop.eup %4058  ;;  %v3961_v24 = vunpack.i.l.bf16 %v3960_v19  ;;  %v3962_v29 = vunpack.i.h.bf16 %v3960_v19 }
0x11e1   : > { %v1786_v6 = vmul.f32 %v4059_v5, %v1784_v8 }
0x11e3   : > { %v1787_v7 = vmul.f32 %v4059_v5, %v1786_v6  ;;  %v5150_v6 = vld [vmem:[%s723_s1] sm:$0xff]  ;;  %s5595_s1 = sld [smem:[#allocation20_spill]] }
0x11e5   : > { %v1788_v55 = vmul.f32 0.5, %v1787_v7 }
0x11e7   : > { %v1789_v56 = vsub.f32 1.5, %v1788_v55 }
0x11e9   : > { %v1790_v54 = vmul.f32 %v4059_v5, %v1789_v56 }
0x11eb   : > { %v1791_v9 = vmul.f32 %v1790_v54, %v1784_v8 }
0x11ed   : > { %v1793_v12 = vsel %vm1792_vm4, %v1784_v8, %v1791_v9 }
0x11ee   : > { %v1796_v16 = vsel %vm1794_vm5, %v1795_v13, %v1793_v12 }
0x11ef   : > { %3954 = vrot.lane.b32.xlu0 %v3953_v3, %s5587_s29  ;;  %v1797_v17 = vadd.f32 1e-06, %v1796_v16 }
0x11f1   : > { %4060 = vrcp.f32 %v1797_v17 }
0x11f7   : > { %v4061_v20 = vpop.eup %4060 }
0x11f8   : > { %v1801_v28 = vmul.f32 %v4061_v20, %v1800_v25 }
0x11fa   : > { %v5106_v30 = vadd.f32 %v1802_v27, %v1801_v28 }
0x124e   : > { %v2171_v46 = vpop.xlane.xlu0 %2170 }
0x124f   : > { %v2172_v10 = vmul.f32 %v2171_v46, %v4611_v32 }
0x1251   : > { %v2173_v11 = vsub.f32 %v5095_v0, %v2172_v10 }
0x1253   : > { %v2174_v14 = vmul.f32 %v2173_v11, %v2173_v11  ;;  %v2194_v50 = vmul.f32 %v2193_v1, %v2173_v11 }
0x1255   : > { %v2175_v15 = vsel %vm850_vm7, %v2174_v14, 0.0 }
0x1256   : > { %2176 = vadd.xlane.f32.xlu1 %v2175_v15 }
0x1261   : > { %v3955_v49 = vpop.permute.xlu0 %3954 }
0x1262   : > { %v3957_v22 = vunpack.i.h.bf16 %v3955_v49  ;;  %v3956_v23 = vunpack.i.l.bf16 %v3955_v49 }
0x1264   : > { %2265 = vmatpush.msra.mxu2 %v3956_v23 }
0x1266   : > { %2266 = vmatpush.msra.mxu2 %v3957_v22 }
0x1268   : > { %2267 = vmatpush.msra.mxu2 %v3961_v24 }
0x126a   : > { %2268 = vmatpush.msra.mxu2 %v3962_v29 }
0x126b   : > { %3786 = vmatmul.msk.f32.vlgmr.msra.gmra.mxu2 %vm850_vm7, %v5106_v30 }
0x126f   : > { %2247 = vrot.lane.b32.xlu1 %v2206_v31, %s5587_s29 }
0x12c9   : > { %v2177_v34 = vpop.xlane.xlu1 %2176 }
0x12ca   : > { %v2178_v35 = vmul.f32 0.032258064, %v2177_v34 }
0x12cc   : > { %4062 = vrsqrt.f32 %v2178_v35  ;;  %vm2186_vm6 = vcmp.eq.f32.partialorder %v2178_v35, inf  ;;  %v2189_v42 = vand.u32 2147483648, %v2178_v35  ;;  %vm2188_vm14 = vcmp.eq.f32.partialorder %v2178_v35, 0.0 }
0x12d2   : > { %v4063_v37 = vpop.eup %4062 }
0x12d3   : > { %v2180_v38 = vmul.f32 %v4063_v37, %v2178_v35 }
0x12d5   : > { %v2181_v26 = vmul.f32 %v4063_v37, %v2180_v38 }
0x12d7   : > { %v2182_v44 = vmul.f32 0.5, %v2181_v26 }
0x12d9   : > { %v2183_v39 = vsub.f32 1.5, %v2182_v44 }
0x12db   : > { %v2184_v40 = vmul.f32 %v4063_v37, %v2183_v39 }
0x12dd   : > { %v2185_v41 = vmul.f32 %v2184_v40, %v2178_v35 }
0x12df   : > { %v2187_v43 = vsel %vm2186_vm6, %v2178_v35, %v2185_v41 }
0x12e0   : > { %v2190_v45 = vsel %vm2188_vm14, %v2189_v42, %v2187_v43 }
0x12e1   : > { %v2191_v48 = vadd.f32 1e-06, %v2190_v45  ;;  %v2248_v58 = vpop.permute.xlu1 %2247 }
0x12e3   : > { %4064 = vrcp.f32 %v2191_v48 }
0x12e9   : > { %v4065_v52 = vpop.eup %4064 }
0x12ea   : > { %v2195_v53 = vmul.f32 %v4065_v52, %v2194_v50 }
0x12ec   : > { %v2197_v57 = vadd.f32 %v2196_v51, %v2195_v53 }
0x12ee   : > { %3785 = vmatmul.msk.f32.vlgmr.msrb.gmra.mxu1 %vm850_vm7, %v2197_v57  ;;  %v2270_v59 = vpop.f32.mrf.mxu2 }
0x12ef   : > { %v5120_v60 = vadd.f32 %v2270_v59, %v2248_v58 }
0x12f1   : > { %2283 = vrot.lane.b32.xlu1 %v5120_v60, %s5585_s7  ;;  %2285 = vrot.lane.b32.xlu0 %v5120_v60, %s5586_s18 }
0x12f2   : > { %3787 = vmatpush.xpose.msk.msrb.mxu3 %vm928_vm11, %v5120_v60 }
0x12f9   : > { %2281 = vrot.lane.b32.xlu0 %v5120_v60, %s5584_s12 }
0x1363   : > { %v5130_v61 = vpop.permute.xlu1 %2283  ;;  %v5132_v62 = vpop.permute.xlu0 %2285 }
0x1364   : > { %3791 = vmatpush.xpose.msk.msra.mxu1 %vm928_vm11, %v5130_v61  ;;  %3793 = vmatpush.xpose.msk.msrb.mxu2 %vm928_vm11, %v5132_v62 }
0x136b   : > { %v2227_v63 = vpop.f32.mrf.mxu1  ;;  %v2282_v2 = vpop.permute.xlu0 %2281 }
0x136c   : > { %v2228_v3 = vadd.f32 %v2227_v63, %v2206_v31  ;;  %3789 = vmatpush.xpose.msk.msra.mxu0 %vm928_vm11, %v2282_v2  ;;  %v3963_v26 = vpack.i.bf16 %v2282_v2, %v5132_v62 }
0x136e   : > { %2278 = vrot.lane.b32.xlu2 %v2228_v3, %s5586_s18  ;;  %2276 = vrot.lane.b32.xlu0 %v2228_v3, %s5585_s7 }
0x136f   : > { %3788 = vmatmul.msk.f32.vlgmr.msrb.gmra.mxu3 %vm928_vm11, %v2228_v3 }
0x1376   : > { %2274 = vrot.lane.b32.xlu2 %v2228_v3, %s5584_s12  ;;  %v2205_v3 = vld [vmem:[#allocation8 + $0x18] sm:$0xff] }
0x13c8   : > { %v2279_v4 = vpop.permute.xlu2 %2278 }
0x13c9   : > { %3794 = vmatmul.msk.f32.vlgmr.msrb.gmra.mxu2 %vm928_vm11, %v2279_v4  ;;  %v2204_v4 = vld [vmem:[#allocation8 + $0x10] sm:$0xff] }
0x13d0   : > { %v2275_v8 = vpop.permute.xlu2 %2274 }
0x13d1   : > { %3790 = vmatmul.msk.f32.vlgmr.msra.gmra.mxu0 %vm928_vm11, %v2275_v8  ;;  %v2203_v8 = vld [vmem:[#allocation8 + $0x8] sm:$0xff] }
0x13e0   : > { %v2277_v5 = vpop.permute.xlu0 %2276 }
0x13e1   : > { %3792 = vmatmul.msk.f32.vlgmr.msra.gmra.mxu1 %vm928_vm11, %v2277_v5  ;;  %v2202_v5 = vld [vmem:[#allocation8] sm:$0xff] }
0x13f2   : > { %v2308_v46 = vpop.f32.mrf.mxu3 }
0x13f3   : > { %v2309_v11 = vadd.f32 %v2308_v46, %v5150_v6 }
0x13f5   : > { %v2383_v12 = vsel %vm928_vm11, %v2309_v11, -inf }
0x144c   : > { %v2380_v7 = vpop.f32.mrf.mxu2 }
0x144d   : > { %v2381_v55 = vadd.f32 %v2380_v7, %v5150_v6 }
0x144e   : > { %v2332_v56 = vpop.f32.mrf.mxu0 }
0x144f   : > { %v2333_v54 = vadd.f32 %v2332_v56, %v5150_v6  ;;  %v2392_v9 = vsel %vm928_vm11, %v2381_v55, -inf }
0x1450   : > { %2393 = vmax.xlane.f32.xlu1 %v2392_v9 }
0x1451   : > { %v2386_v10 = vsel %vm928_vm11, %v2333_v54, -inf }
0x1452   : > { %2387 = vmax.xlane.f32.xlu2 %v2386_v10 }
0x1458   : > { %2384 = vmax.xlane.f32.xlu1 %v2383_v12 }
0x145e   : > { %v2356_v13 = vpop.f32.mrf.mxu1 }
0x145f   : > { %v2357_v14 = vadd.f32 %v2356_v13, %v5150_v6 }
0x1461   : > { %v2389_v15 = vsel %vm928_vm11, %v2357_v14, -inf }
0x1462   : > { %2390 = vmax.xlane.f32.xlu0 %v2389_v15 }
0x14c3   : > { %v2394_v16 = vpop.xlane.xlu1 %2393 }
0x14c4   : > { %v2398_v17 = vsub.f32 %v2381_v55, %v2394_v16 }
0x14c5   : > { %v2388_v18 = vpop.xlane.xlu2 %2387 }
0x14c6   : > { %v2405_v21 = vmul.f32 1.442695, %v2398_v17  ;;  %v2396_v49 = vsub.f32 %v2333_v54, %v2388_v18 }
0x14c8   : > { %4066 = vpow2.f32 %v2405_v21  ;;  %v2401_v19 = vmul.f32 1.442695, %v2396_v49 }
0x14ca   : > { %4068 = vpow2.f32 %v2401_v19  ;;  %v2604_v19 = vld [vmem:[#allocation10 + $0x18] sm:$0xff] }
0x14cb   : > { %v2385_v24 = vpop.xlane.xlu1 %2384 }
0x14cc   : > { %v2395_v29 = vsub.f32 %v2309_v11, %v2385_v24  ;;  %v2570_v11 = vperm.slane %v4949_v33, 3  ;;  %v2637_v24 = vld [vmem:[%s5593_s2 + $0x38] sm:$0xff] }
0x14ce   : > { %v4067_v20 = vpop.eup %4066  ;;  %v2399_v34 = vmul.f32 1.442695, %v2395_v29 }
0x14cf   : > { %v2416_v22 = vsel %vm928_vm11, %v4067_v20, 0.0 }
0x14d0   : > { %v4069_v23 = vpop.eup %4068  ;;  %2417 = vadd.xlane.f32.xlu2 %v2416_v22  ;;  %v2602_v22 = vld [vmem:[#allocation10 + $0x8] sm:$0xff] }
0x14d1   : > { %v2410_v25 = vsel %vm928_vm11, %v4069_v23, 0.0 }
0x14d2   : > { %2411 = vadd.xlane.f32.xlu0 %v2410_v25 }
0x14d5   : > { %v2391_v27 = vpop.xlane.xlu0 %2390 }
0x14d6   : > { %v2397_v28 = vsub.f32 %v2357_v14, %v2391_v27  ;;  %v2636_v27 = vld [vmem:[%s5593_s2 + $0x30] sm:$0xff] }
0x14d8   : > { %v2403_v31 = vmul.f32 1.442695, %v2397_v28  ;;  %v2635_v28 = vld [vmem:[%s5593_s2 + $0x28] sm:$0xff] }
0x14da   : > { %4070 = vpow2.f32 %v2403_v31  ;;  %v2634_v31 = vld [vmem:[%s5593_s2 + $0x20] sm:$0xff] }
0x14db   : > { %4072 = vpow2.f32 %v2399_v34 }
0x14e0   : > { %v4071_v35 = vpop.eup %4070 }
0x14e1   : > { %v2413_v37 = vsel %vm928_vm11, %v4071_v35, 0.0  ;;  %v4073_v38 = vpop.eup %4072 }
0x14e2   : > { %2414 = vadd.xlane.f32.xlu1 %v2413_v37  ;;  %v2407_v44 = vsel %vm928_vm11, %v4073_v38, 0.0 }
0x14e6   : > { %2479 = vrot.lane.b32.xlu0 %v5130_v61, %s5587_s29 }
0x14e8   : > { %3964 = vrot.lane.b32.xlu2 %v3963_v26, %s5587_s29 }
0x14ea   : > { %2408 = vadd.xlane.f32.xlu1 %v2407_v44 }
0x1503   : > { %2427 = vrot.lane.b32.xlu1 %v5120_v60, %s5587_s29 }
0x1543   : > { %v2418_v39 = vpop.xlane.xlu2 %2417 }
0x1544   : > { %4074 = vrcp.f32 %v2418_v39 }
0x1545   : > { %v2412_v40 = vpop.xlane.xlu0 %2411 }
0x1546   : > { %4076 = vrcp.f32 %v2412_v40 }
0x154a   : > { %v4075_v41 = vpop.eup %4074 }
0x154b   : > { %v3965_v42 = vpop.permute.xlu2 %3964  ;;  %v2426_v1 = vmul.f32 %v4075_v41, %v4067_v20  ;;  %v2603_v20 = vld [vmem:[#allocation10 + $0x10] sm:$0xff] }
0x154c   : > { %v4077_v43 = vpop.eup %4076  ;;  %v3967_v45 = vunpack.i.h.bf16 %v3965_v42  ;;  %v3966_v48 = vunpack.i.l.bf16 %v3965_v42 }
0x154d   : > { %v2424_v50 = vmul.f32 %v4077_v43, %v4069_v23 }
0x154e   : > { %2474 = vmatpush.msrb.mxu0 %v3967_v45  ;;  %2526 = vmatpush.msra.mxu2 %v3966_v48  ;;  %v2596_v45 = vperm.slane %v5115_v47, 2 }
0x154f   : > { %3796 = vmatmul.msk.f32.vlgmr.msrb.gmra.mxu0 %vm928_vm11, %v2424_v50  ;;  %3798 = vmatmul.msk.f32.vlgmr.msra.gmra.mxu2 %vm928_vm11, %v2426_v1  ;;  %v2599_v1 = vperm.slane %v5115_v47, 3  ;;  %v2605_v47 = vperm.slane %v4949_v33, 4 }
0x1550   : > { %2621 = vmatpush.msra.mxu0 %v2604_v19 }
0x1552   : > { %2622 = vmatpush.msra.mxu0 %v2603_v20  ;;  %v5243_v20 = vld [vmem:[%s5495_s20 + $0x10] sm:$0xff] }
0x1554   : > { %2623 = vmatpush.msra.mxu0 %v2602_v22 }
0x1555   : > { %v2415_v51 = vpop.xlane.xlu1 %2414 }
0x1556   : > { %4078 = vrcp.f32 %v2415_v51 }
0x1558   : > { %v2480_v52 = vpop.permute.xlu0 %2479 }
0x1559   : > { %2500 = vmatpush.msrb.mxu1 %v2480_v52 }
0x155b   : > { %2649 = vmatpush.msra.mxu1 %v2637_v24 }
0x155c   : > { %v4079_v53 = vpop.eup %4078 }
0x155d   : > { %v2425_v57 = vmul.f32 %v4079_v53, %v4071_v35  ;;  %v2409_v58 = vpop.xlane.xlu1 %2408  ;;  %2650 = vmatpush.msra.mxu1 %v2636_v27  ;;  %v2633_v35 = vld [vmem:[%s5593_s2 + $0x18] sm:$0xff]  ;;  %v2632_v53 = vld [vmem:[%s5593_s2 + $0x10] sm:$0xff] }
0x155e   : > { %4080 = vrcp.f32 %v2409_v58  ;;  %v2630_v58 = vld [vmem:[%s5593_s2] sm:$0xff] }
0x155f   : > { %3797 = vmatmul.msk.f32.vlgmr.msrb.gmra.mxu1 %vm928_vm11, %v2425_v57  ;;  %v2631_v57 = vld [vmem:[%s5593_s2 + $0x8] sm:$0xff] }
0x1560   : > { %2651 = vmatpush.msra.mxu1 %v2635_v28 }
0x1562   : > { %2652 = vmatpush.msra.mxu1 %v2634_v31 }
0x1564   : > { %v4081_v59 = vpop.eup %4080  ;;  %2653 = vmatpush.msra.mxu1 %v2633_v35 }
0x1565   : > { %v2423_v60 = vmul.f32 %v4081_v59, %v4073_v38 }
0x1566   : > { %2654 = vmatpush.msra.mxu1 %v2632_v53 }
0x1568   : > { %2655 = vmatpush.msra.mxu1 %v2631_v57 }
0x156a   : > { %2656 = vmatpush.msra.mxu1 %v2630_v58 }
0x1575   : > { %v2428_v61 = vpop.permute.xlu1 %2427 }
0x1576   : > { %2448 = vmatpush.msra.mxu3 %v2428_v61 }
0x1577   : > { %3795 = vmatmul.msk.f32.vlgmr.msra.gmra.mxu3 %vm928_vm11, %v2423_v60 }
0x1578   : > { %2561 = vmatpush.msrb.mxu3 %v2205_v3 }
0x157a   : > { %2562 = vmatpush.msrb.mxu3 %v2204_v4 }
0x157c   : > { %2563 = vmatpush.msrb.mxu3 %v2203_v8 }
0x157e   : > { %2564 = vmatpush.msrb.mxu3 %v2202_v5 }
0x15cc   : > { %v2476_v62 = vpop.f32.mrf.mxu0 }
0x15cd   : > { %2532 = vrot.lane.b32.xlu0 %v2476_v62, %s5582_s13  ;;  %v2662_v62 = vperm.slane %v4949_v33, 5  ;;  %v3807_v33 = vld [vmem:[%s5489_s14 + $0x38] sm:$0xff] }
0x15ce   : > { %2722 = vmatpush.msrb.mxu2 %v3807_v33 }
0x15d2   : > { %v2528_v63 = vpop.f32.mrf.mxu2 }
0x15d5   : > { %2540 = vrot.lane.b32.xlu0 %v2528_v63, %s5583_s4 }
0x15dc   : > { %v2502_v2 = vpop.f32.mrf.mxu1 }
0x15dd   : > { %2536 = vrot.lane.b32.xlu2 %v2502_v2, %s5581_s15 }
0x15fa   : > { %v2450_v55 = vpop.f32.mrf.mxu3 }
0x1637   : > { %v2537_v54 = vpop.permute.xlu2 %2536 }
0x163f   : > { %v2533_v7 = vpop.permute.xlu0 %2532 }
0x1640   : > { %v2543_v56 = vsel %vm928_vm11, %v2450_v55, %v2533_v7 }
0x1641   : > { %v2544_v46 = vsel %vm1192_vm12, %v2543_v56, %v2537_v54  ;;  %v3806_v54 = vld [vmem:[%s5489_s14 + $0x30] sm:$0xff] }
0x1642   : > { %2723 = vmatpush.msrb.mxu2 %v3806_v54 }
0x1647   : > { %v2541_v9 = vpop.permute.xlu0 %2540 }
0x1648   : > { %v2545_v10 = vsel %vm1194_vm13, %v2544_v46, %v2541_v9  ;;  %v3805_v9 = vld [vmem:[%s5489_s14 + $0x28] sm:$0xff]  ;;  %v3804_v46 = vld [vmem:[%s5489_s14 + $0x20] sm:$0xff] }
0x1649   : > { %3799 = vmatmul.msk.f32.vlgmr.msrb.gmra.mxu3 %vm850_vm7, %v2545_v10  ;;  %2724 = vmatpush.msrb.mxu2 %v3805_v9 }
0x164b   : > { %2725 = vmatpush.msrb.mxu2 %v3804_v46 }
0x16cc   : > { %v2566_v12 = vpop.f32.mrf.mxu3 }
0x16cd   : > { %v2569_v13 = vadd.f32 %v2566_v12, %v5095_v0  ;;  %v2601_v0 = vld [vmem:[#allocation10] sm:$0xff] }
0x16ce   : > { %2624 = vmatpush.msra.mxu0 %v2601_v0  ;;  %v2691_v0 = vperm.slane %v5243_v20, 6 }
0x16cf   : > { %v5183_v14 = vadd.f32 %v2570_v11, %v2569_v13 }
0x16d1   : > { %v2572_v15 = vsel %vm850_vm7, %v5183_v14, 0.0 }
0x16d2   : > { %2573 = vadd.xlane.f32.xlu2 %v2572_v15 }
0x1745   : > { %v2574_v16 = vpop.xlane.xlu2 %2573 }
0x1746   : > { %v2575_v17 = vmul.f32 %v2574_v16, %v4611_v32 }
0x1748   : > { %v2576_v18 = vsub.f32 %v5183_v14, %v2575_v17 }
0x174a   : > { %v2577_v21 = vmul.f32 %v2576_v18, %v2576_v18  ;;  %v2597_v48 = vmul.f32 %v2596_v45, %v2576_v18 }
0x174c   : > { %v2578_v49 = vsel %vm850_vm7, %v2577_v21, 0.0 }
0x174d   : > { %2579 = vadd.xlane.f32.xlu1 %v2578_v49 }
0x17c0   : > { %v2580_v23 = vpop.xlane.xlu1 %2579 }
0x17c1   : > { %v2581_v25 = vmul.f32 0.032258064, %v2580_v23 }
0x17c3   : > { %4082 = vrsqrt.f32 %v2581_v25  ;;  %vm2589_vm15 = vcmp.eq.f32.partialorder %v2581_v25, inf  ;;  %v2592_v40 = vand.u32 2147483648, %v2581_v25  ;;  %vm2591_vm9 = vcmp.eq.f32.partialorder %v2581_v25, 0.0 }
0x17c9   : > { %v4083_v29 = vpop.eup %4082 }
0x17ca   : > { %v2583_v34 = vmul.f32 %v4083_v29, %v2581_v25 }
0x17cc   : > { %v2584_v37 = vmul.f32 %v4083_v29, %v2583_v34 }
0x17ce   : > { %v2585_v38 = vmul.f32 0.5, %v2584_v37 }
0x17d0   : > { %v2586_v26 = vsub.f32 1.5, %v2585_v38 }
0x17d2   : > { %v2587_v44 = vmul.f32 %v4083_v29, %v2586_v26  ;;  %v2706_v29 = vperm.slane %v5243_v20, 0 }
0x17d4   : > { %v2588_v39 = vmul.f32 %v2587_v44, %v2581_v25 }
0x17d6   : > { %v2590_v41 = vsel %vm2589_vm15, %v2581_v25, %v2588_v39  ;;  %v2694_v25 = vperm.slane %v5243_v20, 7 }
0x17d7   : > { %v2593_v42 = vsel %vm2591_vm9, %v2592_v40, %v2590_v41 }
0x17d8   : > { %v2594_v43 = vadd.f32 1e-06, %v2593_v42 }
0x17da   : > { %4084 = vrcp.f32 %v2594_v43 }
0x17e0   : > { %v4085_v50 = vpop.eup %4084 }
0x17e1   : > { %v2598_v51 = vmul.f32 %v4085_v50, %v2597_v48 }
0x17e3   : > { %v2600_v52 = vadd.f32 %v2599_v1, %v2598_v51 }
0x17e5   : > { %3800 = vmatmul.msk.f32.vlgmr.msra.gmra.mxu0 %vm850_vm7, %v2600_v52 }
0x1862   : > { %v2626_v59 = vpop.f32.mrf.mxu0 }
0x1863   : > { %v2627_v60 = vadd.f32 %v2626_v59, %v2605_v47 }
0x1865   : > { %v2629_v61 = vmax.f32 %v2627_v60, 0.0 }
0x1867   : > { %3801 = vmatmul.msk.f32.vlgmr.msra.gmra.mxu1 %vm1288_vm8, %v2629_v61 }
0x18e4   : > { %v2658_v63 = vpop.f32.mrf.mxu1 }
0x18e5   : > { %v2661_v2 = vadd.f32 %v2658_v63, %v5183_v14 }
0x18e7   : > { %v5221_v3 = vadd.f32 %v2662_v62, %v2661_v2 }
0x18e9   : > { %v2667_v4 = vsel %vm850_vm7, %v5221_v3, 0.0 }
0x18ea   : > { %2668 = vadd.xlane.f32.xlu0 %v2667_v4 }
0x195d   : > { %v2669_v8 = vpop.xlane.xlu0 %2668 }
0x195e   : > { %v2670_v5 = vmul.f32 %v2669_v8, %v4611_v32 }
0x1960   : > { %v2671_v7 = vsub.f32 %v5221_v3, %v2670_v5 }
0x1962   : > { %v2672_v55 = vmul.f32 %v2671_v7, %v2671_v7  ;;  %v2692_v23 = vmul.f32 %v2691_v0, %v2671_v7 }
0x1964   : > { %v2673_v56 = vsel %vm850_vm7, %v2672_v55, 0.0 }
0x1965   : > { %2674 = vadd.xlane.f32.xlu2 %v2673_v56 }
0x19d8   : > { %v2675_v10 = vpop.xlane.xlu2 %2674 }
0x19d9   : > { %v2676_v11 = vmul.f32 0.032258064, %v2675_v10 }
0x19db   : > { %4086 = vrsqrt.f32 %v2676_v11  ;;  %vm2684_vm10 = vcmp.eq.f32.partialorder %v2676_v11, inf  ;;  %v2687_v21 = vand.u32 2147483648, %v2676_v11  ;;  %vm2686_vm0 = vcmp.eq.f32.partialorder %v2676_v11, 0.0 }
0x19e1   : > { %v4087_v12 = vpop.eup %4086 }
0x19e2   : > { %v2678_v13 = vmul.f32 %v4087_v12, %v2676_v11 }
0x19e4   : > { %v2679_v14 = vmul.f32 %v4087_v12, %v2678_v13 }
0x19e6   : > { %v2680_v15 = vmul.f32 0.5, %v2679_v14 }
0x19e8   : > { %v2681_v16 = vsub.f32 1.5, %v2680_v15 }
0x19ea   : > { %v2682_v17 = vmul.f32 %v4087_v12, %v2681_v16 }
0x19ec   : > { %v2683_v18 = vmul.f32 %v2682_v17, %v2676_v11 }
0x19ee   : > { %v2685_v49 = vsel %vm2684_vm10, %v2676_v11, %v2683_v18 }
0x19ef   : > { %v2688_v19 = vsel %vm2686_vm0, %v2687_v21, %v2685_v49 }
0x19f0   : > { %v2689_v22 = vadd.f32 1e-06, %v2688_v19 }
0x19f2   : > { %4088 = vrcp.f32 %v2689_v22 }
0x19f8   : > { %v4089_v24 = vpop.eup %4088 }
0x19f9   : > { %v2693_v27 = vmul.f32 %v4089_v24, %v2692_v23 }
0x19fb   : > { %v2695_v28 = vadd.f32 %v2694_v25, %v2693_v27 }
0x19fd   : > { %3812 = vmatmul.msk.f32.vlgmr.msrb.gmra.mxu2 %vm850_vm7, %v2695_v28 }
0x1a80   : > { %v2727_v31 = vpop.f32.mrf.mxu2 }
0x1a81   : > { %v5249_v34 = vadd.f32 %v2727_v31, %v2706_v29 }
0x1a83   : > { %2731 = vrot.lane.b32.xlu2 %v5249_v34, %s5584_s12  ;;  %2735 = vrot.lane.b32.xlu0 %v5249_v34, %s5586_s18 }
0x1a84   : > { %2733 = vrot.lane.b32.xlu1 %v5249_v34, %s5585_s7 }
0x1a8b   : > { %2737 = vrot.lane.b32.xlu0 %v5249_v34, %s5587_s29 }
0x1add   : > { %v2732_v35 = vpop.permute.xlu2 %2731 }
0x1ade   : > { %2763 = vrot.lane.b32.xlu0 %v2732_v35, %s5587_s29 }
0x1af5   : > { %v5260_v37 = vpop.permute.xlu0 %2735 }
0x1af6   : > { %v2734_v38 = vpop.permute.xlu1 %2733  ;;  %2815 = vrot.lane.b32.xlu2 %v5260_v37, %s5587_s29 }
0x1af7   : > { %2789 = vrot.lane.b32.xlu1 %v2734_v38, %s5587_s29  ;;  %v3968_v12 = vpack.i.bf16 %v5260_v37, %v2734_v38 }
0x1afd   : > { %v2738_v26 = vpop.permute.xlu0 %2737 }
0x1afe   : > { %3813 = vmatpush.xpose.msk.msra.mxu3 %vm928_vm11, %v2738_v26 }
0x1b01   : > { %3814 = vmatmul.msk.f32.vlgmr.msra.gmra.mxu3 %vm928_vm11, %v5249_v34 }
0x1b50   : > { %v2816_v44 = vpop.permute.xlu2 %2815  ;;  %v2764_v39 = vpop.permute.xlu0 %2763 }
0x1b51   : > { %3815 = vmatpush.xpose.msk.msrb.mxu0 %vm928_vm11, %v2764_v39  ;;  %3819 = vmatpush.xpose.msk.msrb.mxu3 %vm928_vm11, %v2816_v44 }
0x1b54   : > { %3816 = vmatmul.msk.f32.vlgmr.msrb.gmra.mxu0 %vm928_vm11, %v2732_v35  ;;  %3820 = vmatmul.msk.f32.vlgmr.msrb.gmra.mxu3 %vm928_vm11, %v5260_v37  ;;  %v3061_v37 = vld [vmem:[#allocation5 + $0x28] sm:$0xff] }
0x1b69   : > { %v2790_v40 = vpop.permute.xlu1 %2789 }
0x1b6a   : > { %3817 = vmatpush.xpose.msk.msra.mxu2 %vm928_vm11, %v2790_v40 }
0x1b6d   : > { %3818 = vmatmul.msk.f32.vlgmr.msra.gmra.mxu2 %vm928_vm11, %v2734_v38  ;;  %v3060_v38 = vld [vmem:[#allocation5 + $0x20] sm:$0xff] }
0x1b6e   : > { %v3978_v40 = vpack.i.bf16 %v3060_v38, %v3061_v37 }
0x1b84   : > { %v2760_v41 = vpop.f32.mrf.mxu3 }
0x1b85   : > { %v2761_v51 = vadd.f32 %v2760_v41, %v5043_v36  ;;  %v3811_v41 = vld [vmem:[%s5590_s25 + $0x38] sm:$0xff] }
0x1b87   : > { %v2841_v52 = vsel %vm928_vm11, %v2761_v51, -inf }
0x1bd1   : > { %v2786_v42 = vpop.f32.mrf.mxu0 }
0x1bd2   : > { %v2787_v43 = vadd.f32 %v2786_v42, %v5043_v36  ;;  %v3810_v42 = vld [vmem:[%s5590_s25 + $0x30] sm:$0xff] }
0x1bd4   : > { %v2844_v45 = vsel %vm928_vm11, %v2787_v43, -inf }
0x1bd5   : > { %2845 = vmax.xlane.f32.xlu0 %v2844_v45  ;;  %v3808_v45 = vld [vmem:[%s5590_s25 + $0x20] sm:$0xff] }
0x1bd7   : > { %v2838_v48 = vpop.f32.mrf.mxu3 }
0x1bd8   : > { %v2839_v1 = vadd.f32 %v2838_v48, %v5043_v36  ;;  %v3069_v48 = vperm.slane %v5243_v20, 2 }
0x1bda   : > { %v2850_v50 = vsel %vm928_vm11, %v2839_v1, -inf }
0x1bdb   : > { %2851 = vmax.xlane.f32.xlu2 %v2850_v50 }
0x1be3   : > { %2842 = vmax.xlane.f32.xlu2 %v2841_v52 }
0x1bf0   : > { %v2812_v53 = vpop.f32.mrf.mxu2 }
0x1bf1   : > { %v2813_v57 = vadd.f32 %v2812_v53, %v5043_v36 }
0x1bf3   : > { %v2847_v58 = vsel %vm928_vm11, %v2813_v57, -inf }
0x1bf4   : > { %2848 = vmax.xlane.f32.xlu1 %v2847_v58 }
0x1c48   : > { %v2846_v47 = vpop.xlane.xlu0 %2845 }
0x1c49   : > { %v2854_v59 = vsub.f32 %v2787_v43, %v2846_v47  ;;  %v3809_v43 = vld [vmem:[%s5590_s25 + $0x28] sm:$0xff] }
0x1c4b   : > { %v2859_v60 = vmul.f32 1.442695, %v2854_v59 }
0x1c4d   : > { %4090 = vpow2.f32 %v2859_v60 }
0x1c4e   : > { %v2852_v61 = vpop.xlane.xlu2 %2851 }
0x1c4f   : > { %v2856_v62 = vsub.f32 %v2839_v1, %v2852_v61 }
0x1c51   : > { %v2863_v63 = vmul.f32 1.442695, %v2856_v62 }
0x1c53   : > { %v4091_v2 = vpop.eup %4090  ;;  %4092 = vpow2.f32 %v2863_v63 }
0x1c54   : > { %v2868_v4 = vsel %vm928_vm11, %v4091_v2, 0.0 }
0x1c55   : > { %2869 = vadd.xlane.f32.xlu2 %v2868_v4 }
0x1c56   : > { %v2843_v8 = vpop.xlane.xlu2 %2842 }
0x1c57   : > { %v2853_v5 = vsub.f32 %v2761_v51, %v2843_v8 }
0x1c59   : > { %v4093_v7 = vpop.eup %4092  ;;  %v2857_v55 = vmul.f32 1.442695, %v2853_v5 }
0x1c5a   : > { %v2874_v36 = vsel %vm928_vm11, %v4093_v7, 0.0 }
0x1c5b   : > { %4094 = vpow2.f32 %v2857_v55  ;;  %2875 = vadd.xlane.f32.xlu0 %v2874_v36 }
0x1c61   : > { %v4095_v56 = vpop.eup %4094 }
0x1c62   : > { %v2865_v33 = vsel %vm928_vm11, %v4095_v56, 0.0 }
0x1c63   : > { %2866 = vadd.xlane.f32.xlu2 %v2865_v33 }
0x1c67   : > { %v2849_v54 = vpop.xlane.xlu1 %2848 }
0x1c68   : > { %v2855_v9 = vsub.f32 %v2813_v57, %v2849_v54 }
0x1c6a   : > { %v2861_v46 = vmul.f32 1.442695, %v2855_v9 }
0x1c6c   : > { %4096 = vpow2.f32 %v2861_v46 }
0x1c6f   : > { %2911 = vrot.lane.b32.xlu0 %v2732_v35, %s5589_s0  ;;  %v3062_v35 = vld [vmem:[#allocation5 + $0x30] sm:$0xff] }
0x1c72   : > { %v4097_v10 = vpop.eup %4096 }
0x1c73   : > { %v2871_v11 = vsel %vm928_vm11, %v4097_v10, 0.0 }
0x1c74   : > { %2872 = vadd.xlane.f32.xlu1 %v2871_v11 }
0x1c7b   : > { %2885 = vrot.lane.b32.xlu2 %v5249_v34, %s5589_s0  ;;  %v3063_v34 = vld [vmem:[#allocation5 + $0x38] sm:$0xff] }
0x1c7c   : > { %v3973_v39 = vpack.i.bf16 %v3062_v35, %v3063_v34 }
0x1c8d   : > { %3969 = vrot.lane.b32.xlu1 %v3968_v12, %s5589_s0 }
0x1cc8   : > { %v2870_v13 = vpop.xlane.xlu2 %2869 }
0x1cce   : > { %v2876_v15 = vpop.xlane.xlu0 %2875 }
0x1cd6   : > { %v2867_v14 = vpop.xlane.xlu2 %2866 }
0x1cd7   : > { %4098 = vrcp.f32 %v2867_v14 }
0x1cd8   : > { %4100 = vrcp.f32 %v2870_v13 }
0x1cd9   : > { %4102 = vrcp.f32 %v2876_v15 }
0x1cdd   : > { %v4099_v16 = vpop.eup %4098 }
0x1cde   : > { %v4101_v17 = vpop.eup %4100  ;;  %v2881_v18 = vmul.f32 %v4099_v16, %v4095_v56  ;;  %v2886_v21 = vpop.permute.xlu2 %2885 }
0x1cdf   : > { %2906 = vmatpush.msra.mxu0 %v2886_v21  ;;  %v2882_v49 = vmul.f32 %v4101_v17, %v4091_v2  ;;  %v4103_v0 = vpop.eup %4102  ;;  %v3028_v2 = vperm.slane %v5243_v20, 1 }
0x1ce0   : > { %3821 = vmatmul.msk.f32.vlgmr.msra.gmra.mxu0 %vm928_vm11, %v2881_v18  ;;  %v2884_v28 = vmul.f32 %v4103_v0, %v4093_v7  ;;  %v5351_v0 = vld [vmem:[%s5495_s20 + $0x18] sm:$0xf] }
0x1ce1   : > { %v2912_v19 = vpop.permute.xlu0 %2911  ;;  %3019 = vmatpush.msrb.mxu0 %v3811_v41 }
0x1ce2   : > { %2932 = vmatpush.msrb.mxu1 %v2912_v19 }
0x1ce3   : > { %3822 = vmatmul.msk.f32.vlgmr.msrb.gmra.mxu1 %vm928_vm11, %v2882_v49  ;;  %3020 = vmatpush.msrb.mxu0 %v3810_v42 }
0x1ce4   : > { %3085 = vmatpush.msra.mxu1 %v3063_v34 }
0x1ce5   : > { %3021 = vmatpush.msrb.mxu0 %v3809_v43 }
0x1ce6   : > { %3086 = vmatpush.msra.mxu1 %v3062_v35 }
0x1ce7   : > { %v2873_v22 = vpop.xlane.xlu1 %2872  ;;  %3022 = vmatpush.msrb.mxu0 %v3808_v45 }
0x1ce8   : > { %4104 = vrcp.f32 %v2873_v22  ;;  %3087 = vmatpush.msra.mxu1 %v3061_v37 }
0x1cea   : > { %3088 = vmatpush.msra.mxu1 %v3060_v38 }
0x1cee   : > { %v4105_v23 = vpop.eup %4104 }
0x1cef   : > { %v2883_v29 = vmul.f32 %v4105_v23, %v4097_v10 }
0x1cff   : > { %v3970_v25 = vpop.permute.xlu1 %3969 }
0x1d00   : > { %v3972_v24 = vunpack.i.h.bf16 %v3970_v25  ;;  %v3971_v27 = vunpack.i.l.bf16 %v3970_v25  ;;  %v3054_v25 = vperm.slane %v5351_v0, 0 }
0x1d02   : > { %2958 = vmatpush.msrb.mxu2 %v3971_v27  ;;  %2984 = vmatpush.msra.mxu3 %v3972_v24  ;;  %v3057_v27 = vperm.slane %v5351_v0, 1 }
0x1d03   : > { %3823 = vmatmul.msk.f32.vlgmr.msrb.gmra.mxu2 %vm928_vm11, %v2883_v29  ;;  %3824 = vmatmul.msk.f32.vlgmr.msra.gmra.mxu3 %vm928_vm11, %v2884_v28 }
0x1d5d   : > { %v2908_v50 = vpop.f32.mrf.mxu0 }
0x1d60   : > { %v2934_v31 = vpop.f32.mrf.mxu1 }
0x1d61   : > { %2990 = vrot.lane.b32.xlu0 %v2934_v31, %s5582_s13 }
0x1d86   : > { %v2960_v26 = vpop.f32.mrf.mxu2  ;;  %v2986_v44 = vpop.f32.mrf.mxu3 }
0x1d87   : > { %2998 = vrot.lane.b32.xlu0 %v2986_v44, %s5583_s4  ;;  %2994 = vrot.lane.b32.xlu1 %v2960_v26, %s5581_s15 }
0x1d8f   : > { %3974 = vrot.lane.b32.xlu0 %v3973_v39, %s5587_s29 }
0x1d97   : > { %3979 = vrot.lane.b32.xlu0 %v3978_v40, %s5587_s29 }
0x1d9f   : > { %3110 = vrot.lane.b32.xlu0 %v3069_v48, %s5587_s29 }
0x1dd3   : > { %v2991_v1 = vpop.permute.xlu0 %2990 }
0x1dd4   : > { %v3001_v51 = vsel %vm928_vm11, %v2908_v50, %v2991_v1 }
0x1df9   : > { %v2999_v52 = vpop.permute.xlu0 %2998  ;;  %v2995_v53 = vpop.permute.xlu1 %2994 }
0x1dfa   : > { %v3002_v57 = vsel %vm1192_vm12, %v3001_v51, %v2995_v53 }
0x1dfb   : > { %v3003_v58 = vsel %vm1194_vm13, %v3002_v57, %v2999_v52 }
0x1dfc   : > { %3825 = vmatmul.msk.f32.vlgmr.msrb.gmra.mxu0 %vm850_vm7, %v3003_v58 }
0x1e01   : > { %v3975_v47 = vpop.permute.xlu0 %3974 }
0x1e02   : > { %v3977_v59 = vunpack.i.h.bf16 %v3975_v47  ;;  %v3976_v60 = vunpack.i.l.bf16 %v3975_v47 }
0x1e04   : > { %3125 = vmatpush.msra.mxu2 %v3976_v60 }
0x1e06   : > { %3126 = vmatpush.msra.mxu2 %v3977_v59 }
0x1e09   : > { %v3980_v61 = vpop.permute.xlu0 %3979 }
0x1e0a   : > { %v3982_v62 = vunpack.i.h.bf16 %v3980_v61  ;;  %v3981_v63 = vunpack.i.l.bf16 %v3980_v61 }
0x1e0c   : > { %3127 = vmatpush.msra.mxu2 %v3981_v63 }
0x1e0e   : > { %3128 = vmatpush.msra.mxu2 %v3982_v62 }
0x1e0f   : > { %3827 = vmatmul.msk.f32.vlgmr.msra.gmra.mxu2 %vm850_vm7, %v5106_v30 }
0x1e11   : > { %v3111_v55 = vpop.permute.xlu0 %3110 }
0x1e79   : > { %v3024_v4 = vpop.f32.mrf.mxu0 }
0x1e7a   : > { %v3027_v8 = vadd.f32 %v3024_v4, %v5221_v3 }
0x1e7c   : > { %v5325_v5 = vadd.f32 %v3028_v2, %v3027_v8 }
0x1e7e   : > { %v3030_v7 = vsel %vm850_vm7, %v5325_v5, 0.0 }
0x1e7f   : > { %3031 = vadd.xlane.f32.xlu1 %v3030_v7 }
0x1e92   : > { %v3130_v36 = vpop.f32.mrf.mxu2 }
0x1e93   : > { %v5329_v56 = vadd.f32 %v3130_v36, %v3111_v55 }
0x1e95   : > { %3145 = vrot.lane.b32.xlu0 %v5329_v56, %s5586_s18  ;;  %3828 = vmatpush.xpose.msk.msrb.mxu3 %vm928_vm11, %v5329_v56 }
0x1e98   : > { %3141 = vrot.lane.b32.xlu1 %v5329_v56, %s5584_s12 }
0x1ef2   : > { %v3032_v30 = vpop.xlane.xlu1 %3031 }
0x1ef3   : > { %v3033_v3 = vmul.f32 %v3032_v30, %v4611_v32 }
0x1ef5   : > { %v3034_v33 = vsub.f32 %v5325_v5, %v3033_v3 }
0x1ef7   : > { %v3035_v54 = vmul.f32 %v3034_v33, %v3034_v33  ;;  %v3055_v24 = vmul.f32 %v3054_v25, %v3034_v33 }
0x1ef9   : > { %v3036_v9 = vsel %vm850_vm7, %v3035_v54, 0.0 }
0x1efa   : > { %3037 = vadd.xlane.f32.xlu2 %v3036_v9 }
0x1f07   : > { %v5340_v46 = vpop.permute.xlu0 %3145 }
0x1f08   : > { %3834 = vmatpush.xpose.msk.msrb.mxu2 %vm928_vm11, %v5340_v46 }
0x1f0a   : > { %v5344_v10 = vpop.permute.xlu1 %3141 }
0x1f0b   : > { %3830 = vmatpush.xpose.msk.msra.mxu0 %vm928_vm11, %v5344_v10 }
0x1f6d   : > { %v3038_v11 = vpop.xlane.xlu2 %3037 }
0x1f6e   : > { %v3039_v12 = vmul.f32 0.032258064, %v3038_v11  ;;  %v3983_v11 = vpack.i.bf16 %v5344_v10, %v5340_v46 }
0x1f70   : > { %4106 = vrsqrt.f32 %v3039_v12  ;;  %vm3047_vm1 = vcmp.eq.f32.partialorder %v3039_v12, inf  ;;  %v3050_v49 = vand.u32 2147483648, %v3039_v12  ;;  %vm3049_vm2 = vcmp.eq.f32.partialorder %v3039_v12, 0.0 }
0x1f76   : > { %v4107_v13 = vpop.eup %4106 }
0x1f77   : > { %v3041_v14 = vmul.f32 %v4107_v13, %v3039_v12 }
0x1f79   : > { %v3042_v15 = vmul.f32 %v4107_v13, %v3041_v14 }
0x1f7b   : > { %v3043_v16 = vmul.f32 0.5, %v3042_v15 }
0x1f7d   : > { %v3044_v17 = vsub.f32 1.5, %v3043_v16 }
0x1f7f   : > { %v3045_v18 = vmul.f32 %v4107_v13, %v3044_v17 }
0x1f81   : > { %v3046_v21 = vmul.f32 %v3045_v18, %v3039_v12 }
0x1f83   : > { %v3048_v19 = vsel %vm3047_vm1, %v3039_v12, %v3046_v21 }
0x1f84   : > { %v3051_v22 = vsel %vm3049_vm2, %v3050_v49, %v3048_v19 }
0x1f85   : > { %v3052_v23 = vadd.f32 1e-06, %v3051_v22 }
0x1f87   : > { %4108 = vrcp.f32 %v3052_v23 }
0x1f8d   : > { %v4109_v28 = vpop.eup %4108 }
0x1f8e   : > { %v3056_v29 = vmul.f32 %v4109_v28, %v3055_v24 }
0x1f90   : > { %v3058_v31 = vadd.f32 %v3057_v27, %v3056_v29 }
0x1f92   : > { %3826 = vmatmul.msk.f32.vlgmr.msra.gmra.mxu1 %vm850_vm7, %v3058_v31  ;;  %v3068_v31 = vld [vmem:[#allocation8 + $0x38] sm:$0xff] }
0x200f   : > { %v3090_v34 = vpop.f32.mrf.mxu1 }
0x2010   : > { %v3091_v35 = vadd.f32 %v3090_v34, %v3069_v48  ;;  %v3067_v34 = vld [vmem:[#allocation8 + $0x30] sm:$0xff] }
0x2012   : > { %3134 = vrot.lane.b32.xlu2 %v3091_v35, %s5584_s12  ;;  %3138 = vrot.lane.b32.xlu0 %v3091_v35, %s5586_s18  ;;  %s5597_s12 = sld [smem:[#allocation41_spill]] }
0x2013   : > { %3829 = vmatmul.msk.f32.vlgmr.msrb.gmra.mxu3 %vm928_vm11, %v3091_v35 }
0x2018   : > { %s4268_s17 = scalar_lea.hbm %s5597_s12, 16 }
0x201a   : > { %3143 = vrot.lane.b32.xlu0 %v5329_v56, %s5585_s7 }
0x2022   : > { %3136 = vrot.lane.b32.xlu0 %v3091_v35, %s5585_s7  ;;  %v3066_v35 = vld [vmem:[#allocation8 + $0x28] sm:$0xff] }
0x206c   : > { %v3135_v37 = vpop.permute.xlu2 %3134 }
0x206d   : > { %3831 = vmatmul.msk.f32.vlgmr.msra.gmra.mxu0 %vm928_vm11, %v3135_v37  ;;  %v3065_v37 = vld [vmem:[#allocation8 + $0x20] sm:$0xff] }
0x2084   : > { %v3139_v38 = vpop.permute.xlu0 %3138 }
0x2085   : > { %3835 = vmatmul.msk.f32.vlgmr.msrb.gmra.mxu2 %vm928_vm11, %v3139_v38 }
0x208c   : > { %v3144_v26 = vpop.permute.xlu0 %3143 }
0x208d   : > { %3832 = vmatpush.xpose.msk.msrb.mxu1 %vm928_vm11, %v3144_v26 }
0x2094   : > { %v3137_v44 = vpop.permute.xlu0 %3136 }
0x2095   : > { %3833 = vmatmul.msk.f32.vlgmr.msrb.gmra.mxu1 %vm928_vm11, %v3137_v44 }
0x2096   : > { %v3168_v48 = vpop.f32.mrf.mxu3 }
0x2097   : > { %v3169_v1 = vadd.f32 %v3168_v48, %v5150_v6 }
0x2099   : > { %v3243_v52 = vsel %vm928_vm11, %v3169_v1, -inf }
0x20ea   : > { %v3192_v39 = vpop.f32.mrf.mxu0 }
0x20eb   : > { %v3193_v40 = vadd.f32 %v3192_v39, %v5150_v6 }
0x20ed   : > { %v3246_v41 = vsel %vm928_vm11, %v3193_v40, -inf }
0x20ee   : > { %3247 = vmax.xlane.f32.xlu1 %v3246_v41 }
0x2108   : > { %v3240_v42 = vpop.f32.mrf.mxu2 }
0x2109   : > { %v3241_v43 = vadd.f32 %v3240_v42, %v5150_v6 }
0x210b   : > { %v3252_v45 = vsel %vm928_vm11, %v3241_v43, -inf }
0x210c   : > { %3253 = vmax.xlane.f32.xlu0 %v3252_v45 }
0x2112   : > { %v3216_v50 = vpop.f32.mrf.mxu1 }
0x2113   : > { %v3217_v51 = vadd.f32 %v3216_v50, %v5150_v6 }
0x2114   : > { %3244 = vmax.xlane.f32.xlu0 %v3243_v52 }
0x2115   : > { %v3249_v53 = vsel %vm928_vm11, %v3217_v51, -inf }
0x2116   : > { %3250 = vmax.xlane.f32.xlu2 %v3249_v53 }
0x2161   : > { %v3248_v57 = vpop.xlane.xlu1 %3247 }
0x2162   : > { %v3256_v58 = vsub.f32 %v3193_v40, %v3248_v57 }
0x2164   : > { %v3261_v47 = vmul.f32 1.442695, %v3256_v58 }
0x2166   : > { %4110 = vpow2.f32 %v3261_v47  ;;  %v3465_v47 = vld [vmem:[#allocation10 + $0x38] sm:$0xff] }
0x216c   : > { %v4111_v59 = vpop.eup %4110 }
0x216d   : > { %v3270_v60 = vsel %vm928_vm11, %v4111_v59, 0.0 }
0x216e   : > { %3271 = vadd.xlane.f32.xlu2 %v3270_v60  ;;  %v3463_v60 = vld [vmem:[#allocation10 + $0x28] sm:$0xff] }
0x217f   : > { %v3254_v61 = vpop.xlane.xlu0 %3253 }
0x2180   : > { %v3258_v62 = vsub.f32 %v3241_v43, %v3254_v61  ;;  %v3430_v43 = vperm.slane %v5243_v20, 3 }
0x2182   : > { %v3265_v63 = vmul.f32 1.442695, %v3258_v62 }
0x2184   : > { %4112 = vpow2.f32 %v3265_v63  ;;  %v3849_v63 = vld [vmem:[%s5593_s2 + $0x78] sm:$0xff] }
0x2186   : > { %3339 = vrot.lane.b32.xlu2 %v3144_v26, %s5587_s29 }
0x2187   : > { %v3245_v6 = vpop.xlane.xlu0 %3244 }
0x2188   : > { %v3255_v55 = vsub.f32 %v3169_v1, %v3245_v6  ;;  %v3848_v6 = vld [vmem:[%s5593_s2 + $0x70] sm:$0xff] }
0x2189   : > { %v3251_v2 = vpop.xlane.xlu2 %3250 }
0x218a   : > { %v4113_v4 = vpop.eup %4112  ;;  %v3257_v8 = vsub.f32 %v3217_v51, %v3251_v2  ;;  %v3259_v30 = vmul.f32 1.442695, %v3255_v55  ;;  %v3847_v2 = vld [vmem:[%s5593_s2 + $0x68] sm:$0xff]  ;;  %v3845_v55 = vld [vmem:[%s5593_s2 + $0x58] sm:$0xff] }
0x218b   : > { %v3276_v7 = vsel %vm928_vm11, %v4113_v4, 0.0 }
0x218c   : > { %v3263_v36 = vmul.f32 1.442695, %v3257_v8  ;;  %3277 = vadd.xlane.f32.xlu1 %v3276_v7  ;;  %v3846_v8 = vld [vmem:[%s5593_s2 + $0x60] sm:$0xff] }
0x218e   : > { %4114 = vpow2.f32 %v3263_v36 }
0x218f   : > { %4116 = vpow2.f32 %v3259_v30 }
0x2194   : > { %v4115_v3 = vpop.eup %4114 }
0x2195   : > { %v3273_v33 = vsel %vm928_vm11, %v4115_v3, 0.0  ;;  %v4117_v54 = vpop.eup %4116 }
0x2196   : > { %3274 = vadd.xlane.f32.xlu0 %v3273_v33  ;;  %v3267_v9 = vsel %vm928_vm11, %v4117_v54, 0.0 }
0x219e   : > { %3268 = vadd.xlane.f32.xlu0 %v3267_v9 }
0x21a5   : > { %3984 = vrot.lane.b32.xlu1 %v3983_v11, %s5587_s29 }
0x21b2   : > { %3287 = vrot.lane.b32.xlu0 %v5329_v56, %s5587_s29  ;;  %s711_s29 = scalar_lea.vmem [#allocation11], %s3713_s19 }
0x21b3   : > { %s3570_s5 = sshll.u32 %s711_s29, 4  ;;  %s3571_s5 = int_to_ptr.vmem [resolvable:$true] %s3570_s5 }
0x21e1   : > { %v3272_v12 = vpop.xlane.xlu2 %3271 }
0x21e9   : > { %v3340_v13 = vpop.permute.xlu2 %3339 }
0x21ea   : > { %3360 = vmatpush.msra.mxu1 %v3340_v13 }
0x21ec   : > { %3511 = vmatpush.msrb.mxu1 %v3849_v63 }
0x21ee   : > { %3512 = vmatpush.msrb.mxu1 %v3848_v6 }
0x21f0   : > { %3513 = vmatpush.msrb.mxu1 %v3847_v2 }
0x21f2   : > { %3514 = vmatpush.msrb.mxu1 %v3846_v8 }
0x21f4   : > { %3515 = vmatpush.msrb.mxu1 %v3845_v55 }
0x21ff   : > { %v3278_v15 = vpop.xlane.xlu1 %3277 }
0x2209   : > { %v3275_v14 = vpop.xlane.xlu0 %3274 }
0x220a   : > { %4118 = vrcp.f32 %v3275_v14  ;;  %v3456_v14 = vperm.slane %v5351_v0, 2 }
0x220b   : > { %4120 = vrcp.f32 %v3272_v12 }
0x220c   : > { %4122 = vrcp.f32 %v3278_v15 }
0x2210   : > { %v4119_v16 = vpop.eup %4118 }
0x2211   : > { %v3285_v17 = vmul.f32 %v4119_v16, %v4115_v3  ;;  %v4121_v18 = vpop.eup %4120  ;;  %v3269_v10 = vpop.xlane.xlu0 %3268  ;;  %v3459_v16 = vperm.slane %v5351_v0, 3  ;;  %v3466_v0 = vperm.slane %v5243_v20, 4 }
0x2212   : > { %v4123_v21 = vpop.eup %4122  ;;  %v3284_v22 = vmul.f32 %v4121_v18, %v4111_v59  ;;  %4124 = vrcp.f32 %v3269_v10  ;;  %v3464_v59 = vld [vmem:[#allocation10 + $0x30] sm:$0xff]  ;;  %v3843_v10 = vld [vmem:[%s5593_s2 + $0x48] sm:$0xff] }
0x2213   : > { %3838 = vmatmul.msk.f32.vlgmr.msra.gmra.mxu1 %vm928_vm11, %v3285_v17  ;;  %v3286_v56 = vmul.f32 %v4123_v21, %v4113_v4 }
0x2217   : > { %v3985_v46 = vpop.permute.xlu1 %3984 }
0x2218   : > { %v3987_v49 = vunpack.i.h.bf16 %v3985_v46  ;;  %v3986_v19 = vunpack.i.l.bf16 %v3985_v46  ;;  %v4125_v23 = vpop.eup %4124  ;;  %v3844_v46 = vld [vmem:[%s5593_s2 + $0x50] sm:$0xff] }
0x2219   : > { %v3283_v25 = vmul.f32 %v4125_v23, %v4117_v54  ;;  %3516 = vmatpush.msrb.mxu1 %v3844_v46  ;;  %v3524_v23 = vperm.slane %v5243_v20, 5 }
0x221a   : > { %3334 = vmatpush.msrb.mxu0 %v3987_v49  ;;  %3386 = vmatpush.msra.mxu2 %v3986_v19  ;;  %v3842_v49 = vld [vmem:[%s5593_s2 + $0x40] sm:$0xff] }
0x221b   : > { %3837 = vmatmul.msk.f32.vlgmr.msrb.gmra.mxu0 %vm928_vm11, %v3284_v22  ;;  %3839 = vmatmul.msk.f32.vlgmr.msra.gmra.mxu2 %vm928_vm11, %v3286_v56 }
0x221c   : > { %3482 = vmatpush.msra.mxu0 %v3465_v47  ;;  %3517 = vmatpush.msrb.mxu1 %v3843_v10 }
0x221e   : > { %3483 = vmatpush.msra.mxu0 %v3464_v59  ;;  %3518 = vmatpush.msrb.mxu1 %v3842_v49 }
0x2220   : > { %3484 = vmatpush.msra.mxu0 %v3463_v60 }
0x2224   : > { %v3288_v24 = vpop.permute.xlu0 %3287 }
0x2225   : > { %3308 = vmatpush.msra.mxu3 %v3288_v24 }
0x2226   : > { %3836 = vmatmul.msk.f32.vlgmr.msra.gmra.mxu3 %vm928_vm11, %v3283_v25 }
0x2227   : > { %3421 = vmatpush.msrb.mxu3 %v3068_v31 }
0x2229   : > { %3422 = vmatpush.msrb.mxu3 %v3067_v34 }
0x222b   : > { %3423 = vmatpush.msrb.mxu3 %v3066_v35 }
0x222d   : > { %3424 = vmatpush.msrb.mxu3 %v3065_v37 }
0x2290   : > { %v3362_v27 = vpop.f32.mrf.mxu1 }
0x2291   : > { %3396 = vrot.lane.b32.xlu2 %v3362_v27, %s5581_s15  ;;  %s3852_s15 = sshll.u32 %s5595_s1, 3 }
0x2292   : > { %s3568_s7 = scalar_lea.hbm %s5597_s12, %s3852_s15 }
0x2293   : > { %s3572_s27 = sshll.u32 %s3568_s7, 4  ;;  %s3573_s27 = int_to_ptr.hbm [resolvable:$true] %s3572_s27 }
0x2294   : > { %s4262_s26 = sshra.s32 %s3573_s27, 4  ;;  %s4263_s26 = int_to_ptr.hbm [resolvable:$true] %s4262_s26 }
0x2295   : > { %s4264_s3 = scalar_lea.hbm %s4263_s26, 8  ;;  %p4269_p3 = scmp.lt.s32.totalorder %s4263_s26, %s5597_s12 }
0x2296   : > { %p4265_p0 = scmp.ne.s32.totalorder %s4263_s26, %s4264_s3  ;;  %p4270_p4 = scmp.lt.s32.totalorder %s4268_s17, %s4264_s3 }
0x2298   : > { %v3336_v28 = vpop.f32.mrf.mxu0  ;;  %p4266_p1 = pnand %p4265_p0, %p4497_p5  ;;  %p4271_p7 = por %p4270_p4, %p4269_p3 }
0x2299   : > { %3392 = vrot.lane.b32.xlu1 %v3336_v28, %s5582_s13 }
0x229a   : > { %p4267_p2 = pneg %p4266_p1 }
0x229c   : > { %p4272_p8 = pnand %p4271_p7, %p4267_p2 }
0x229e   : > { %v3388_v29 = vpop.f32.mrf.mxu2 }
0x229f   : > { %3400 = vrot.lane.b32.xlu0 %v3388_v29, %s5583_s4 }
0x22a9   : > { %v3310_v26 = vpop.f32.mrf.mxu3 }
0x22eb   : > { %v3397_v39 = vpop.permute.xlu2 %3396 }
0x230b   : > { %v3393_v38 = vpop.permute.xlu1 %3392 }
0x230c   : > { %v3403_v44 = vsel %vm928_vm11, %v3310_v26, %v3393_v38 }
0x230d   : > { %v3404_v40 = vsel %vm1192_vm12, %v3403_v44, %v3397_v39 }
0x2311   : > { %v3401_v41 = vpop.permute.xlu0 %3400 }
0x2312   : > { %v3405_v42 = vsel %vm1194_vm13, %v3404_v40, %v3401_v41 }
0x2313   : > { %3840 = vmatmul.msk.f32.vlgmr.msrb.gmra.mxu3 %vm850_vm7, %v3405_v42 }
0x2396   : > { %v3426_v45 = vpop.f32.mrf.mxu3 }
0x2397   : > { %v3429_v48 = vadd.f32 %v3426_v45, %v5325_v5  ;;  %v3462_v5 = vld [vmem:[#allocation10 + $0x20] sm:$0xff] }
0x2398   : > { %3485 = vmatpush.msra.mxu0 %v3462_v5 }
0x2399   : > { %v5399_v1 = vadd.f32 %v3430_v43, %v3429_v48 }
0x239b   : > { %v3432_v50 = vsel %vm850_vm7, %v5399_v1, 0.0 }
0x239c   : > { %3433 = vadd.xlane.f32.xlu1 %v3432_v50 }
0x240f   : > { %v3434_v51 = vpop.xlane.xlu1 %3433 }
0x2410   : > { %v3435_v52 = vmul.f32 %v3434_v51, %v4611_v32 }
0x2412   : > { %v3436_v53 = vsub.f32 %v5399_v1, %v3435_v52 }
0x2414   : > { %v3437_v57 = vmul.f32 %v3436_v53, %v3436_v53  ;;  %v3457_v15 = vmul.f32 %v3456_v14, %v3436_v53 }
0x2416   : > { %v3438_v58 = vsel %vm850_vm7, %v3437_v57, 0.0 }
0x2417   : > { %3439 = vadd.xlane.f32.xlu2 %v3438_v58 }
0x248a   : > { %v3440_v61 = vpop.xlane.xlu2 %3439 }
0x248b   : > { %v3441_v62 = vmul.f32 0.032258064, %v3440_v61 }
0x248d   : > { %4126 = vrsqrt.f32 %v3441_v62  ;;  %vm3449_vm11 = vcmp.eq.f32.partialorder %v3441_v62, inf  ;;  %v3452_v9 = vand.u32 2147483648, %v3441_v62  ;;  %vm3451_vm12 = vcmp.eq.f32.partialorder %v3441_v62, 0.0 }
0x2493   : > { %v4127_v4 = vpop.eup %4126 }
0x2494   : > { %v3443_v7 = vmul.f32 %v4127_v4, %v3441_v62 }
0x2496   : > { %v3444_v36 = vmul.f32 %v4127_v4, %v3443_v7 }
0x2498   : > { %v3445_v30 = vmul.f32 0.5, %v3444_v36 }
0x249a   : > { %v3446_v3 = vsub.f32 1.5, %v3445_v30 }
0x249c   : > { %v3447_v33 = vmul.f32 %v4127_v4, %v3446_v3 }
0x249e   : > { %v3448_v54 = vmul.f32 %v3447_v33, %v3441_v62 }
0x24a0   : > { %v3450_v11 = vsel %vm3449_vm11, %v3441_v62, %v3448_v54 }
0x24a1   : > { %v3453_v12 = vsel %vm3451_vm12, %v3452_v9, %v3450_v11 }
0x24a2   : > { %v3454_v13 = vadd.f32 1e-06, %v3453_v12 }
0x24a4   : > { %4128 = vrcp.f32 %v3454_v13 }
0x24aa   : > { %v4129_v17 = vpop.eup %4128 }
0x24ab   : > { %v3458_v18 = vmul.f32 %v4129_v17, %v3457_v15 }
0x24ad   : > { %v3460_v21 = vadd.f32 %v3459_v16, %v3458_v18 }
0x24af   : > { %3841 = vmatmul.msk.f32.vlgmr.msra.gmra.mxu0 %vm850_vm7, %v3460_v21 }
0x252c   : > { %v3487_v19 = vpop.f32.mrf.mxu0 }
0x252d   : > { %v3488_v22 = vadd.f32 %v3487_v19, %v3466_v0 }
0x252f   : > { %v3490_v56 = vmax.f32 %v3488_v22, 0.0 }
0x2531   : > { %3850 = vmatmul.msk.f32.vlgmr.msrb.gmra.mxu1 %vm1288_vm8, %v3490_v56 }
0x25ae   : > { %v3520_v25 = vpop.f32.mrf.mxu1 }
0x25af   : > { %v3523_v24 = vadd.f32 %v3520_v25, %v5399_v1  ;;  %v3526_v1 = vld [vmem:[%s5596_s28] sm:$0x3] }
0x25b0   : > { %v3551_v51 = vperm.slane %v3526_v1, 0  ;;  %v3554_v52 = vperm.slane %v3526_v1, 1 }
0x25b1   : > { %v3525_v27 = vadd.f32 %v3524_v23, %v3523_v24 }
0x25b3   : > { %v3527_v28 = vsel %vm850_vm7, %v3525_v27, 0.0 }
0x25b4   : > { %3528 = vadd.xlane.f32.xlu0 %v3527_v28 }
0x2627   : > { %v3529_v29 = vpop.xlane.xlu0 %3528 }
0x2628   : > { %v3530_v31 = vmul.f32 %v3529_v29, %v4611_v32 }
0x262a   : > { %v3531_v34 = vsub.f32 %v3525_v27, %v3530_v31 }
0x262c   : > { %v3532_v35 = vmul.f32 %v3531_v34, %v3531_v34  ;;  %v3552_v53 = vmul.f32 %v3551_v51, %v3531_v34 }
0x262e   : > { %v3533_v37 = vsel %vm850_vm7, %v3532_v35, 0.0 }
0x262f   : > { %3534 = vadd.xlane.f32.xlu1 %v3533_v37 }
0x26a2   : > { %v3535_v38 = vpop.xlane.xlu1 %3534 }
0x26a3   : > { %v3536_v26 = vmul.f32 0.032258064, %v3535_v38 }
0x26a5   : > { %4130 = vrsqrt.f32 %v3536_v26  ;;  %vm3544_vm13 = vcmp.eq.f32.partialorder %v3536_v26, inf  ;;  %v3547_v45 = vand.u32 2147483648, %v3536_v26  ;;  %vm3546_vm8 = vcmp.eq.f32.partialorder %v3536_v26, 0.0 }
0x26ab   : > { %v4131_v20 = vpop.eup %4130 }
0x26ac   : > { %v3538_v44 = vmul.f32 %v4131_v20, %v3536_v26 }
0x26ae   : > { %v3539_v39 = vmul.f32 %v4131_v20, %v3538_v44 }
0x26b0   : > { %v3540_v40 = vmul.f32 0.5, %v3539_v39 }
0x26b2   : > { %v3541_v41 = vsub.f32 1.5, %v3540_v40 }
0x26b4   : > { %v3542_v42 = vmul.f32 %v4131_v20, %v3541_v41 }
0x26b6   : > { %v3543_v43 = vmul.f32 %v3542_v42, %v3536_v26 }
0x26b8   : > { %v3545_v32 = vsel %vm3544_vm13, %v3536_v26, %v3543_v43 }
0x26b9   : > { %v3548_v48 = vsel %vm3546_vm8, %v3547_v45, %v3545_v32 }
0x26ba   : > { %v3549_v50 = vadd.f32 1e-06, %v3548_v48 }
0x26bc   : > { %4132 = vrcp.f32 %v3549_v50 }
0x26c2   : > { %v4133_v57 = vpop.eup %4132 }
0x26c3   : > { %v3553_v58 = vmul.f32 %v4133_v57, %v3552_v53 }
0x26c5   : > { %v3555_v47 = vadd.f32 %v3554_v52, %v3553_v58 }
0x26c7   : > { %3556 = vst.msk [vmem:[%s711_s29] sm:$0xff] %vm850_vm7, %v3555_v47 }
0x26c8   : > { %4275 = shalt.err (!%p4272_p8)
}
0x26c9   : > { %3867 = dma.vmem_to_hbm [thread:$0]  (%p4497_p5), %s3571_s5, 128, %s3573_s27, %s3558_s24  }
0x26ca PF: > { %s5599_s1 = sld [smem:[#allocation19_spill]] }
0x26cb   : > { %s5600_s6 = sld [smem:[#allocation16_spill]] }
0x26d0   : > { %p3889_p9 = scmp.ge.s32.totalorder %s5599_s1, 2 }
0x26d1   : > { %s3584_s23 = sand.u32 1, %s5600_s6  }
0x26d2   : > { %p3880_p10 = pnand %p3889_p9, %p4501_p6  ;;  %s3585_s28 = scalar_lea.sflag [#allocation7], %s3584_s23 }
0x26d4   : > { %p3881_p11 = pneg %p3880_p10 }
0x26d6   : > { %4303 = dma.done.wait (%p3881_p11), %s3585_s28, 128  }
0x26d7   : > { %4305 = vsyncadd (%p3881_p11), %s3585_s28, 4294967168  ;;  %s5602_s1 = sld [smem:[#allocation21_spill]] }
0x26d8   : > { %s5603_s6 = sld [smem:[#allocation17_spill]] }
0x26d9   : > { %s5604_s24 = sld [smem:[#allocation18_spill]] }
0x26da   : > { %s5605_s7 = sld [smem:[#allocation22_spill]] }
0x26dd   : > { %p47_p12 = scmp.ge.s32.totalorder %s5602_s1, 4  }
0x26df   :  { %49 = sbr.rel (!%p47_p12) target bundleno = 35 (0x23), region = 182 }
0x26e4   :  { %3591 = vsyncpa [#allocation6], 1 }
0x26e5   :  { %3593 = vsyncpa [#allocation6 + $0x1], 1 }
0x26e6   :  { %3594 = vsyncpa [#allocation9], 1 }
0x26e7   :  { %3595 = vsyncpa [#allocation7], 1 }
0x26e8   :  { %3597 = vsyncpa [#allocation7 + $0x1], 1 }

</bundles_post_ra>
